<compile_context>
chip_gen: v6e
topology: v6e:2x2x1
jax: 0.10.0
libtpu: 0.0.40
codegen_flags: <defaults>
</compile_context>

<pallas_src>
import math
import functools
from dataclasses import dataclass

import jax
import jax.numpy as jnp
from jax.experimental import pallas as pl
from jax.experimental.pallas import tpu as pltpu


# ----------------------------- Pallas kernels ------------------------------

def _attn_block_kernel(*refs, n_heads, d_kv, eps, self_attn, causal, use_pos):
    """Fused: rmsnorm -> q/k/v -> multi-head attention -> o-proj -> residual add.

    Runs for one batch element (all heads together)."""
    refs = list(refs)
    x_ref = refs.pop(0)
    kv_ref = x_ref if self_attn else refs.pop(0)
    mask_ref = refs.pop(0)                      # (1, 1, Sk) additive key-padding mask
    pos_ref = refs.pop(0) if use_pos else None  # (1, H, Sq, Sk) relative position bias
    ln_ref, wq_ref, wk_ref, wv_ref, wo_ref, o_ref = refs

    x = x_ref[0]                                # (Sq, d) f32
    ln = ln_ref[...]                            # (1, d)  f32

    def rms(t):
        var = jnp.mean(t * t, axis=-1, keepdims=True)
        return t * jax.lax.rsqrt(var + eps) * ln

    xn = rms(x)
    kvn = xn if self_attn else kv_ref[0]        # cross-attn kv (encoder out) is not re-normed

    xb = xn.astype(jnp.bfloat16)
    kvb = kvn.astype(jnp.bfloat16)
    # bf16 MXU inputs, f32 accumulation
    q = jnp.dot(xb, wq_ref[...], preferred_element_type=jnp.float32)   # (Sq, H*dk)
    k = jnp.dot(kvb, wk_ref[...], preferred_element_type=jnp.float32)  # (Sk, H*dk)
    v = jnp.dot(kvb, wv_ref[...], preferred_element_type=jnp.float32)  # (Sk, H*dk)

    Sq = x.shape[0]
    Sk = kvn.shape[0]
    key_mask = mask_ref[0]                      # (1, Sk) f32 additive, broadcast over rows
    if causal:
        rows = jax.lax.broadcasted_iota(jnp.int32, (Sq, Sk), 0)
        cols = jax.lax.broadcasted_iota(jnp.int32, (Sq, Sk), 1)
        causal_add = jnp.where(cols <= rows, 0.0, -1e9).astype(jnp.float32)

    heads_out = []
    for h in range(n_heads):                    # static unroll over heads
        lo = h * d_kv
        qh = q[:, lo:lo + d_kv].astype(jnp.bfloat16)
        kh = k[:, lo:lo + d_kv].astype(jnp.bfloat16)
        vh = v[:, lo:lo + d_kv].astype(jnp.bfloat16)
        # QK^T via dot_general contracting last dims (no materialized transpose);
        # T5 uses no 1/sqrt(dk) scaling.
        s = jax.lax.dot_general(qh, kh, (((1,), (1,)), ((), ())),
                                preferred_element_type=jnp.float32)    # (Sq, Sk) f32
        s = s + key_mask
        if use_pos:
            s = s + pos_ref[0, h]
        if causal:
            s = s + causal_add
        m = jnp.max(s, axis=-1, keepdims=True)
        p = jnp.exp(s - m)
        l = jnp.sum(p, axis=-1, keepdims=True)  # >= 1 by construction (max subtracted)
        p = p * pl.reciprocal(l, approx=True)
        heads_out.append(jnp.dot(p.astype(jnp.bfloat16), vh,
                                 preferred_element_type=jnp.float32))  # (Sq, dk)

    attn = jnp.concatenate(heads_out, axis=-1)                         # (Sq, H*dk)
    out = jnp.dot(attn.astype(jnp.bfloat16), wo_ref[...],
                  preferred_element_type=jnp.float32)                  # (Sq, d)
    o_ref[0] = x + out                                                 # residual add


def attn_block(x, ln, wq, wk, wv, wo, mask_add, *, cfg, kv=None, pos=None, causal=False):
    """x: (B, Sq, d); kv: None (self-attn) or (B, Sk, d); mask_add: (B, 1, Sk) additive;
    pos: None or (1, H, Sq, Sk). Returns x + Attention(rmsnorm(x), ...)."""
    self_attn = kv is None
    B, Sq, d = x.shape
    Sk = Sq if self_attn else kv.shape[1]
    H, dk = cfg.n_heads, cfg.d_kv
    inner = H * dk

    args = [x.astype(jnp.float32)]
    in_specs = [pl.BlockSpec((1, Sq, d), lambda b: (b, 0, 0))]
    if not self_attn:
        args.append(kv.astype(jnp.float32))
        in_specs.append(pl.BlockSpec((1, Sk, d), lambda b: (b, 0, 0)))
    args.append(mask_add.astype(jnp.float32))
    in_specs.append(pl.BlockSpec((1, 1, Sk), lambda b: (b, 0, 0)))
    if pos is not None:
        args.append(pos.astype(jnp.float32))
        in_specs.append(pl.BlockSpec((1, H, Sq, Sk), lambda b: (0, 0, 0, 0)))
    args += [ln.reshape(1, d).astype(jnp.float32), wq, wk, wv, wo]  # w* already bf16
    in_specs += [pl.BlockSpec((1, d), lambda b: (0, 0)),
                 pl.BlockSpec((d, inner), lambda b: (0, 0)),
                 pl.BlockSpec((d, inner), lambda b: (0, 0)),
                 pl.BlockSpec((d, inner), lambda b: (0, 0)),
                 pl.BlockSpec((inner, d), lambda b: (0, 0))]

    kernel = functools.partial(_attn_block_kernel, n_heads=H, d_kv=dk, eps=cfg.eps,
                               self_attn=self_attn, causal=causal,
                               use_pos=pos is not None)
    return pl.pallas_call(
        kernel,
        out_shape=jax.ShapeDtypeStruct((B, Sq, d), jnp.float32),
        grid=(B,),
        in_specs=in_specs,
        out_specs=pl.BlockSpec((1, Sq, d), lambda b: (b, 0, 0)),
        compiler_params=pltpu.CompilerParams(dimension_semantics=("parallel",)),
    )(*args)


def _ffn_block_kernel(x_ref, ln_ref, wi_ref, wo_ref, o_ref, *, eps):
    """Fused: rmsnorm -> wi -> ReLU -> wo -> residual add."""
    x = x_ref[...]                              # (tn, d) f32
    ln = ln_ref[...]
    var = jnp.mean(x * x, axis=-1, keepdims=True)
    xn = x * jax.lax.rsqrt(var + eps) * ln
    h = jnp.dot(xn.astype(jnp.bfloat16), wi_ref[...],
                preferred_element_type=jnp.float32)
    h = jnp.maximum(h, 0.0)                     # T5 DenseReluDense
    y = jnp.dot(h.astype(jnp.bfloat16), wo_ref[...],
                preferred_element_type=jnp.float32)
    o_ref[...] = x + y


def ffn_block(x, ln, wi, wo, *, eps, row_tile=256):
    B, S, d = x.shape
    N = B * S
    d_ff = wi.shape[1]
    tn = row_tile if (N % row_tile == 0) else N
    out = pl.pallas_call(
        functools.partial(_ffn_block_kernel, eps=eps),
        out_shape=jax.ShapeDtypeStruct((N, d), jnp.float32),
        grid=(N // tn,),
        in_specs=[pl.BlockSpec((tn, d), lambda i: (i, 0)),
                  pl.BlockSpec((1, d), lambda i: (0, 0)),
                  pl.BlockSpec((d, d_ff), lambda i: (0, 0)),
                  pl.BlockSpec((d_ff, d), lambda i: (0, 0))],
        out_specs=pl.BlockSpec((tn, d), lambda i: (i, 0)),
        compiler_params=pltpu.CompilerParams(dimension_semantics=("parallel",)),
    )(x.reshape(N, d).astype(jnp.float32),
      ln.reshape(1, d).astype(jnp.float32), wi, wo)
    return out.reshape(B, S, d)


def _rmsnorm_kernel(x_ref, w_ref, o_ref, *, eps):
    x = x_ref[...]
    var = jnp.mean(x * x, axis=-1, keepdims=True)
    o_ref[...] = x * jax.lax.rsqrt(var + eps) * w_ref[...]


def rmsnorm(x, w, eps, row_tile=256):
    """T5 LayerNorm (no mean subtraction). Used only for the encoder final norm."""
    B, S, d = x.shape
    N = B * S
    tn = row_tile if (N % row_tile == 0) else N
    out = pl.pallas_call(
        functools.partial(_rmsnorm_kernel, eps=eps),
        out_shape=jax.ShapeDtypeStruct((N, d), jnp.float32),
        grid=(N // tn,),
        in_specs=[pl.BlockSpec((tn, d), lambda i: (i, 0)),
                  pl.BlockSpec((1, d), lambda i: (0, 0))],
        out_specs=pl.BlockSpec((tn, d), lambda i: (i, 0)),
        compiler_params=pltpu.CompilerParams(dimension_semantics=("parallel",)),
    )(x.reshape(N, d).astype(jnp.float32), w.reshape(1, d).astype(jnp.float32))
    return out.reshape(B, S, d)


def _lm_head_kernel(x_ref, ln_ref, emb_ref, o_ref, *, eps, scale):
    """Fused: decoder-final rmsnorm -> d_model**-0.5 scale -> logits = x @ shared^T
    (contraction on emb axis 1, no materialized transpose)."""
    x = x_ref[...]                              # (tm, d) f32
    ln = ln_ref[...]
    var = jnp.mean(x * x, axis=-1, keepdims=True)
    xn = (x * jax.lax.rsqrt(var + eps) * ln) * scale
    o_ref[...] = jax.lax.dot_general(
        xn.astype(jnp.bfloat16), emb_ref[...],
        (((1,), (1,)), ((), ())),
        preferred_element_type=jnp.float32)


def lm_head(x, ln, emb_bf16, *, eps, d_model, row_tile=256, vocab_tile=512):
    B, S, d = x.shape
    M = B * S
    V = emb_bf16.shape[0]
    tm = row_tile if (M % row_tile == 0) else M
    tv = vocab_tile if (V % vocab_tile == 0) else V
    out = pl.pallas_call(
        functools.partial(_lm_head_kernel, eps=eps, scale=d_model ** -0.5),
        out_shape=jax.ShapeDtypeStruct((M, V), jnp.float32),
        grid=(M // tm, V // tv),
        in_specs=[pl.BlockSpec((tm, d), lambda i, j: (i, 0)),
                  pl.BlockSpec((1, d), lambda i, j: (0, 0)),
                  pl.BlockSpec((tv, d), lambda i, j: (j, 0))],
        out_specs=pl.BlockSpec((tm, tv), lambda i, j: (i, j)),
        compiler_params=pltpu.CompilerParams(
            dimension_semantics=("parallel", "parallel")),
    )(x.reshape(M, d).astype(jnp.float32),
      ln.reshape(1, d).astype(jnp.float32), emb_bf16)
    return out.reshape(B, S, V)


# ------------------------------ model glue ---------------------------------

@dataclass(frozen=True)
class T5Cfg:
    vocab: int = 128
    d_model: int = 32
    d_kv: int = 8
    n_heads: int = 4
    d_ff: int = 64
    num_layers: int = 2
    num_decoder_layers: int = 2
    num_buckets: int = 32
    max_distance: int = 128
    eps: float = 1e-6


def init_t5_params(key, cfg):
    keys = iter(jax.random.split(key, 64))

    def nrm(shape, scale=0.02, dtype=jnp.float32):
        return (jax.random.normal(next(keys), shape, jnp.float32) * scale).astype(dtype)

    inner = cfg.n_heads * cfg.d_kv

    def attn_p():
        # matmul weights stored in bf16 (MXU inputs); accumulation stays f32 in-kernel
        return {'q': nrm((cfg.d_model, inner), dtype=jnp.bfloat16),
                'k': nrm((cfg.d_model, inner), dtype=jnp.bfloat16),
                'v': nrm((cfg.d_model, inner), dtype=jnp.bfloat16),
                'o': nrm((inner, cfg.d_model), dtype=jnp.bfloat16)}

    shared = nrm((cfg.vocab, cfg.d_model), 1.0)
    params = {
        'shared': shared,                                   # tied token embedding / lm head
        'shared_bf16': shared.astype(jnp.bfloat16),         # pre-cast once (lm-head MXU input)
        'new_embed': nrm((2 + 2 * 2 * 2 * 2, cfg.d_model), 1.0),  # nn.Embedding(34, d_model)
        'enc_rel_bias': nrm((cfg.num_buckets, cfg.n_heads)),
        'dec_rel_bias': nrm((cfg.num_buckets, cfg.n_heads)),
        'enc_final_ln': jnp.ones((cfg.d_model,), jnp.float32),
        'dec_final_ln': jnp.ones((cfg.d_model,), jnp.float32),
    }
    params['enc_layers'] = [
        {'ln0': jnp.ones((cfg.d_model,), jnp.float32), 'sa': attn_p(),
         'ln1': jnp.ones((cfg.d_model,), jnp.float32),
         'wi': nrm((cfg.d_model, cfg.d_ff), dtype=jnp.bfloat16),
         'wo': nrm((cfg.d_ff, cfg.d_model), dtype=jnp.bfloat16)}
        for _ in range(cfg.num_layers)]
    params['dec_layers'] = [
        {'ln0': jnp.ones((cfg.d_model,), jnp.float32), 'sa': attn_p(),
         'ln1': jnp.ones((cfg.d_model,), jnp.float32), 'ca': attn_p(),
         'ln2': jnp.ones((cfg.d_model,), jnp.float32),
         'wi': nrm((cfg.d_model, cfg.d_ff), dtype=jnp.bfloat16),
         'wo': nrm((cfg.d_ff, cfg.d_model), dtype=jnp.bfloat16)}
        for _ in range(cfg.num_decoder_layers)]
    return params


# TODO(synk): embedding gather (token ids + the >=32100 -> new_embed path), the
# relative-position bucket computation and the cross-entropy loss stay in plain JAX
# (gather/scatter-dominated, tiny compared with the fused Pallas blocks).
def embed_input(input_ids, shared, new_embed):
    """CustomT5Stack.embed_input: ids >= 32100 use new_embed(id - 32100)."""
    is_special = input_ids >= 32100
    base_ids = jnp.where(is_special, 2, input_ids)
    raw = jnp.take(shared, base_ids, axis=0)
    sp_ids = jnp.where(is_special, input_ids - 32100, 0)
    sp = jnp.take(new_embed, sp_ids, axis=0)
    return jnp.where(is_special[..., None], sp, raw)


def _relative_position_bucket(rel_pos, bidirectional, num_buckets, max_distance):
    relative_buckets = jnp.zeros_like(rel_pos)
    if bidirectional:
        num_buckets = num_buckets // 2
        relative_buckets = relative_buckets + (rel_pos > 0).astype(jnp.int32) * num_buckets
        rel_pos = jnp.abs(rel_pos)
    else:
        rel_pos = -jnp.minimum(rel_pos, 0)
    max_exact = num_buckets // 2
    is_small = rel_pos < max_exact
    rel_f = jnp.maximum(rel_pos, 1).astype(jnp.float32)
    large = max_exact + (
        jnp.log(rel_f / max_exact) / math.log(max_distance / max_exact)
        * (num_buckets - max_exact)
    ).astype(jnp.int32)
    large = jnp.minimum(large, num_buckets - 1)
    return relative_buckets + jnp.where(is_small, rel_pos, large)


def compute_bias(qlen, klen, bidirectional, table, cfg):
    ctx = jnp.arange(qlen)[:, None]
    mem = jnp.arange(klen)[None, :]
    buckets = _relative_position_bucket(mem - ctx, bidirectional,
                                        cfg.num_buckets, cfg.max_distance)
    values = jnp.take(table, buckets, axis=0)            # (q, k, H)
    return jnp.transpose(values, (2, 0, 1))[None]        # (1, H, q, k)


def _key_mask_add(mask):
    """(B, Sk) {0,1} -> (B, 1, Sk) additive f32 mask (no B*H broadcast in HBM)."""
    return ((1.0 - mask.astype(jnp.float32)) * -1e9)[:, None, :]


def encoder_forward(params, cfg, input_ids, attention_mask):
    B, S = input_ids.shape
    x = embed_input(input_ids, params['shared'], params['new_embed'])
    mask_add = _key_mask_add(attention_mask)                       # (B, 1, S)
    pos = compute_bias(S, S, True, params['enc_rel_bias'], cfg)    # (1, H, S, S)
    for lyr in params['enc_layers']:
        sa = lyr['sa']
        x = attn_block(x, lyr['ln0'], sa['q'], sa['k'], sa['v'], sa['o'],
                       mask_add, cfg=cfg, pos=pos, causal=False)
        x = ffn_block(x, lyr['ln1'], lyr['wi'], lyr['wo'], eps=cfg.eps)
    return rmsnorm(x, params['enc_final_ln'], cfg.eps)


def decoder_forward(params, cfg, dec_ids, dec_mask, enc_hidden, enc_mask):
    B, Sd = dec_ids.shape
    x = embed_input(dec_ids, params['shared'], params['new_embed'])
    self_mask_add = _key_mask_add(dec_mask)                        # (B, 1, Sd)
    cross_mask_add = _key_mask_add(enc_mask)                       # (B, 1, Se)
    pos = compute_bias(Sd, Sd, False, params['dec_rel_bias'], cfg) # (1, H, Sd, Sd)
    for lyr in params['dec_layers']:
        sa, ca = lyr['sa'], lyr['ca']
        x = attn_block(x, lyr['ln0'], sa['q'], sa['k'], sa['v'], sa['o'],
                       self_mask_add, cfg=cfg, pos=pos, causal=True)
        x = attn_block(x, lyr['ln1'], ca['q'], ca['k'], ca['v'], ca['o'],
                       cross_mask_add, cfg=cfg, kv=enc_hidden, pos=None, causal=False)
        x = ffn_block(x, lyr['ln2'], lyr['wi'], lyr['wo'], eps=cfg.eps)
    return x   # final rmsnorm is fused into the lm-head kernel


def knowledge_generator_forward(params, cfg, input_ids, attention_mask,
                                decoder_input_ids, decoder_attention_mask,
                                labels=None):
    enc = encoder_forward(params, cfg, input_ids, attention_mask)
    dec = decoder_forward(params, cfg, decoder_input_ids, decoder_attention_mask,
                          enc, attention_mask)
    # tied embeddings: rmsnorm + d_model**-0.5 scale + shared^T projection, fused
    lm_logits = lm_head(dec, params['dec_final_ln'], params['shared_bf16'],
                        eps=cfg.eps, d_model=cfg.d_model)
    if labels is None:
        return (lm_logits,)
    # CrossEntropyLoss(ignore_index=-100), mean over non-ignored positions
    logp = lm_logits - jax.scipy.special.logsumexp(lm_logits, axis=-1, keepdims=True)
    valid = (labels != -100)
    safe = jnp.where(valid, labels, 0)
    nll = -jnp.take_along_axis(logp, safe[..., None], axis=-1)[..., 0]
    loss = jnp.sum(nll * valid) / jnp.maximum(jnp.sum(valid), 1)
    return ({'total_loss': loss}, lm_logits)


# ---------------------------------- main ------------------------------------

if __name__ == "__main__":
    cfg = T5Cfg()
    key = jax.random.PRNGKey(0)
    pkey, k1, k2, k3 = jax.random.split(key, 4)
    params = init_t5_params(pkey, cfg)

    B, Se, Sd = 2, 8, 8
    input_ids = jax.random.randint(k1, (B, Se), 0, cfg.vocab)
    # a couple of "virtual prompt" tokens >= 32100 exercise the new_embed path
    input_ids = input_ids.at[0, 0].set(32100 + 3)
    input_ids = input_ids.at[1, 1].set(32100 + 7)
    attention_mask = jnp.ones((B, Se), jnp.int32).at[1, Se - 2:].set(0)
    decoder_input_ids = jax.random.randint(k2, (B, Sd), 0, cfg.vocab)
    decoder_attention_mask = jnp.ones((B, Sd), jnp.int32)
    labels = jax.random.randint(k3, (B, Sd), 0, cfg.vocab).at[:, Sd - 1].set(-100)

    fwd = jax.jit(functools.partial(knowledge_generator_forward, params, cfg))
    out = fwd(input_ids, attention_mask, decoder_input_ids,
              decoder_attention_mask, labels)
    loss = out[0]['total_loss']
    lm_logits = out[1]
    jax.block_until_ready((loss, lm_logits))
    assert lm_logits.shape == (B, Sd, cfg.vocab)
    assert bool(jnp.isfinite(loss))
    print("KERNEL_OK")
</pallas_src>

<mosaic_0001>
module attributes {stable_mosaic.version = 11 : i64} {
  func.func @_ffn_block_kernel(%arg0: i32, %arg1: memref<16x32xf32, #tpu.memory_space<vmem>>, %arg2: memref<1x32xf32, #tpu.memory_space<vmem>>, %arg3: memref<32x64xbf16, #tpu.memory_space<vmem>>, %arg4: memref<64x32xbf16, #tpu.memory_space<vmem>>, %arg5: memref<16x32xf32, #tpu.memory_space<vmem>>) attributes {dimension_semantics = [#tpu.dimension_semantics<parallel>], iteration_bounds = array<i64: 1>, scalar_prefetch = 0 : i64, scratch_operands = 0 : i64, tpu.core_type = #tpu.core_type<tc>, window_params = [{transform_indices = @transform_0, window_bounds = array<i64: 16, 32>}, {pipeline_mode = #tpu.pipeline_mode<synchronous>, transform_indices = @transform_1, window_bounds = array<i64: 1, 32>}, {pipeline_mode = #tpu.pipeline_mode<synchronous>, transform_indices = @transform_2, window_bounds = array<i64: 32, 64>}, {pipeline_mode = #tpu.pipeline_mode<synchronous>, transform_indices = @transform_3, window_bounds = array<i64: 64, 32>}, {transform_indices = @transform_4, window_bounds = array<i64: 16, 32>}]} {
    %c0 = arith.constant 0 : index
    %c0_0 = arith.constant 0 : index
    %0 = vector.load %arg1[%c0, %c0_0] : memref<16x32xf32, #tpu.memory_space<vmem>>, vector<16x32xf32>
    %c0_1 = arith.constant 0 : index
    %c0_2 = arith.constant 0 : index
    %1 = vector.load %arg2[%c0_1, %c0_2] : memref<1x32xf32, #tpu.memory_space<vmem>>, vector<1x32xf32>
    %2 = arith.mulf %0, %0 : vector<16x32xf32>
    %cst = arith.constant dense<0.000000e+00> : vector<16xf32>
    %3 = vector.multi_reduction <add>, %2, %cst [1] : vector<16x32xf32> to vector<16xf32>
    %4 = vector.shape_cast %3 : vector<16xf32> to vector<16x1xf32>
    %cst_3 = arith.constant 3.200000e+01 : f32
    %5 = vector.broadcast %cst_3 : f32 to vector<16x1xf32>
    %6 = arith.divf %4, %5 : vector<16x1xf32>
    %cst_4 = arith.constant 9.99999997E-7 : f32
    %7 = vector.broadcast %cst_4 : f32 to vector<16x1xf32>
    %8 = arith.addf %6, %7 : vector<16x1xf32>
    %9 = math.rsqrt %8 : vector<16x1xf32>
    %10 = vector.broadcast %9 : vector<16x1xf32> to vector<16x32xf32>
    %11 = arith.mulf %0, %10 : vector<16x32xf32>
    %12 = vector.broadcast %1 : vector<1x32xf32> to vector<16x32xf32>
    %13 = arith.mulf %11, %12 : vector<16x32xf32>
    %14 = arith.truncf %13 : vector<16x32xf32> to vector<16x32xbf16>
    %c0_5 = arith.constant 0 : index
    %c0_6 = arith.constant 0 : index
    %15 = vector.load %arg3[%c0_5, %c0_6] : memref<32x64xbf16, #tpu.memory_space<vmem>>, vector<32x64xbf16>
    %cst_7 = arith.constant dense<0.000000e+00> : vector<16x64xf32>
    %16 = tpu.matmul %14, %15, %cst_7 {dimension_numbers = #tpu.dot_dimension_numbers<[1], [0], [0], [1], [0, 0, 1, 1], [], []>} : vector<16x32xbf16>, vector<32x64xbf16>, vector<16x64xf32> -> vector<16x64xf32>
    %cst_8 = arith.constant 0.000000e+00 : f32
    %17 = vector.broadcast %cst_8 : f32 to vector<16x64xf32>
    %18 = arith.maximumf %16, %17 : vector<16x64xf32>
    %19 = arith.truncf %18 : vector<16x64xf32> to vector<16x64xbf16>
    %c0_9 = arith.constant 0 : index
    %c0_10 = arith.constant 0 : index
    %20 = vector.load %arg4[%c0_9, %c0_10] : memref<64x32xbf16, #tpu.memory_space<vmem>>, vector<64x32xbf16>
    %cst_11 = arith.constant dense<0.000000e+00> : vector<16x32xf32>
    %21 = tpu.matmul %19, %20, %cst_11 {dimension_numbers = #tpu.dot_dimension_numbers<[1], [0], [0], [1], [0, 0, 1, 1], [], []>} : vector<16x64xbf16>, vector<64x32xbf16>, vector<16x32xf32> -> vector<16x32xf32>
    %22 = arith.addf %0, %21 : vector<16x32xf32>
    %c0_12 = arith.constant 0 : index
    %c0_13 = arith.constant 0 : index
    %23 = vector.load %arg5[%c0_12, %c0_13] : memref<16x32xf32, #tpu.memory_space<vmem>>, vector<16x32xf32>
    tpu.vector_store %arg5[%c0_12, %c0_13], %22 {strides = array<i32>} : memref<16x32xf32, #tpu.memory_space<vmem>>, vector<16x32xf32>,
    return
  }
  func.func @transform_0(%arg0: i32) -> (i32, i32) {
    %c0_i32 = arith.constant 0 : i32
    %c0_i32_0 = arith.constant 0 : i32
    return %arg0, %c0_i32 : i32, i32
  }
  func.func @transform_1(%arg0: i32) -> (i32, i32) {
    %c0_i32 = arith.constant 0 : i32
    %c0_i32_0 = arith.constant 0 : i32
    %c0_i32_1 = arith.constant 0 : i32
    return %c0_i32, %c0_i32_0 : i32, i32
  }
  func.func @transform_2(%arg0: i32) -> (i32, i32) {
    %c0_i32 = arith.constant 0 : i32
    %c0_i32_0 = arith.constant 0 : i32
    %c0_i32_1 = arith.constant 0 : i32
    return %c0_i32, %c0_i32_0 : i32, i32
  }
  func.func @transform_3(%arg0: i32) -> (i32, i32) {
    %c0_i32 = arith.constant 0 : i32
    %c0_i32_0 = arith.constant 0 : i32
    %c0_i32_1 = arith.constant 0 : i32
    return %c0_i32, %c0_i32_0 : i32, i32
  }
  func.func @transform_4(%arg0: i32) -> (i32, i32) {
    %c0_i32 = arith.constant 0 : i32
    %c0_i32_0 = arith.constant 0 : i32
    return %arg0, %c0_i32 : i32, i32
  }
}

module attributes {stable_mosaic.version = 11 : i64} {
  func.func @_rmsnorm_kernel(%arg0: i32, %arg1: memref<16x32xf32, #tpu.memory_space<vmem>>, %arg2: memref<1x32xf32, #tpu.memory_space<vmem>>, %arg3: memref<16x32xf32, #tpu.memory_space<vmem>>) attributes {dimension_semantics = [#tpu.dimension_semantics<parallel>], iteration_bounds = array<i64: 1>, scalar_prefetch = 0 : i64, scratch_operands = 0 : i64, tpu.core_type = #tpu.core_type<tc>, window_params = [{transform_indices = @transform_0, window_bounds = array<i64: 16, 32>}, {pipeline_mode = #tpu.pipeline_mode<synchronous>, transform_indices = @transform_1, window_bounds = array<i64: 1, 32>}, {transform_indices = @transform_2, window_bounds = array<i64: 16, 32>}]} {
    %c0 = arith.constant 0 : index
    %c0_0 = arith.constant 0 : index
    %0 = vector.load %arg1[%c0, %c0_0] : memref<16x32xf32, #tpu.memory_space<vmem>>, vector<16x32xf32>
    %1 = arith.mulf %0, %0 : vector<16x32xf32>
    %cst = arith.constant dense<0.000000e+00> : vector<16xf32>
    %2 = vector.multi_reduction <add>, %1, %cst [1] : vector<16x32xf32> to vector<16xf32>
    %3 = vector.shape_cast %2 : vector<16xf32> to vector<16x1xf32>
    %cst_1 = arith.constant 3.200000e+01 : f32
    %4 = vector.broadcast %cst_1 : f32 to vector<16x1xf32>
    %5 = arith.divf %3, %4 : vector<16x1xf32>
    %cst_2 = arith.constant 9.99999997E-7 : f32
    %6 = vector.broadcast %cst_2 : f32 to vector<16x1xf32>
    %7 = arith.addf %5, %6 : vector<16x1xf32>
    %8 = math.rsqrt %7 : vector<16x1xf32>
    %9 = vector.broadcast %8 : vector<16x1xf32> to vector<16x32xf32>
    %10 = arith.mulf %0, %9 : vector<16x32xf32>
    %c0_3 = arith.constant 0 : index
    %c0_4 = arith.constant 0 : index
    %11 = vector.load %arg2[%c0_3, %c0_4] : memref<1x32xf32, #tpu.memory_space<vmem>>, vector<1x32xf32>
    %12 = vector.broadcast %11 : vector<1x32xf32> to vector<16x32xf32>
    %13 = arith.mulf %10, %12 : vector<16x32xf32>
    %c0_5 = arith.constant 0 : index
    %c0_6 = arith.constant 0 : index
    %14 = vector.load %arg3[%c0_5, %c0_6] : memref<16x32xf32, #tpu.memory_space<vmem>>, vector<16x32xf32>
    tpu.vector_store %arg3[%c0_5, %c0_6], %13 {strides = array<i32>} : memref<16x32xf32, #tpu.memory_space<vmem>>, vector<16x32xf32>,
    return
  }
  func.func @transform_0(%arg0: i32) -> (i32, i32) {
    %c0_i32 = arith.constant 0 : i32
    %c0_i32_0 = arith.constant 0 : i32
    return %arg0, %c0_i32 : i32, i32
  }
  func.func @transform_1(%arg0: i32) -> (i32, i32) {
    %c0_i32 = arith.constant 0 : i32
    %c0_i32_0 = arith.constant 0 : i32
    %c0_i32_1 = arith.constant 0 : i32
    return %c0_i32, %c0_i32_0 : i32, i32
  }
  func.func @transform_2(%arg0: i32) -> (i32, i32) {
    %c0_i32 = arith.constant 0 : i32
    %c0_i32_0 = arith.constant 0 : i32
    return %arg0, %c0_i32 : i32, i32
  }
}

module attributes {stable_mosaic.version = 11 : i64} {
  func.func @_attn_block_kernel(%arg0: i32, %arg1: memref<1x8x32xf32, #tpu.memory_space<vmem>>, %arg2: memref<1x1x8xf32, #tpu.memory_space<vmem>>, %arg3: memref<1x4x8x8xf32, #tpu.memory_space<vmem>>, %arg4: memref<1x32xf32, #tpu.memory_space<vmem>>, %arg5: memref<32x32xbf16, #tpu.memory_space<vmem>>, %arg6: memref<32x32xbf16, #tpu.memory_space<vmem>>, %arg7: memref<32x32xbf16, #tpu.memory_space<vmem>>, %arg8: memref<32x32xbf16, #tpu.memory_space<vmem>>, %arg9: memref<1x8x32xf32, #tpu.memory_space<vmem>>) attributes {dimension_semantics = [#tpu.dimension_semantics<parallel>], iteration_bounds = array<i64: 2>, scalar_prefetch = 0 : i64, scratch_operands = 0 : i64, tpu.core_type = #tpu.core_type<tc>, window_params = [{transform_indices = @transform_0, window_bounds = array<i64: 1, 8, 32>}, {transform_indices = @transform_1, window_bounds = array<i64: 1, 1, 8>}, {pipeline_mode = #tpu.pipeline_mode<synchronous>, transform_indices = @transform_2, window_bounds = array<i64: 1, 4, 8, 8>}, {pipeline_mode = #tpu.pipeline_mode<synchronous>, transform_indices = @transform_3, window_bounds = array<i64: 1, 32>}, {pipeline_mode = #tpu.pipeline_mode<synchronous>, transform_indices = @transform_4, window_bounds = array<i64: 32, 32>}, {pipeline_mode = #tpu.pipeline_mode<synchronous>, transform_indices = @transform_5, window_bounds = array<i64: 32, 32>}, {pipeline_mode = #tpu.pipeline_mode<synchronous>, transform_indices = @transform_6, window_bounds = array<i64: 32, 32>}, {pipeline_mode = #tpu.pipeline_mode<synchronous>, transform_indices = @transform_7, window_bounds = array<i64: 32, 32>}, {transform_indices = @transform_8, window_bounds = array<i64: 1, 8, 32>}]} {
    %c0 = arith.constant 0 : index
    %c0_0 = arith.constant 0 : index
    %c0_1 = arith.constant 0 : index
    %0 = vector.load %arg1[%c0, %c0_0, %c0_1] : memref<1x8x32xf32, #tpu.memory_space<vmem>>, vector<1x8x32xf32>
    %1 = vector.shape_cast %0 : vector<1x8x32xf32> to vector<8x32xf32>
    %c0_2 = arith.constant 0 : index
    %c0_3 = arith.constant 0 : index
    %2 = vector.load %arg4[%c0_2, %c0_3] : memref<1x32xf32, #tpu.memory_space<vmem>>, vector<1x32xf32>
    %3 = arith.mulf %1, %1 : vector<8x32xf32>
    %cst = arith.constant dense<0.000000e+00> : vector<8xf32>
    %4 = vector.multi_reduction <add>, %3, %cst [1] : vector<8x32xf32> to vector<8xf32>
    %5 = vector.shape_cast %4 : vector<8xf32> to vector<8x1xf32>
    %cst_4 = arith.constant 3.200000e+01 : f32
    %6 = vector.broadcast %cst_4 : f32 to vector<8x1xf32>
    %7 = arith.divf %5, %6 : vector<8x1xf32>
    %cst_5 = arith.constant 9.99999997E-7 : f32
    %8 = vector.broadcast %cst_5 : f32 to vector<8x1xf32>
    %9 = arith.addf %7, %8 : vector<8x1xf32>
    %10 = math.rsqrt %9 : vector<8x1xf32>
    %11 = vector.broadcast %10 : vector<8x1xf32> to vector<8x32xf32>
    %12 = arith.mulf %1, %11 : vector<8x32xf32>
    %13 = vector.broadcast %2 : vector<1x32xf32> to vector<8x32xf32>
    %14 = arith.mulf %12, %13 : vector<8x32xf32>
    %15 = arith.truncf %14 : vector<8x32xf32> to vector<8x32xbf16>
    %16 = arith.truncf %14 : vector<8x32xf32> to vector<8x32xbf16>
    %c0_6 = arith.constant 0 : index
    %c0_7 = arith.constant 0 : index
    %17 = vector.load %arg5[%c0_6, %c0_7] : memref<32x32xbf16, #tpu.memory_space<vmem>>, vector<32x32xbf16>
    %cst_8 = arith.constant dense<0.000000e+00> : vector<8x32xf32>
    %18 = tpu.matmul %15, %17, %cst_8 {dimension_numbers = #tpu.dot_dimension_numbers<[1], [0], [0], [1], [0, 0, 1, 1], [], []>} : vector<8x32xbf16>, vector<32x32xbf16>, vector<8x32xf32> -> vector<8x32xf32>
    %c0_9 = arith.constant 0 : index
    %c0_10 = arith.constant 0 : index
    %19 = vector.load %arg6[%c0_9, %c0_10] : memref<32x32xbf16, #tpu.memory_space<vmem>>, vector<32x32xbf16>
    %cst_11 = arith.constant dense<0.000000e+00> : vector<8x32xf32>
    %20 = tpu.matmul %16, %19, %cst_11 {dimension_numbers = #tpu.dot_dimension_numbers<[1], [0], [0], [1], [0, 0, 1, 1], [], []>} : vector<8x32xbf16>, vector<32x32xbf16>, vector<8x32xf32> -> vector<8x32xf32>
    %c0_12 = arith.constant 0 : index
    %c0_13 = arith.constant 0 : index
    %21 = vector.load %arg7[%c0_12, %c0_13] : memref<32x32xbf16, #tpu.memory_space<vmem>>, vector<32x32xbf16>
    %cst_14 = arith.constant dense<0.000000e+00> : vector<8x32xf32>
    %22 = tpu.matmul %16, %21, %cst_14 {dimension_numbers = #tpu.dot_dimension_numbers<[1], [0], [0], [1], [0, 0, 1, 1], [], []>} : vector<8x32xbf16>, vector<32x32xbf16>, vector<8x32xf32> -> vector<8x32xf32>
    %c0_15 = arith.constant 0 : index
    %c0_16 = arith.constant 0 : index
    %c0_17 = arith.constant 0 : index
    %23 = vector.load %arg2[%c0_15, %c0_16, %c0_17] : memref<1x1x8xf32, #tpu.memory_space<vmem>>, vector<1x1x8xf32>
    %24 = vector.shape_cast %23 : vector<1x1x8xf32> to vector<1x8xf32>
    %25 = vector.extract_strided_slice %18 {offsets = [0, 0], sizes = [8, 8], strides = [1, 1]} : vector<8x32xf32> to vector<8x8xf32>
    %26 = arith.truncf %25 : vector<8x8xf32> to vector<8x8xbf16>
    %27 = vector.extract_strided_slice %20 {offsets = [0, 0], sizes = [8, 8], strides = [1, 1]} : vector<8x32xf32> to vector<8x8xf32>
    %28 = arith.truncf %27 : vector<8x8xf32> to vector<8x8xbf16>
    %29 = vector.extract_strided_slice %22 {offsets = [0, 0], sizes = [8, 8], strides = [1, 1]} : vector<8x32xf32> to vector<8x8xf32>
    %30 = arith.truncf %29 : vector<8x8xf32> to vector<8x8xbf16>
    %cst_18 = arith.constant dense<0.000000e+00> : vector<8x8xf32>
    %31 = tpu.matmul %26, %28, %cst_18 {dimension_numbers = #tpu.dot_dimension_numbers<[1], [1], [0], [0], [0, 0, 1, 0], [], []>} : vector<8x8xbf16>, vector<8x8xbf16>, vector<8x8xf32> -> vector<8x8xf32>
    %32 = vector.broadcast %24 : vector<1x8xf32> to vector<8x8xf32>
    %33 = arith.addf %31, %32 : vector<8x8xf32>
    %c0_19 = arith.constant 0 : index
    %c0_20 = arith.constant 0 : index
    %c0_21 = arith.constant 0 : index
    %c0_22 = arith.constant 0 : index
    %34 = vector.load %arg3[%c0_19, %c0_20, %c0_21, %c0_22] : memref<1x4x8x8xf32, #tpu.memory_space<vmem>>, vector<1x1x8x8xf32>
    %35 = vector.shape_cast %34 : vector<1x1x8x8xf32> to vector<8x8xf32>
    %36 = arith.addf %33, %35 : vector<8x8xf32>
    %cst_23 = arith.constant dense<0xFF800000> : vector<8xf32>
    %37 = vector.multi_reduction <maximumf>, %36, %cst_23 [1] : vector<8x8xf32> to vector<8xf32>
    %38 = vector.shape_cast %37 : vector<8xf32> to vector<8x1xf32>
    %39 = vector.broadcast %38 : vector<8x1xf32> to vector<8x8xf32>
    %40 = arith.subf %36, %39 : vector<8x8xf32>
    %41 = math.exp %40 : vector<8x8xf32>
    %cst_24 = arith.constant dense<0.000000e+00> : vector<8xf32>
    %42 = vector.multi_reduction <add>, %41, %cst_24 [1] : vector<8x8xf32> to vector<8xf32>
    %43 = vector.shape_cast %42 : vector<8xf32> to vector<8x1xf32>
    %44 = tpu.reciprocal %43 {approx = true} : vector<8x1xf32> -> vector<8x1xf32>
    %45 = vector.broadcast %44 : vector<8x1xf32> to vector<8x8xf32>
    %46 = arith.mulf %41, %45 : vector<8x8xf32>
    %47 = arith.truncf %46 : vector<8x8xf32> to vector<8x8xbf16>
    %cst_25 = arith.constant dense<0.000000e+00> : vector<8x8xf32>
    %48 = tpu.matmul %47, %30, %cst_25 {dimension_numbers = #tpu.dot_dimension_numbers<[1], [0], [0], [1], [0, 0, 1, 1], [], []>} : vector<8x8xbf16>, vector<8x8xbf16>, vector<8x8xf32> -> vector<8x8xf32>
    %49 = vector.extract_strided_slice %18 {offsets = [0, 8], sizes = [8, 8], strides = [1, 1]} : vector<8x32xf32> to vector<8x8xf32>
    %50 = arith.truncf %49 : vector<8x8xf32> to vector<8x8xbf16>
    %51 = vector.extract_strided_slice %20 {offsets = [0, 8], sizes = [8, 8], strides = [1, 1]} : vector<8x32xf32> to vector<8x8xf32>
    %52 = arith.truncf %51 : vector<8x8xf32> to vector<8x8xbf16>
    %53 = vector.extract_strided_slice %22 {offsets = [0, 8], sizes = [8, 8], strides = [1, 1]} : vector<8x32xf32> to vector<8x8xf32>
    %54 = arith.truncf %53 : vector<8x8xf32> to vector<8x8xbf16>
    %cst_26 = arith.constant dense<0.000000e+00> : vector<8x8xf32>
    %55 = tpu.matmul %50, %52, %cst_26 {dimension_numbers = #tpu.dot_dimension_numbers<[1], [1], [0], [0], [0, 0, 1, 0], [], []>} : vector<8x8xbf16>, vector<8x8xbf16>, vector<8x8xf32> -> vector<8x8xf32>
    %56 = vector.broadcast %24 : vector<1x8xf32> to vector<8x8xf32>
    %57 = arith.addf %55, %56 : vector<8x8xf32>
    %c0_27 = arith.constant 0 : index
    %c1 = arith.constant 1 : index
    %c0_28 = arith.constant 0 : index
    %c0_29 = arith.constant 0 : index
    %58 = vector.load %arg3[%c0_27, %c1, %c0_28, %c0_29] : memref<1x4x8x8xf32, #tpu.memory_space<vmem>>, vector<1x1x8x8xf32>
    %59 = vector.shape_cast %58 : vector<1x1x8x8xf32> to vector<8x8xf32>
    %60 = arith.addf %57, %59 : vector<8x8xf32>
    %cst_30 = arith.constant dense<0xFF800000> : vector<8xf32>
    %61 = vector.multi_reduction <maximumf>, %60, %cst_30 [1] : vector<8x8xf32> to vector<8xf32>
    %62 = vector.shape_cast %61 : vector<8xf32> to vector<8x1xf32>
    %63 = vector.broadcast %62 : vector<8x1xf32> to vector<8x8xf32>
    %64 = arith.subf %60, %63 : vector<8x8xf32>
    %65 = math.exp %64 : vector<8x8xf32>
    %cst_31 = arith.constant dense<0.000000e+00> : vector<8xf32>
    %66 = vector.multi_reduction <add>, %65, %cst_31 [1] : vector<8x8xf32> to vector<8xf32>
    %67 = vector.shape_cast %66 : vector<8xf32> to vector<8x1xf32>
    %68 = tpu.reciprocal %67 {approx = true} : vector<8x1xf32> -> vector<8x1xf32>
    %69 = vector.broadcast %68 : vector<8x1xf32> to vector<8x8xf32>
    %70 = arith.mulf %65, %69 : vector<8x8xf32>
    %71 = arith.truncf %70 : vector<8x8xf32> to vector<8x8xbf16>
    %cst_32 = arith.constant dense<0.000000e+00> : vector<8x8xf32>
    %72 = tpu.matmul %71, %54, %cst_32 {dimension_numbers = #tpu.dot_dimension_numbers<[1], [0], [0], [1], [0, 0, 1, 1], [], []>} : vector<8x8xbf16>, vector<8x8xbf16>, vector<8x8xf32> -> vector<8x8xf32>
    %73 = vector.extract_strided_slice %18 {offsets = [0, 16], sizes = [8, 8], strides = [1, 1]} : vector<8x32xf32> to vector<8x8xf32>
    %74 = arith.truncf %73 : vector<8x8xf32> to vector<8x8xbf16>
    %75 = vector.extract_strided_slice %20 {offsets = [0, 16], sizes = [8, 8], strides = [1, 1]} : vector<8x32xf32> to vector<8x8xf32>
    %76 = arith.truncf %75 : vector<8x8xf32> to vector<8x8xbf16>
    %77 = vector.extract_strided_slice %22 {offsets = [0, 16], sizes = [8, 8], strides = [1, 1]} : vector<8x32xf32> to vector<8x8xf32>
    %78 = arith.truncf %77 : vector<8x8xf32> to vector<8x8xbf16>
    %cst_33 = arith.constant dense<0.000000e+00> : vector<8x8xf32>
    %79 = tpu.matmul %74, %76, %cst_33 {dimension_numbers = #tpu.dot_dimension_numbers<[1], [1], [0], [0], [0, 0, 1, 0], [], []>} : vector<8x8xbf16>, vector<8x8xbf16>, vector<8x8xf32> -> vector<8x8xf32>
    %80 = vector.broadcast %24 : vector<1x8xf32> to vector<8x8xf32>
    %81 = arith.addf %79, %80 : vector<8x8xf32>
    %c0_34 = arith.constant 0 : index
    %c2 = arith.constant 2 : index
    %c0_35 = arith.constant 0 : index
    %c0_36 = arith.constant 0 : index
    %82 = vector.load %arg3[%c0_34, %c2, %c0_35, %c0_36] : memref<1x4x8x8xf32, #tpu.memory_space<vmem>>, vector<1x1x8x8xf32>
    %83 = vector.shape_cast %82 : vector<1x1x8x8xf32> to vector<8x8xf32>
    %84 = arith.addf %81, %83 : vector<8x8xf32>
    %cst_37 = arith.constant dense<0xFF800000> : vector<8xf32>
    %85 = vector.multi_reduction <maximumf>, %84, %cst_37 [1] : vector<8x8xf32> to vector<8xf32>
    %86 = vector.shape_cast %85 : vector<8xf32> to vector<8x1xf32>
    %87 = vector.broadcast %86 : vector<8x1xf32> to vector<8x8xf32>
    %88 = arith.subf %84, %87 : vector<8x8xf32>
    %89 = math.exp %88 : vector<8x8xf32>
    %cst_38 = arith.constant dense<0.000000e+00> : vector<8xf32>
    %90 = vector.multi_reduction <add>, %89, %cst_38 [1] : vector<8x8xf32> to vector<8xf32>
    %91 = vector.shape_cast %90 : vector<8xf32> to vector<8x1xf32>
    %92 = tpu.reciprocal %91 {approx = true} : vector<8x1xf32> -> vector<8x1xf32>
    %93 = vector.broadcast %92 : vector<8x1xf32> to vector<8x8xf32>
    %94 = arith.mulf %89, %93 : vector<8x8xf32>
    %95 = arith.truncf %94 : vector<8x8xf32> to vector<8x8xbf16>
    %cst_39 = arith.constant dense<0.000000e+00> : vector<8x8xf32>
    %96 = tpu.matmul %95, %78, %cst_39 {dimension_numbers = #tpu.dot_dimension_numbers<[1], [0], [0], [1], [0, 0, 1, 1], [], []>} : vector<8x8xbf16>, vector<8x8xbf16>, vector<8x8xf32> -> vector<8x8xf32>
    %97 = vector.extract_strided_slice %18 {offsets = [0, 24], sizes = [8, 8], strides = [1, 1]} : vector<8x32xf32> to vector<8x8xf32>
    %98 = arith.truncf %97 : vector<8x8xf32> to vector<8x8xbf16>
    %99 = vector.extract_strided_slice %20 {offsets = [0, 24], sizes = [8, 8], strides = [1, 1]} : vector<8x32xf32> to vector<8x8xf32>
    %100 = arith.truncf %99 : vector<8x8xf32> to vector<8x8xbf16>
    %101 = vector.extract_strided_slice %22 {offsets = [0, 24], sizes = [8, 8], strides = [1, 1]} : vector<8x32xf32> to vector<8x8xf32>
    %102 = arith.truncf %101 : vector<8x8xf32> to vector<8x8xbf16>
    %cst_40 = arith.constant dense<0.000000e+00> : vector<8x8xf32>
    %103 = tpu.matmul %98, %100, %cst_40 {dimension_numbers = #tpu.dot_dimension_numbers<[1], [1], [0], [0], [0, 0, 1, 0], [], []>} : vector<8x8xbf16>, vector<8x8xbf16>, vector<8x8xf32> -> vector<8x8xf32>
    %104 = vector.broadcast %24 : vector<1x8xf32> to vector<8x8xf32>
    %105 = arith.addf %103, %104 : vector<8x8xf32>
    %c0_41 = arith.constant 0 : index
    %c3 = arith.constant 3 : index
    %c0_42 = arith.constant 0 : index
    %c0_43 = arith.constant 0 : index
    %106 = vector.load %arg3[%c0_41, %c3, %c0_42, %c0_43] : memref<1x4x8x8xf32, #tpu.memory_space<vmem>>, vector<1x1x8x8xf32>
    %107 = vector.shape_cast %106 : vector<1x1x8x8xf32> to vector<8x8xf32>
    %108 = arith.addf %105, %107 : vector<8x8xf32>
    %cst_44 = arith.constant dense<0xFF800000> : vector<8xf32>
    %109 = vector.multi_reduction <maximumf>, %108, %cst_44 [1] : vector<8x8xf32> to vector<8xf32>
    %110 = vector.shape_cast %109 : vector<8xf32> to vector<8x1xf32>
    %111 = vector.broadcast %110 : vector<8x1xf32> to vector<8x8xf32>
    %112 = arith.subf %108, %111 : vector<8x8xf32>
    %113 = math.exp %112 : vector<8x8xf32>
    %cst_45 = arith.constant dense<0.000000e+00> : vector<8xf32>
    %114 = vector.multi_reduction <add>, %113, %cst_45 [1] : vector<8x8xf32> to vector<8xf32>
    %115 = vector.shape_cast %114 : vector<8xf32> to vector<8x1xf32>
    %116 = tpu.reciprocal %115 {approx = true} : vector<8x1xf32> -> vector<8x1xf32>
    %117 = vector.broadcast %116 : vector<8x1xf32> to vector<8x8xf32>
    %118 = arith.mulf %113, %117 : vector<8x8xf32>
    %119 = arith.truncf %118 : vector<8x8xf32> to vector<8x8xbf16>
    %cst_46 = arith.constant dense<0.000000e+00> : vector<8x8xf32>
    %120 = tpu.matmul %119, %102, %cst_46 {dimension_numbers = #tpu.dot_dimension_numbers<[1], [0], [0], [1], [0, 0, 1, 1], [], []>} : vector<8x8xbf16>, vector<8x8xbf16>, vector<8x8xf32> -> vector<8x8xf32>
    %121 = tpu.concatenate %48, %72, %96, %120 in 1 : vector<8x8xf32>, vector<8x8xf32>, vector<8x8xf32>, vector<8x8xf32> -> vector<8x32xf32>
    %122 = arith.truncf %121 : vector<8x32xf32> to vector<8x32xbf16>
    %c0_47 = arith.constant 0 : index
    %c0_48 = arith.constant 0 : index
    %123 = vector.load %arg8[%c0_47, %c0_48] : memref<32x32xbf16, #tpu.memory_space<vmem>>, vector<32x32xbf16>
    %cst_49 = arith.constant dense<0.000000e+00> : vector<8x32xf32>
    %124 = tpu.matmul %122, %123, %cst_49 {dimension_numbers = #tpu.dot_dimension_numbers<[1], [0], [0], [1], [0, 0, 1, 1], [], []>} : vector<8x32xbf16>, vector<32x32xbf16>, vector<8x32xf32> -> vector<8x32xf32>
    %125 = arith.addf %1, %124 : vector<8x32xf32>
    %c0_50 = arith.constant 0 : index
    %c0_51 = arith.constant 0 : index
    %c0_52 = arith.constant 0 : index
    %126 = vector.load %arg9[%c0_50, %c0_51, %c0_52] : memref<1x8x32xf32, #tpu.memory_space<vmem>>, vector<1x8x32xf32>
    %127 = vector.shape_cast %126 : vector<1x8x32xf32> to vector<8x32xf32>
    %128 = vector.shape_cast %125 : vector<8x32xf32> to vector<1x8x32xf32>
    tpu.vector_store %arg9[%c0_50, %c0_51, %c0_52], %128 {strides = array<i32>} : memref<1x8x32xf32, #tpu.memory_space<vmem>>, vector<1x8x32xf32>,
    return
  }
  func.func @transform_0(%arg0: i32) -> (i32, i32, i32) {
    %c0_i32 = arith.constant 0 : i32
    %c0_i32_0 = arith.constant 0 : i32
    %c0_i32_1 = arith.constant 0 : i32
    return %arg0, %c0_i32, %c0_i32_0 : i32, i32, i32
  }
  func.func @transform_1(%arg0: i32) -> (i32, i32, i32) {
    %c0_i32 = arith.constant 0 : i32
    %c0_i32_0 = arith.constant 0 : i32
    %c0_i32_1 = arith.constant 0 : i32
    return %arg0, %c0_i32, %c0_i32_0 : i32, i32, i32
  }
  func.func @transform_2(%arg0: i32) -> (i32, i32, i32, i32) {
    %c0_i32 = arith.constant 0 : i32
    %c0_i32_0 = arith.constant 0 : i32
    %c0_i32_1 = arith.constant 0 : i32
    %c0_i32_2 = arith.constant 0 : i32
    %c0_i32_3 = arith.constant 0 : i32
    return %c0_i32, %c0_i32_0, %c0_i32_1, %c0_i32_2 : i32, i32, i32, i32
  }
  func.func @transform_3(%arg0: i32) -> (i32, i32) {
    %c0_i32 = arith.constant 0 : i32
    %c0_i32_0 = arith.constant 0 : i32
    %c0_i32_1 = arith.constant 0 : i32
    return %c0_i32, %c0_i32_0 : i32, i32
  }
  func.func @transform_4(%arg0: i32) -> (i32, i32) {
    %c0_i32 = arith.constant 0 : i32
    %c0_i32_0 = arith.constant 0 : i32
    %c0_i32_1 = arith.constant 0 : i32
    return %c0_i32, %c0_i32_0 : i32, i32
  }
  func.func @transform_5(%arg0: i32) -> (i32, i32) {
    %c0_i32 = arith.constant 0 : i32
    %c0_i32_0 = arith.constant 0 : i32
    %c0_i32_1 = arith.constant 0 : i32
    return %c0_i32, %c0_i32_0 : i32, i32
  }
  func.func @transform_6(%arg0: i32) -> (i32, i32) {
    %c0_i32 = arith.constant 0 : i32
    %c0_i32_0 = arith.constant 0 : i32
    %c0_i32_1 = arith.constant 0 : i32
    return %c0_i32, %c0_i32_0 : i32, i32
  }
  func.func @transform_7(%arg0: i32) -> (i32, i32) {
    %c0_i32 = arith.constant 0 : i32
    %c0_i32_0 = arith.constant 0 : i32
    %c0_i32_1 = arith.constant 0 : i32
    return %c0_i32, %c0_i32_0 : i32, i32
  }
  func.func @transform_8(%arg0: i32) -> (i32, i32, i32) {
    %c0_i32 = arith.constant 0 : i32
    %c0_i32_0 = arith.constant 0 : i32
    %c0_i32_1 = arith.constant 0 : i32
    return %arg0, %c0_i32, %c0_i32_0 : i32, i32, i32
  }
}

module attributes {stable_mosaic.version = 11 : i64} {
  func.func @_attn_block_kernel(%arg0: i32, %arg1: memref<1x8x32xf32, #tpu.memory_space<vmem>>, %arg2: memref<1x1x8xf32, #tpu.memory_space<vmem>>, %arg3: memref<1x4x8x8xf32, #tpu.memory_space<vmem>>, %arg4: memref<1x32xf32, #tpu.memory_space<vmem>>, %arg5: memref<32x32xbf16, #tpu.memory_space<vmem>>, %arg6: memref<32x32xbf16, #tpu.memory_space<vmem>>, %arg7: memref<32x32xbf16, #tpu.memory_space<vmem>>, %arg8: memref<32x32xbf16, #tpu.memory_space<vmem>>, %arg9: memref<1x8x32xf32, #tpu.memory_space<vmem>>) attributes {dimension_semantics = [#tpu.dimension_semantics<parallel>], iteration_bounds = array<i64: 2>, scalar_prefetch = 0 : i64, scratch_operands = 0 : i64, tpu.core_type = #tpu.core_type<tc>, window_params = [{transform_indices = @transform_0, window_bounds = array<i64: 1, 8, 32>}, {transform_indices = @transform_1, window_bounds = array<i64: 1, 1, 8>}, {pipeline_mode = #tpu.pipeline_mode<synchronous>, transform_indices = @transform_2, window_bounds = array<i64: 1, 4, 8, 8>}, {pipeline_mode = #tpu.pipeline_mode<synchronous>, transform_indices = @transform_3, window_bounds = array<i64: 1, 32>}, {pipeline_mode = #tpu.pipeline_mode<synchronous>, transform_indices = @transform_4, window_bounds = array<i64: 32, 32>}, {pipeline_mode = #tpu.pipeline_mode<synchronous>, transform_indices = @transform_5, window_bounds = array<i64: 32, 32>}, {pipeline_mode = #tpu.pipeline_mode<synchronous>, transform_indices = @transform_6, window_bounds = array<i64: 32, 32>}, {pipeline_mode = #tpu.pipeline_mode<synchronous>, transform_indices = @transform_7, window_bounds = array<i64: 32, 32>}, {transform_indices = @transform_8, window_bounds = array<i64: 1, 8, 32>}]} {
    %c0 = arith.constant 0 : index
    %c0_0 = arith.constant 0 : index
    %c0_1 = arith.constant 0 : index
    %0 = vector.load %arg1[%c0, %c0_0, %c0_1] : memref<1x8x32xf32, #tpu.memory_space<vmem>>, vector<1x8x32xf32>
    %1 = vector.shape_cast %0 : vector<1x8x32xf32> to vector<8x32xf32>
    %c0_2 = arith.constant 0 : index
    %c0_3 = arith.constant 0 : index
    %2 = vector.load %arg4[%c0_2, %c0_3] : memref<1x32xf32, #tpu.memory_space<vmem>>, vector<1x32xf32>
    %3 = arith.mulf %1, %1 : vector<8x32xf32>
    %cst = arith.constant dense<0.000000e+00> : vector<8xf32>
    %4 = vector.multi_reduction <add>, %3, %cst [1] : vector<8x32xf32> to vector<8xf32>
    %5 = vector.shape_cast %4 : vector<8xf32> to vector<8x1xf32>
    %cst_4 = arith.constant 3.200000e+01 : f32
    %6 = vector.broadcast %cst_4 : f32 to vector<8x1xf32>
    %7 = arith.divf %5, %6 : vector<8x1xf32>
    %cst_5 = arith.constant 9.99999997E-7 : f32
    %8 = vector.broadcast %cst_5 : f32 to vector<8x1xf32>
    %9 = arith.addf %7, %8 : vector<8x1xf32>
    %10 = math.rsqrt %9 : vector<8x1xf32>
    %11 = vector.broadcast %10 : vector<8x1xf32> to vector<8x32xf32>
    %12 = arith.mulf %1, %11 : vector<8x32xf32>
    %13 = vector.broadcast %2 : vector<1x32xf32> to vector<8x32xf32>
    %14 = arith.mulf %12, %13 : vector<8x32xf32>
    %15 = arith.truncf %14 : vector<8x32xf32> to vector<8x32xbf16>
    %16 = arith.truncf %14 : vector<8x32xf32> to vector<8x32xbf16>
    %c0_6 = arith.constant 0 : index
    %c0_7 = arith.constant 0 : index
    %17 = vector.load %arg5[%c0_6, %c0_7] : memref<32x32xbf16, #tpu.memory_space<vmem>>, vector<32x32xbf16>
    %cst_8 = arith.constant dense<0.000000e+00> : vector<8x32xf32>
    %18 = tpu.matmul %15, %17, %cst_8 {dimension_numbers = #tpu.dot_dimension_numbers<[1], [0], [0], [1], [0, 0, 1, 1], [], []>} : vector<8x32xbf16>, vector<32x32xbf16>, vector<8x32xf32> -> vector<8x32xf32>
    %c0_9 = arith.constant 0 : index
    %c0_10 = arith.constant 0 : index
    %19 = vector.load %arg6[%c0_9, %c0_10] : memref<32x32xbf16, #tpu.memory_space<vmem>>, vector<32x32xbf16>
    %cst_11 = arith.constant dense<0.000000e+00> : vector<8x32xf32>
    %20 = tpu.matmul %16, %19, %cst_11 {dimension_numbers = #tpu.dot_dimension_numbers<[1], [0], [0], [1], [0, 0, 1, 1], [], []>} : vector<8x32xbf16>, vector<32x32xbf16>, vector<8x32xf32> -> vector<8x32xf32>
    %c0_12 = arith.constant 0 : index
    %c0_13 = arith.constant 0 : index
    %21 = vector.load %arg7[%c0_12, %c0_13] : memref<32x32xbf16, #tpu.memory_space<vmem>>, vector<32x32xbf16>
    %cst_14 = arith.constant dense<0.000000e+00> : vector<8x32xf32>
    %22 = tpu.matmul %16, %21, %cst_14 {dimension_numbers = #tpu.dot_dimension_numbers<[1], [0], [0], [1], [0, 0, 1, 1], [], []>} : vector<8x32xbf16>, vector<32x32xbf16>, vector<8x32xf32> -> vector<8x32xf32>
    %c0_15 = arith.constant 0 : index
    %c0_16 = arith.constant 0 : index
    %c0_17 = arith.constant 0 : index
    %23 = vector.load %arg2[%c0_15, %c0_16, %c0_17] : memref<1x1x8xf32, #tpu.memory_space<vmem>>, vector<1x1x8xf32>
    %24 = vector.shape_cast %23 : vector<1x1x8xf32> to vector<1x8xf32>
    %25 = tpu.iota {dimensions = array<i32: 0>} : vector<8x8xi32>
    %26 = tpu.iota {dimensions = array<i32: 1>} : vector<8x8xi32>
    %27 = arith.cmpi sle, %26, %25 : vector<8x8xi32>
    %cst_18 = arith.constant 0.000000e+00 : f32
    %cst_19 = arith.constant -1.000000e+09 : f32
    %28 = vector.broadcast %cst_18 : f32 to vector<8x8xf32>
    %29 = vector.broadcast %cst_19 : f32 to vector<8x8xf32>
    %30 = arith.select %27, %28, %29 : vector<8x8xi1>, vector<8x8xf32>
    %31 = vector.extract_strided_slice %18 {offsets = [0, 0], sizes = [8, 8], strides = [1, 1]} : vector<8x32xf32> to vector<8x8xf32>
    %32 = arith.truncf %31 : vector<8x8xf32> to vector<8x8xbf16>
    %33 = vector.extract_strided_slice %20 {offsets = [0, 0], sizes = [8, 8], strides = [1, 1]} : vector<8x32xf32> to vector<8x8xf32>
    %34 = arith.truncf %33 : vector<8x8xf32> to vector<8x8xbf16>
    %35 = vector.extract_strided_slice %22 {offsets = [0, 0], sizes = [8, 8], strides = [1, 1]} : vector<8x32xf32> to vector<8x8xf32>
    %36 = arith.truncf %35 : vector<8x8xf32> to vector<8x8xbf16>
    %cst_20 = arith.constant dense<0.000000e+00> : vector<8x8xf32>
    %37 = tpu.matmul %32, %34, %cst_20 {dimension_numbers = #tpu.dot_dimension_numbers<[1], [1], [0], [0], [0, 0, 1, 0], [], []>} : vector<8x8xbf16>, vector<8x8xbf16>, vector<8x8xf32> -> vector<8x8xf32>
    %38 = vector.broadcast %24 : vector<1x8xf32> to vector<8x8xf32>
    %39 = arith.addf %37, %38 : vector<8x8xf32>
    %c0_21 = arith.constant 0 : index
    %c0_22 = arith.constant 0 : index
    %c0_23 = arith.constant 0 : index
    %c0_24 = arith.constant 0 : index
    %40 = vector.load %arg3[%c0_21, %c0_22, %c0_23, %c0_24] : memref<1x4x8x8xf32, #tpu.memory_space<vmem>>, vector<1x1x8x8xf32>
    %41 = vector.shape_cast %40 : vector<1x1x8x8xf32> to vector<8x8xf32>
    %42 = arith.addf %39, %41 : vector<8x8xf32>
    %43 = arith.addf %42, %30 : vector<8x8xf32>
    %cst_25 = arith.constant dense<0xFF800000> : vector<8xf32>
    %44 = vector.multi_reduction <maximumf>, %43, %cst_25 [1] : vector<8x8xf32> to vector<8xf32>
    %45 = vector.shape_cast %44 : vector<8xf32> to vector<8x1xf32>
    %46 = vector.broadcast %45 : vector<8x1xf32> to vector<8x8xf32>
    %47 = arith.subf %43, %46 : vector<8x8xf32>
    %48 = math.exp %47 : vector<8x8xf32>
    %cst_26 = arith.constant dense<0.000000e+00> : vector<8xf32>
    %49 = vector.multi_reduction <add>, %48, %cst_26 [1] : vector<8x8xf32> to vector<8xf32>
    %50 = vector.shape_cast %49 : vector<8xf32> to vector<8x1xf32>
    %51 = tpu.reciprocal %50 {approx = true} : vector<8x1xf32> -> vector<8x1xf32>
    %52 = vector.broadcast %51 : vector<8x1xf32> to vector<8x8xf32>
    %53 = arith.mulf %48, %52 : vector<8x8xf32>
    %54 = arith.truncf %53 : vector<8x8xf32> to vector<8x8xbf16>
    %cst_27 = arith.constant dense<0.000000e+00> : vector<8x8xf32>
    %55 = tpu.matmul %54, %36, %cst_27 {dimension_numbers = #tpu.dot_dimension_numbers<[1], [0], [0], [1], [0, 0, 1, 1], [], []>} : vector<8x8xbf16>, vector<8x8xbf16>, vector<8x8xf32> -> vector<8x8xf32>
    %56 = vector.extract_strided_slice %18 {offsets = [0, 8], sizes = [8, 8], strides = [1, 1]} : vector<8x32xf32> to vector<8x8xf32>
    %57 = arith.truncf %56 : vector<8x8xf32> to vector<8x8xbf16>
    %58 = vector.extract_strided_slice %20 {offsets = [0, 8], sizes = [8, 8], strides = [1, 1]} : vector<8x32xf32> to vector<8x8xf32>
    %59 = arith.truncf %58 : vector<8x8xf32> to vector<8x8xbf16>
    %60 = vector.extract_strided_slice %22 {offsets = [0, 8], sizes = [8, 8], strides = [1, 1]} : vector<8x32xf32> to vector<8x8xf32>
    %61 = arith.truncf %60 : vector<8x8xf32> to vector<8x8xbf16>
    %cst_28 = arith.constant dense<0.000000e+00> : vector<8x8xf32>
    %62 = tpu.matmul %57, %59, %cst_28 {dimension_numbers = #tpu.dot_dimension_numbers<[1], [1], [0], [0], [0, 0, 1, 0], [], []>} : vector<8x8xbf16>, vector<8x8xbf16>, vector<8x8xf32> -> vector<8x8xf32>
    %63 = vector.broadcast %24 : vector<1x8xf32> to vector<8x8xf32>
    %64 = arith.addf %62, %63 : vector<8x8xf32>
    %c0_29 = arith.constant 0 : index
    %c1 = arith.constant 1 : index
    %c0_30 = arith.constant 0 : index
    %c0_31 = arith.constant 0 : index
    %65 = vector.load %arg3[%c0_29, %c1, %c0_30, %c0_31] : memref<1x4x8x8xf32, #tpu.memory_space<vmem>>, vector<1x1x8x8xf32>
    %66 = vector.shape_cast %65 : vector<1x1x8x8xf32> to vector<8x8xf32>
    %67 = arith.addf %64, %66 : vector<8x8xf32>
    %68 = arith.addf %67, %30 : vector<8x8xf32>
    %cst_32 = arith.constant dense<0xFF800000> : vector<8xf32>
    %69 = vector.multi_reduction <maximumf>, %68, %cst_32 [1] : vector<8x8xf32> to vector<8xf32>
    %70 = vector.shape_cast %69 : vector<8xf32> to vector<8x1xf32>
    %71 = vector.broadcast %70 : vector<8x1xf32> to vector<8x8xf32>
    %72 = arith.subf %68, %71 : vector<8x8xf32>
    %73 = math.exp %72 : vector<8x8xf32>
    %cst_33 = arith.constant dense<0.000000e+00> : vector<8xf32>
    %74 = vector.multi_reduction <add>, %73, %cst_33 [1] : vector<8x8xf32> to vector<8xf32>
    %75 = vector.shape_cast %74 : vector<8xf32> to vector<8x1xf32>
    %76 = tpu.reciprocal %75 {approx = true} : vector<8x1xf32> -> vector<8x1xf32>
    %77 = vector.broadcast %76 : vector<8x1xf32> to vector<8x8xf32>
    %78 = arith.mulf %73, %77 : vector<8x8xf32>
    %79 = arith.truncf %78 : vector<8x8xf32> to vector<8x8xbf16>
    %cst_34 = arith.constant dense<0.000000e+00> : vector<8x8xf32>
    %80 = tpu.matmul %79, %61, %cst_34 {dimension_numbers = #tpu.dot_dimension_numbers<[1], [0], [0], [1], [0, 0, 1, 1], [], []>} : vector<8x8xbf16>, vector<8x8xbf16>, vector<8x8xf32> -> vector<8x8xf32>
    %81 = vector.extract_strided_slice %18 {offsets = [0, 16], sizes = [8, 8], strides = [1, 1]} : vector<8x32xf32> to vector<8x8xf32>
    %82 = arith.truncf %81 : vector<8x8xf32> to vector<8x8xbf16>
    %83 = vector.extract_strided_slice %20 {offsets = [0, 16], sizes = [8, 8], strides = [1, 1]} : vector<8x32xf32> to vector<8x8xf32>
    %84 = arith.truncf %83 : vector<8x8xf32> to vector<8x8xbf16>
    %85 = vector.extract_strided_slice %22 {offsets = [0, 16], sizes = [8, 8], strides = [1, 1]} : vector<8x32xf32> to vector<8x8xf32>
    %86 = arith.truncf %85 : vector<8x8xf32> to vector<8x8xbf16>
    %cst_35 = arith.constant dense<0.000000e+00> : vector<8x8xf32>
    %87 = tpu.matmul %82, %84, %cst_35 {dimension_numbers = #tpu.dot_dimension_numbers<[1], [1], [0], [0], [0, 0, 1, 0], [], []>} : vector<8x8xbf16>, vector<8x8xbf16>, vector<8x8xf32> -> vector<8x8xf32>
    %88 = vector.broadcast %24 : vector<1x8xf32> to vector<8x8xf32>
    %89 = arith.addf %87, %88 : vector<8x8xf32>
    %c0_36 = arith.constant 0 : index
    %c2 = arith.constant 2 : index
    %c0_37 = arith.constant 0 : index
    %c0_38 = arith.constant 0 : index
    %90 = vector.load %arg3[%c0_36, %c2, %c0_37, %c0_38] : memref<1x4x8x8xf32, #tpu.memory_space<vmem>>, vector<1x1x8x8xf32>
    %91 = vector.shape_cast %90 : vector<1x1x8x8xf32> to vector<8x8xf32>
    %92 = arith.addf %89, %91 : vector<8x8xf32>
    %93 = arith.addf %92, %30 : vector<8x8xf32>
    %cst_39 = arith.constant dense<0xFF800000> : vector<8xf32>
    %94 = vector.multi_reduction <maximumf>, %93, %cst_39 [1] : vector<8x8xf32> to vector<8xf32>
    %95 = vector.shape_cast %94 : vector<8xf32> to vector<8x1xf32>
    %96 = vector.broadcast %95 : vector<8x1xf32> to vector<8x8xf32>
    %97 = arith.subf %93, %96 : vector<8x8xf32>
    %98 = math.exp %97 : vector<8x8xf32>
    %cst_40 = arith.constant dense<0.000000e+00> : vector<8xf32>
    %99 = vector.multi_reduction <add>, %98, %cst_40 [1] : vector<8x8xf32> to vector<8xf32>
    %100 = vector.shape_cast %99 : vector<8xf32> to vector<8x1xf32>
    %101 = tpu.reciprocal %100 {approx = true} : vector<8x1xf32> -> vector<8x1xf32>
    %102 = vector.broadcast %101 : vector<8x1xf32> to vector<8x8xf32>
    %103 = arith.mulf %98, %102 : vector<8x8xf32>
    %104 = arith.truncf %103 : vector<8x8xf32> to vector<8x8xbf16>
    %cst_41 = arith.constant dense<0.000000e+00> : vector<8x8xf32>
    %105 = tpu.matmul %104, %86, %cst_41 {dimension_numbers = #tpu.dot_dimension_numbers<[1], [0], [0], [1], [0, 0, 1, 1], [], []>} : vector<8x8xbf16>, vector<8x8xbf16>, vector<8x8xf32> -> vector<8x8xf32>
    %106 = vector.extract_strided_slice %18 {offsets = [0, 24], sizes = [8, 8], strides = [1, 1]} : vector<8x32xf32> to vector<8x8xf32>
    %107 = arith.truncf %106 : vector<8x8xf32> to vector<8x8xbf16>
    %108 = vector.extract_strided_slice %20 {offsets = [0, 24], sizes = [8, 8], strides = [1, 1]} : vector<8x32xf32> to vector<8x8xf32>
    %109 = arith.truncf %108 : vector<8x8xf32> to vector<8x8xbf16>
    %110 = vector.extract_strided_slice %22 {offsets = [0, 24], sizes = [8, 8], strides = [1, 1]} : vector<8x32xf32> to vector<8x8xf32>
    %111 = arith.truncf %110 : vector<8x8xf32> to vector<8x8xbf16>
    %cst_42 = arith.constant dense<0.000000e+00> : vector<8x8xf32>
    %112 = tpu.matmul %107, %109, %cst_42 {dimension_numbers = #tpu.dot_dimension_numbers<[1], [1], [0], [0], [0, 0, 1, 0], [], []>} : vector<8x8xbf16>, vector<8x8xbf16>, vector<8x8xf32> -> vector<8x8xf32>
    %113 = vector.broadcast %24 : vector<1x8xf32> to vector<8x8xf32>
    %114 = arith.addf %112, %113 : vector<8x8xf32>
    %c0_43 = arith.constant 0 : index
    %c3 = arith.constant 3 : index
    %c0_44 = arith.constant 0 : index
    %c0_45 = arith.constant 0 : index
    %115 = vector.load %arg3[%c0_43, %c3, %c0_44, %c0_45] : memref<1x4x8x8xf32, #tpu.memory_space<vmem>>, vector<1x1x8x8xf32>
    %116 = vector.shape_cast %115 : vector<1x1x8x8xf32> to vector<8x8xf32>
    %117 = arith.addf %114, %116 : vector<8x8xf32>
    %118 = arith.addf %117, %30 : vector<8x8xf32>
    %cst_46 = arith.constant dense<0xFF800000> : vector<8xf32>
    %119 = vector.multi_reduction <maximumf>, %118, %cst_46 [1] : vector<8x8xf32> to vector<8xf32>
    %120 = vector.shape_cast %119 : vector<8xf32> to vector<8x1xf32>
    %121 = vector.broadcast %120 : vector<8x1xf32> to vector<8x8xf32>
    %122 = arith.subf %118, %121 : vector<8x8xf32>
    %123 = math.exp %122 : vector<8x8xf32>
    %cst_47 = arith.constant dense<0.000000e+00> : vector<8xf32>
    %124 = vector.multi_reduction <add>, %123, %cst_47 [1] : vector<8x8xf32> to vector<8xf32>
    %125 = vector.shape_cast %124 : vector<8xf32> to vector<8x1xf32>
    %126 = tpu.reciprocal %125 {approx = true} : vector<8x1xf32> -> vector<8x1xf32>
    %127 = vector.broadcast %126 : vector<8x1xf32> to vector<8x8xf32>
    %128 = arith.mulf %123, %127 : vector<8x8xf32>
    %129 = arith.truncf %128 : vector<8x8xf32> to vector<8x8xbf16>
    %cst_48 = arith.constant dense<0.000000e+00> : vector<8x8xf32>
    %130 = tpu.matmul %129, %111, %cst_48 {dimension_numbers = #tpu.dot_dimension_numbers<[1], [0], [0], [1], [0, 0, 1, 1], [], []>} : vector<8x8xbf16>, vector<8x8xbf16>, vector<8x8xf32> -> vector<8x8xf32>
    %131 = tpu.concatenate %55, %80, %105, %130 in 1 : vector<8x8xf32>, vector<8x8xf32>, vector<8x8xf32>, vector<8x8xf32> -> vector<8x32xf32>
    %132 = arith.truncf %131 : vector<8x32xf32> to vector<8x32xbf16>
    %c0_49 = arith.constant 0 : index
    %c0_50 = arith.constant 0 : index
    %133 = vector.load %arg8[%c0_49, %c0_50] : memref<32x32xbf16, #tpu.memory_space<vmem>>, vector<32x32xbf16>
    %cst_51 = arith.constant dense<0.000000e+00> : vector<8x32xf32>
    %134 = tpu.matmul %132, %133, %cst_51 {dimension_numbers = #tpu.dot_dimension_numbers<[1], [0], [0], [1], [0, 0, 1, 1], [], []>} : vector<8x32xbf16>, vector<32x32xbf16>, vector<8x32xf32> -> vector<8x32xf32>
    %135 = arith.addf %1, %134 : vector<8x32xf32>
    %c0_52 = arith.constant 0 : index
    %c0_53 = arith.constant 0 : index
    %c0_54 = arith.constant 0 : index
    %136 = vector.load %arg9[%c0_52, %c0_53, %c0_54] : memref<1x8x32xf32, #tpu.memory_space<vmem>>, vector<1x8x32xf32>
    %137 = vector.shape_cast %136 : vector<1x8x32xf32> to vector<8x32xf32>
    %138 = vector.shape_cast %135 : vector<8x32xf32> to vector<1x8x32xf32>
    tpu.vector_store %arg9[%c0_52, %c0_53, %c0_54], %138 {strides = array<i32>} : memref<1x8x32xf32, #tpu.memory_space<vmem>>, vector<1x8x32xf32>,
    return
  }
  func.func @transform_0(%arg0: i32) -> (i32, i32, i32) {
    %c0_i32 = arith.constant 0 : i32
    %c0_i32_0 = arith.constant 0 : i32
    %c0_i32_1 = arith.constant 0 : i32
    return %arg0, %c0_i32, %c0_i32_0 : i32, i32, i32
  }
  func.func @transform_1(%arg0: i32) -> (i32, i32, i32) {
    %c0_i32 = arith.constant 0 : i32
    %c0_i32_0 = arith.constant 0 : i32
    %c0_i32_1 = arith.constant 0 : i32
    return %arg0, %c0_i32, %c0_i32_0 : i32, i32, i32
  }
  func.func @transform_2(%arg0: i32) -> (i32, i32, i32, i32) {
    %c0_i32 = arith.constant 0 : i32
    %c0_i32_0 = arith.constant 0 : i32
    %c0_i32_1 = arith.constant 0 : i32
    %c0_i32_2 = arith.constant 0 : i32
    %c0_i32_3 = arith.constant 0 : i32
    return %c0_i32, %c0_i32_0, %c0_i32_1, %c0_i32_2 : i32, i32, i32, i32
  }
  func.func @transform_3(%arg0: i32) -> (i32, i32) {
    %c0_i32 = arith.constant 0 : i32
    %c0_i32_0 = arith.constant 0 : i32
    %c0_i32_1 = arith.constant 0 : i32
    return %c0_i32, %c0_i32_0 : i32, i32
  }
  func.func @transform_4(%arg0: i32) -> (i32, i32) {
    %c0_i32 = arith.constant 0 : i32
    %c0_i32_0 = arith.constant 0 : i32
    %c0_i32_1 = arith.constant 0 : i32
    return %c0_i32, %c0_i32_0 : i32, i32
  }
  func.func @transform_5(%arg0: i32) -> (i32, i32) {
    %c0_i32 = arith.constant 0 : i32
    %c0_i32_0 = arith.constant 0 : i32
    %c0_i32_1 = arith.constant 0 : i32
    return %c0_i32, %c0_i32_0 : i32, i32
  }
  func.func @transform_6(%arg0: i32) -> (i32, i32) {
    %c0_i32 = arith.constant 0 : i32
    %c0_i32_0 = arith.constant 0 : i32
    %c0_i32_1 = arith.constant 0 : i32
    return %c0_i32, %c0_i32_0 : i32, i32
  }
  func.func @transform_7(%arg0: i32) -> (i32, i32) {
    %c0_i32 = arith.constant 0 : i32
    %c0_i32_0 = arith.constant 0 : i32
    %c0_i32_1 = arith.constant 0 : i32
    return %c0_i32, %c0_i32_0 : i32, i32
  }
  func.func @transform_8(%arg0: i32) -> (i32, i32, i32) {
    %c0_i32 = arith.constant 0 : i32
    %c0_i32_0 = arith.constant 0 : i32
    %c0_i32_1 = arith.constant 0 : i32
    return %arg0, %c0_i32, %c0_i32_0 : i32, i32, i32
  }
}

module attributes {stable_mosaic.version = 11 : i64} {
  func.func @_lm_head_kernel(%arg0: i32, %arg1: i32, %arg2: memref<16x32xf32, #tpu.memory_space<vmem>>, %arg3: memref<1x32xf32, #tpu.memory_space<vmem>>, %arg4: memref<128x32xbf16, #tpu.memory_space<vmem>>, %arg5: memref<16x128xf32, #tpu.memory_space<vmem>>) attributes {dimension_semantics = [#tpu.dimension_semantics<parallel>, #tpu.dimension_semantics<parallel>], iteration_bounds = array<i64: 1, 1>, scalar_prefetch = 0 : i64, scratch_operands = 0 : i64, tpu.core_type = #tpu.core_type<tc>, window_params = [{transform_indices = @transform_0, window_bounds = array<i64: 16, 32>}, {pipeline_mode = #tpu.pipeline_mode<synchronous>, transform_indices = @transform_1, window_bounds = array<i64: 1, 32>}, {transform_indices = @transform_2, window_bounds = array<i64: 128, 32>}, {transform_indices = @transform_3, window_bounds = array<i64: 16, 128>}]} {
    %c0 = arith.constant 0 : index
    %c0_0 = arith.constant 0 : index
    %0 = vector.load %arg2[%c0, %c0_0] : memref<16x32xf32, #tpu.memory_space<vmem>>, vector<16x32xf32>
    %c0_1 = arith.constant 0 : index
    %c0_2 = arith.constant 0 : index
    %1 = vector.load %arg3[%c0_1, %c0_2] : memref<1x32xf32, #tpu.memory_space<vmem>>, vector<1x32xf32>
    %2 = arith.mulf %0, %0 : vector<16x32xf32>
    %cst = arith.constant dense<0.000000e+00> : vector<16xf32>
    %3 = vector.multi_reduction <add>, %2, %cst [1] : vector<16x32xf32> to vector<16xf32>
    %4 = vector.shape_cast %3 : vector<16xf32> to vector<16x1xf32>
    %cst_3 = arith.constant 3.200000e+01 : f32
    %5 = vector.broadcast %cst_3 : f32 to vector<16x1xf32>
    %6 = arith.divf %4, %5 : vector<16x1xf32>
    %cst_4 = arith.constant 9.99999997E-7 : f32
    %7 = vector.broadcast %cst_4 : f32 to vector<16x1xf32>
    %8 = arith.addf %6, %7 : vector<16x1xf32>
    %9 = math.rsqrt %8 : vector<16x1xf32>
    %10 = vector.broadcast %9 : vector<16x1xf32> to vector<16x32xf32>
    %11 = arith.mulf %0, %10 : vector<16x32xf32>
    %12 = vector.broadcast %1 : vector<1x32xf32> to vector<16x32xf32>
    %13 = arith.mulf %11, %12 : vector<16x32xf32>
    %cst_5 = arith.constant 0.176776692 : f32
    %14 = vector.broadcast %cst_5 : f32 to vector<16x32xf32>
    %15 = arith.mulf %13, %14 : vector<16x32xf32>
    %16 = arith.truncf %15 : vector<16x32xf32> to vector<16x32xbf16>
    %c0_6 = arith.constant 0 : index
    %c0_7 = arith.constant 0 : index
    %17 = vector.load %arg4[%c0_6, %c0_7] : memref<128x32xbf16, #tpu.memory_space<vmem>>, vector<128x32xbf16>
    %cst_8 = arith.constant dense<0.000000e+00> : vector<16x128xf32>
    %18 = tpu.matmul %16, %17, %cst_8 {dimension_numbers = #tpu.dot_dimension_numbers<[1], [1], [0], [0], [0, 0, 1, 0], [], []>} : vector<16x32xbf16>, vector<128x32xbf16>, vector<16x128xf32> -> vector<16x128xf32>
    %c0_9 = arith.constant 0 : index
    %c0_10 = arith.constant 0 : index
    %19 = vector.load %arg5[%c0_9, %c0_10] : memref<16x128xf32, #tpu.memory_space<vmem>>, vector<16x128xf32>
    tpu.vector_store %arg5[%c0_9, %c0_10], %18 {strides = array<i32>} : memref<16x128xf32, #tpu.memory_space<vmem>>, vector<16x128xf32>,
    return
  }
  func.func @transform_0(%arg0: i32, %arg1: i32) -> (i32, i32) {
    %c0_i32 = arith.constant 0 : i32
    %c0_i32_0 = arith.constant 0 : i32
    return %arg0, %c0_i32 : i32, i32
  }
  func.func @transform_1(%arg0: i32, %arg1: i32) -> (i32, i32) {
    %c0_i32 = arith.constant 0 : i32
    %c0_i32_0 = arith.constant 0 : i32
    %c0_i32_1 = arith.constant 0 : i32
    return %c0_i32, %c0_i32_0 : i32, i32
  }
  func.func @transform_2(%arg0: i32, %arg1: i32) -> (i32, i32) {
    %c0_i32 = arith.constant 0 : i32
    %c0_i32_0 = arith.constant 0 : i32
    return %arg1, %c0_i32 : i32, i32
  }
  func.func @transform_3(%arg0: i32, %arg1: i32) -> (i32, i32) {
    %c0_i32 = arith.constant 0 : i32
    return %arg0, %arg1 : i32, i32
  }
}

module attributes {stable_mosaic.version = 11 : i64} {
  func.func @_attn_block_kernel(%arg0: i32, %arg1: memref<1x8x32xf32, #tpu.memory_space<vmem>>, %arg2: memref<1x8x32xf32, #tpu.memory_space<vmem>>, %arg3: memref<1x1x8xf32, #tpu.memory_space<vmem>>, %arg4: memref<1x32xf32, #tpu.memory_space<vmem>>, %arg5: memref<32x32xbf16, #tpu.memory_space<vmem>>, %arg6: memref<32x32xbf16, #tpu.memory_space<vmem>>, %arg7: memref<32x32xbf16, #tpu.memory_space<vmem>>, %arg8: memref<32x32xbf16, #tpu.memory_space<vmem>>, %arg9: memref<1x8x32xf32, #tpu.memory_space<vmem>>) attributes {dimension_semantics = [#tpu.dimension_semantics<parallel>], iteration_bounds = array<i64: 2>, scalar_prefetch = 0 : i64, scratch_operands = 0 : i64, tpu.core_type = #tpu.core_type<tc>, window_params = [{transform_indices = @transform_0, window_bounds = array<i64: 1, 8, 32>}, {transform_indices = @transform_1, window_bounds = array<i64: 1, 8, 32>}, {transform_indices = @transform_2, window_bounds = array<i64: 1, 1, 8>}, {pipeline_mode = #tpu.pipeline_mode<synchronous>, transform_indices = @transform_3, window_bounds = array<i64: 1, 32>}, {pipeline_mode = #tpu.pipeline_mode<synchronous>, transform_indices = @transform_4, window_bounds = array<i64: 32, 32>}, {pipeline_mode = #tpu.pipeline_mode<synchronous>, transform_indices = @transform_5, window_bounds = array<i64: 32, 32>}, {pipeline_mode = #tpu.pipeline_mode<synchronous>, transform_indices = @transform_6, window_bounds = array<i64: 32, 32>}, {pipeline_mode = #tpu.pipeline_mode<synchronous>, transform_indices = @transform_7, window_bounds = array<i64: 32, 32>}, {transform_indices = @transform_8, window_bounds = array<i64: 1, 8, 32>}]} {
    %c0 = arith.constant 0 : index
    %c0_0 = arith.constant 0 : index
    %c0_1 = arith.constant 0 : index
    %0 = vector.load %arg1[%c0, %c0_0, %c0_1] : memref<1x8x32xf32, #tpu.memory_space<vmem>>, vector<1x8x32xf32>
    %1 = vector.shape_cast %0 : vector<1x8x32xf32> to vector<8x32xf32>
    %c0_2 = arith.constant 0 : index
    %c0_3 = arith.constant 0 : index
    %2 = vector.load %arg4[%c0_2, %c0_3] : memref<1x32xf32, #tpu.memory_space<vmem>>, vector<1x32xf32>
    %3 = arith.mulf %1, %1 : vector<8x32xf32>
    %cst = arith.constant dense<0.000000e+00> : vector<8xf32>
    %4 = vector.multi_reduction <add>, %3, %cst [1] : vector<8x32xf32> to vector<8xf32>
    %5 = vector.shape_cast %4 : vector<8xf32> to vector<8x1xf32>
    %cst_4 = arith.constant 3.200000e+01 : f32
    %6 = vector.broadcast %cst_4 : f32 to vector<8x1xf32>
    %7 = arith.divf %5, %6 : vector<8x1xf32>
    %cst_5 = arith.constant 9.99999997E-7 : f32
    %8 = vector.broadcast %cst_5 : f32 to vector<8x1xf32>
    %9 = arith.addf %7, %8 : vector<8x1xf32>
    %10 = math.rsqrt %9 : vector<8x1xf32>
    %11 = vector.broadcast %10 : vector<8x1xf32> to vector<8x32xf32>
    %12 = arith.mulf %1, %11 : vector<8x32xf32>
    %13 = vector.broadcast %2 : vector<1x32xf32> to vector<8x32xf32>
    %14 = arith.mulf %12, %13 : vector<8x32xf32>
    %c0_6 = arith.constant 0 : index
    %c0_7 = arith.constant 0 : index
    %c0_8 = arith.constant 0 : index
    %15 = vector.load %arg2[%c0_6, %c0_7, %c0_8] : memref<1x8x32xf32, #tpu.memory_space<vmem>>, vector<1x8x32xf32>
    %16 = vector.shape_cast %15 : vector<1x8x32xf32> to vector<8x32xf32>
    %17 = arith.truncf %14 : vector<8x32xf32> to vector<8x32xbf16>
    %18 = arith.truncf %16 : vector<8x32xf32> to vector<8x32xbf16>
    %c0_9 = arith.constant 0 : index
    %c0_10 = arith.constant 0 : index
    %19 = vector.load %arg5[%c0_9, %c0_10] : memref<32x32xbf16, #tpu.memory_space<vmem>>, vector<32x32xbf16>
    %cst_11 = arith.constant dense<0.000000e+00> : vector<8x32xf32>
    %20 = tpu.matmul %17, %19, %cst_11 {dimension_numbers = #tpu.dot_dimension_numbers<[1], [0], [0], [1], [0, 0, 1, 1], [], []>} : vector<8x32xbf16>, vector<32x32xbf16>, vector<8x32xf32> -> vector<8x32xf32>
    %c0_12 = arith.constant 0 : index
    %c0_13 = arith.constant 0 : index
    %21 = vector.load %arg6[%c0_12, %c0_13] : memref<32x32xbf16, #tpu.memory_space<vmem>>, vector<32x32xbf16>
    %cst_14 = arith.constant dense<0.000000e+00> : vector<8x32xf32>
    %22 = tpu.matmul %18, %21, %cst_14 {dimension_numbers = #tpu.dot_dimension_numbers<[1], [0], [0], [1], [0, 0, 1, 1], [], []>} : vector<8x32xbf16>, vector<32x32xbf16>, vector<8x32xf32> -> vector<8x32xf32>
    %c0_15 = arith.constant 0 : index
    %c0_16 = arith.constant 0 : index
    %23 = vector.load %arg7[%c0_15, %c0_16] : memref<32x32xbf16, #tpu.memory_space<vmem>>, vector<32x32xbf16>
    %cst_17 = arith.constant dense<0.000000e+00> : vector<8x32xf32>
    %24 = tpu.matmul %18, %23, %cst_17 {dimension_numbers = #tpu.dot_dimension_numbers<[1], [0], [0], [1], [0, 0, 1, 1], [], []>} : vector<8x32xbf16>, vector<32x32xbf16>, vector<8x32xf32> -> vector<8x32xf32>
    %c0_18 = arith.constant 0 : index
    %c0_19 = arith.constant 0 : index
    %c0_20 = arith.constant 0 : index
    %25 = vector.load %arg3[%c0_18, %c0_19, %c0_20] : memref<1x1x8xf32, #tpu.memory_space<vmem>>, vector<1x1x8xf32>
    %26 = vector.shape_cast %25 : vector<1x1x8xf32> to vector<1x8xf32>
    %27 = vector.extract_strided_slice %20 {offsets = [0, 0], sizes = [8, 8], strides = [1, 1]} : vector<8x32xf32> to vector<8x8xf32>
    %28 = arith.truncf %27 : vector<8x8xf32> to vector<8x8xbf16>
    %29 = vector.extract_strided_slice %22 {offsets = [0, 0], sizes = [8, 8], strides = [1, 1]} : vector<8x32xf32> to vector<8x8xf32>
    %30 = arith.truncf %29 : vector<8x8xf32> to vector<8x8xbf16>
    %31 = vector.extract_strided_slice %24 {offsets = [0, 0], sizes = [8, 8], strides = [1, 1]} : vector<8x32xf32> to vector<8x8xf32>
    %32 = arith.truncf %31 : vector<8x8xf32> to vector<8x8xbf16>
    %cst_21 = arith.constant dense<0.000000e+00> : vector<8x8xf32>
    %33 = tpu.matmul %28, %30, %cst_21 {dimension_numbers = #tpu.dot_dimension_numbers<[1], [1], [0], [0], [0, 0, 1, 0], [], []>} : vector<8x8xbf16>, vector<8x8xbf16>, vector<8x8xf32> -> vector<8x8xf32>
    %34 = vector.broadcast %26 : vector<1x8xf32> to vector<8x8xf32>
    %35 = arith.addf %33, %34 : vector<8x8xf32>
    %cst_22 = arith.constant dense<0xFF800000> : vector<8xf32>
    %36 = vector.multi_reduction <maximumf>, %35, %cst_22 [1] : vector<8x8xf32> to vector<8xf32>
    %37 = vector.shape_cast %36 : vector<8xf32> to vector<8x1xf32>
    %38 = vector.broadcast %37 : vector<8x1xf32> to vector<8x8xf32>
    %39 = arith.subf %35, %38 : vector<8x8xf32>
    %40 = math.exp %39 : vector<8x8xf32>
    %cst_23 = arith.constant dense<0.000000e+00> : vector<8xf32>
    %41 = vector.multi_reduction <add>, %40, %cst_23 [1] : vector<8x8xf32> to vector<8xf32>
    %42 = vector.shape_cast %41 : vector<8xf32> to vector<8x1xf32>
    %43 = tpu.reciprocal %42 {approx = true} : vector<8x1xf32> -> vector<8x1xf32>
    %44 = vector.broadcast %43 : vector<8x1xf32> to vector<8x8xf32>
    %45 = arith.mulf %40, %44 : vector<8x8xf32>
    %46 = arith.truncf %45 : vector<8x8xf32> to vector<8x8xbf16>
    %cst_24 = arith.constant dense<0.000000e+00> : vector<8x8xf32>
    %47 = tpu.matmul %46, %32, %cst_24 {dimension_numbers = #tpu.dot_dimension_numbers<[1], [0], [0], [1], [0, 0, 1, 1], [], []>} : vector<8x8xbf16>, vector<8x8xbf16>, vector<8x8xf32> -> vector<8x8xf32>
    %48 = vector.extract_strided_slice %20 {offsets = [0, 8], sizes = [8, 8], strides = [1, 1]} : vector<8x32xf32> to vector<8x8xf32>
    %49 = arith.truncf %48 : vector<8x8xf32> to vector<8x8xbf16>
    %50 = vector.extract_strided_slice %22 {offsets = [0, 8], sizes = [8, 8], strides = [1, 1]} : vector<8x32xf32> to vector<8x8xf32>
    %51 = arith.truncf %50 : vector<8x8xf32> to vector<8x8xbf16>
    %52 = vector.extract_strided_slice %24 {offsets = [0, 8], sizes = [8, 8], strides = [1, 1]} : vector<8x32xf32> to vector<8x8xf32>
    %53 = arith.truncf %52 : vector<8x8xf32> to vector<8x8xbf16>
    %cst_25 = arith.constant dense<0.000000e+00> : vector<8x8xf32>
    %54 = tpu.matmul %49, %51, %cst_25 {dimension_numbers = #tpu.dot_dimension_numbers<[1], [1], [0], [0], [0, 0, 1, 0], [], []>} : vector<8x8xbf16>, vector<8x8xbf16>, vector<8x8xf32> -> vector<8x8xf32>
    %55 = vector.broadcast %26 : vector<1x8xf32> to vector<8x8xf32>
    %56 = arith.addf %54, %55 : vector<8x8xf32>
    %cst_26 = arith.constant dense<0xFF800000> : vector<8xf32>
    %57 = vector.multi_reduction <maximumf>, %56, %cst_26 [1] : vector<8x8xf32> to vector<8xf32>
    %58 = vector.shape_cast %57 : vector<8xf32> to vector<8x1xf32>
    %59 = vector.broadcast %58 : vector<8x1xf32> to vector<8x8xf32>
    %60 = arith.subf %56, %59 : vector<8x8xf32>
    %61 = math.exp %60 : vector<8x8xf32>
    %cst_27 = arith.constant dense<0.000000e+00> : vector<8xf32>
    %62 = vector.multi_reduction <add>, %61, %cst_27 [1] : vector<8x8xf32> to vector<8xf32>
    %63 = vector.shape_cast %62 : vector<8xf32> to vector<8x1xf32>
    %64 = tpu.reciprocal %63 {approx = true} : vector<8x1xf32> -> vector<8x1xf32>
    %65 = vector.broadcast %64 : vector<8x1xf32> to vector<8x8xf32>
    %66 = arith.mulf %61, %65 : vector<8x8xf32>
    %67 = arith.truncf %66 : vector<8x8xf32> to vector<8x8xbf16>
    %cst_28 = arith.constant dense<0.000000e+00> : vector<8x8xf32>
    %68 = tpu.matmul %67, %53, %cst_28 {dimension_numbers = #tpu.dot_dimension_numbers<[1], [0], [0], [1], [0, 0, 1, 1], [], []>} : vector<8x8xbf16>, vector<8x8xbf16>, vector<8x8xf32> -> vector<8x8xf32>
    %69 = vector.extract_strided_slice %20 {offsets = [0, 16], sizes = [8, 8], strides = [1, 1]} : vector<8x32xf32> to vector<8x8xf32>
    %70 = arith.truncf %69 : vector<8x8xf32> to vector<8x8xbf16>
    %71 = vector.extract_strided_slice %22 {offsets = [0, 16], sizes = [8, 8], strides = [1, 1]} : vector<8x32xf32> to vector<8x8xf32>
    %72 = arith.truncf %71 : vector<8x8xf32> to vector<8x8xbf16>
    %73 = vector.extract_strided_slice %24 {offsets = [0, 16], sizes = [8, 8], strides = [1, 1]} : vector<8x32xf32> to vector<8x8xf32>
    %74 = arith.truncf %73 : vector<8x8xf32> to vector<8x8xbf16>
    %cst_29 = arith.constant dense<0.000000e+00> : vector<8x8xf32>
    %75 = tpu.matmul %70, %72, %cst_29 {dimension_numbers = #tpu.dot_dimension_numbers<[1], [1], [0], [0], [0, 0, 1, 0], [], []>} : vector<8x8xbf16>, vector<8x8xbf16>, vector<8x8xf32> -> vector<8x8xf32>
    %76 = vector.broadcast %26 : vector<1x8xf32> to vector<8x8xf32>
    %77 = arith.addf %75, %76 : vector<8x8xf32>
    %cst_30 = arith.constant dense<0xFF800000> : vector<8xf32>
    %78 = vector.multi_reduction <maximumf>, %77, %cst_30 [1] : vector<8x8xf32> to vector<8xf32>
    %79 = vector.shape_cast %78 : vector<8xf32> to vector<8x1xf32>
    %80 = vector.broadcast %79 : vector<8x1xf32> to vector<8x8xf32>
    %81 = arith.subf %77, %80 : vector<8x8xf32>
    %82 = math.exp %81 : vector<8x8xf32>
    %cst_31 = arith.constant dense<0.000000e+00> : vector<8xf32>
    %83 = vector.multi_reduction <add>, %82, %cst_31 [1] : vector<8x8xf32> to vector<8xf32>
    %84 = vector.shape_cast %83 : vector<8xf32> to vector<8x1xf32>
    %85 = tpu.reciprocal %84 {approx = true} : vector<8x1xf32> -> vector<8x1xf32>
    %86 = vector.broadcast %85 : vector<8x1xf32> to vector<8x8xf32>
    %87 = arith.mulf %82, %86 : vector<8x8xf32>
    %88 = arith.truncf %87 : vector<8x8xf32> to vector<8x8xbf16>
    %cst_32 = arith.constant dense<0.000000e+00> : vector<8x8xf32>
    %89 = tpu.matmul %88, %74, %cst_32 {dimension_numbers = #tpu.dot_dimension_numbers<[1], [0], [0], [1], [0, 0, 1, 1], [], []>} : vector<8x8xbf16>, vector<8x8xbf16>, vector<8x8xf32> -> vector<8x8xf32>
    %90 = vector.extract_strided_slice %20 {offsets = [0, 24], sizes = [8, 8], strides = [1, 1]} : vector<8x32xf32> to vector<8x8xf32>
    %91 = arith.truncf %90 : vector<8x8xf32> to vector<8x8xbf16>
    %92 = vector.extract_strided_slice %22 {offsets = [0, 24], sizes = [8, 8], strides = [1, 1]} : vector<8x32xf32> to vector<8x8xf32>
    %93 = arith.truncf %92 : vector<8x8xf32> to vector<8x8xbf16>
    %94 = vector.extract_strided_slice %24 {offsets = [0, 24], sizes = [8, 8], strides = [1, 1]} : vector<8x32xf32> to vector<8x8xf32>
    %95 = arith.truncf %94 : vector<8x8xf32> to vector<8x8xbf16>
    %cst_33 = arith.constant dense<0.000000e+00> : vector<8x8xf32>
    %96 = tpu.matmul %91, %93, %cst_33 {dimension_numbers = #tpu.dot_dimension_numbers<[1], [1], [0], [0], [0, 0, 1, 0], [], []>} : vector<8x8xbf16>, vector<8x8xbf16>, vector<8x8xf32> -> vector<8x8xf32>
    %97 = vector.broadcast %26 : vector<1x8xf32> to vector<8x8xf32>
    %98 = arith.addf %96, %97 : vector<8x8xf32>
    %cst_34 = arith.constant dense<0xFF800000> : vector<8xf32>
    %99 = vector.multi_reduction <maximumf>, %98, %cst_34 [1] : vector<8x8xf32> to vector<8xf32>
    %100 = vector.shape_cast %99 : vector<8xf32> to vector<8x1xf32>
    %101 = vector.broadcast %100 : vector<8x1xf32> to vector<8x8xf32>
    %102 = arith.subf %98, %101 : vector<8x8xf32>
    %103 = math.exp %102 : vector<8x8xf32>
    %cst_35 = arith.constant dense<0.000000e+00> : vector<8xf32>
    %104 = vector.multi_reduction <add>, %103, %cst_35 [1] : vector<8x8xf32> to vector<8xf32>
    %105 = vector.shape_cast %104 : vector<8xf32> to vector<8x1xf32>
    %106 = tpu.reciprocal %105 {approx = true} : vector<8x1xf32> -> vector<8x1xf32>
    %107 = vector.broadcast %106 : vector<8x1xf32> to vector<8x8xf32>
    %108 = arith.mulf %103, %107 : vector<8x8xf32>
    %109 = arith.truncf %108 : vector<8x8xf32> to vector<8x8xbf16>
    %cst_36 = arith.constant dense<0.000000e+00> : vector<8x8xf32>
    %110 = tpu.matmul %109, %95, %cst_36 {dimension_numbers = #tpu.dot_dimension_numbers<[1], [0], [0], [1], [0, 0, 1, 1], [], []>} : vector<8x8xbf16>, vector<8x8xbf16>, vector<8x8xf32> -> vector<8x8xf32>
    %111 = tpu.concatenate %47, %68, %89, %110 in 1 : vector<8x8xf32>, vector<8x8xf32>, vector<8x8xf32>, vector<8x8xf32> -> vector<8x32xf32>
    %112 = arith.truncf %111 : vector<8x32xf32> to vector<8x32xbf16>
    %c0_37 = arith.constant 0 : index
    %c0_38 = arith.constant 0 : index
    %113 = vector.load %arg8[%c0_37, %c0_38] : memref<32x32xbf16, #tpu.memory_space<vmem>>, vector<32x32xbf16>
    %cst_39 = arith.constant dense<0.000000e+00> : vector<8x32xf32>
    %114 = tpu.matmul %112, %113, %cst_39 {dimension_numbers = #tpu.dot_dimension_numbers<[1], [0], [0], [1], [0, 0, 1, 1], [], []>} : vector<8x32xbf16>, vector<32x32xbf16>, vector<8x32xf32> -> vector<8x32xf32>
    %115 = arith.addf %1, %114 : vector<8x32xf32>
    %c0_40 = arith.constant 0 : index
    %c0_41 = arith.constant 0 : index
    %c0_42 = arith.constant 0 : index
    %116 = vector.load %arg9[%c0_40, %c0_41, %c0_42] : memref<1x8x32xf32, #tpu.memory_space<vmem>>, vector<1x8x32xf32>
    %117 = vector.shape_cast %116 : vector<1x8x32xf32> to vector<8x32xf32>
    %118 = vector.shape_cast %115 : vector<8x32xf32> to vector<1x8x32xf32>
    tpu.vector_store %arg9[%c0_40, %c0_41, %c0_42], %118 {strides = array<i32>} : memref<1x8x32xf32, #tpu.memory_space<vmem>>, vector<1x8x32xf32>,
    return
  }
  func.func @transform_0(%arg0: i32) -> (i32, i32, i32) {
    %c0_i32 = arith.constant 0 : i32
    %c0_i32_0 = arith.constant 0 : i32
    %c0_i32_1 = arith.constant 0 : i32
    return %arg0, %c0_i32, %c0_i32_0 : i32, i32, i32
  }
  func.func @transform_1(%arg0: i32) -> (i32, i32, i32) {
    %c0_i32 = arith.constant 0 : i32
    %c0_i32_0 = arith.constant 0 : i32
    %c0_i32_1 = arith.constant 0 : i32
    return %arg0, %c0_i32, %c0_i32_0 : i32, i32, i32
  }
  func.func @transform_2(%arg0: i32) -> (i32, i32, i32) {
    %c0_i32 = arith.constant 0 : i32
    %c0_i32_0 = arith.constant 0 : i32
    %c0_i32_1 = arith.constant 0 : i32
    return %arg0, %c0_i32, %c0_i32_0 : i32, i32, i32
  }
  func.func @transform_3(%arg0: i32) -> (i32, i32) {
    %c0_i32 = arith.constant 0 : i32
    %c0_i32_0 = arith.constant 0 : i32
    %c0_i32_1 = arith.constant 0 : i32
    return %c0_i32, %c0_i32_0 : i32, i32
  }
  func.func @transform_4(%arg0: i32) -> (i32, i32) {
    %c0_i32 = arith.constant 0 : i32
    %c0_i32_0 = arith.constant 0 : i32
    %c0_i32_1 = arith.constant 0 : i32
    return %c0_i32, %c0_i32_0 : i32, i32
  }
  func.func @transform_5(%arg0: i32) -> (i32, i32) {
    %c0_i32 = arith.constant 0 : i32
    %c0_i32_0 = arith.constant 0 : i32
    %c0_i32_1 = arith.constant 0 : i32
    return %c0_i32, %c0_i32_0 : i32, i32
  }
  func.func @transform_6(%arg0: i32) -> (i32, i32) {
    %c0_i32 = arith.constant 0 : i32
    %c0_i32_0 = arith.constant 0 : i32
    %c0_i32_1 = arith.constant 0 : i32
    return %c0_i32, %c0_i32_0 : i32, i32
  }
  func.func @transform_7(%arg0: i32) -> (i32, i32) {
    %c0_i32 = arith.constant 0 : i32
    %c0_i32_0 = arith.constant 0 : i32
    %c0_i32_1 = arith.constant 0 : i32
    return %c0_i32, %c0_i32_0 : i32, i32
  }
  func.func @transform_8(%arg0: i32) -> (i32, i32, i32) {
    %c0_i32 = arith.constant 0 : i32
    %c0_i32_0 = arith.constant 0 : i32
    %c0_i32_1 = arith.constant 0 : i32
    return %arg0, %c0_i32, %c0_i32_0 : i32, i32, i32
  }
}

</mosaic_0001>

<bundles_post_ra>
// kernel: knowledge_generator_forward.16
= control target key start
LH: loop header
LB: loop body
LE: loop exit
PB: predicated region body
PF: predicated region fallthrough
CT: control target
= control target key end

     0   :  { %vm15_vm0 = vcmask 261120   ;;  %s85_s0 = inlined_call_operand.vmem [shape: f32[16,32], index: 0, kind: input, shape index: {}]   ;;  %s86_s1 = inlined_call_operand.vmem [shape: f32[1,32], index: 1, kind: input, shape index: {}]   ;;  %s87_s2 = inlined_call_operand.vmem [shape: f32[16,32], index: 2, kind: output, shape index: {}]  }
   0x1   :  { %v11_v0 = vld [vmem:[%s85_s0] sm:$0xff]  ;;  %v12_v1 = vld [vmem:[%s85_s0 + $0x8] sm:$0xff] }
   0x2   :  { %v13_v2 = vmul.f32 %v11_v0, %v11_v0  ;;  %v14_v3 = vmul.f32 %v12_v1, %v12_v1  ;;  %v46_v13 = vld [vmem:[%s86_s1] ss:$0 sm:$0xff] }
   0x4   :  { %v16_v4 = vsel %vm15_vm0, %v13_v2, 0.0  ;;  %v19_v5 = vsel %vm15_vm0, %v14_v3, 0.0 }
   0x5   :  { %17 = vadd.xlane.f32.xlu0 %v16_v4 }
   0x9   :  { %20 = vadd.xlane.f32.xlu0 %v19_v5 }
  0x8e   :  { %v18_v6 = vpop.xlane.xlu0 %17 }
  0x8f   :  { %v23_v7 = vmul.f32 0.03125, %v18_v6 }
  0x91   :  { %v25_v8 = vadd.f32 1e-06, %v23_v7 }
  0x92   :  { %v21_v9 = vpop.xlane.xlu0 %20 }
  0x93   :  { %47 = vrsqrt.f32 %v25_v8  ;;  %v24_v10 = vmul.f32 0.03125, %v21_v9 }
  0x95   :  { %v26_v11 = vadd.f32 1e-06, %v24_v10 }
  0x97   :  { %49 = vrsqrt.f32 %v26_v11 }
  0xa0   :  { %v48_v12 = vpop.eup %47 }
  0xa1   :  { %v29_v14 = vmul.f32 %v48_v12, %v11_v0 }
  0xa3   :  { %v38_v15 = vmul.f32 %v46_v13, %v29_v14 }
  0xa4   :  { %v50_v16 = vpop.eup %49 }
  0xa5   :  { %40 = vst.msk [vmem:[%s87_s2] sm:$0xff] %vm15_vm0, %v38_v15  ;;  %v30_v17 = vmul.f32 %v50_v16, %v12_v1 }
  0xa7   :  { %v39_v18 = vmul.f32 %v46_v13, %v30_v17 }
  0xa9   :  { %41 = vst.msk [vmem:[%s87_s2 + $0x8] sm:$0xff] %vm15_vm0, %v39_v18 }

// kernel: knowledge_generator_forward.13
= control target key start
LH: loop header
LB: loop body
LE: loop exit
PB: predicated region body
PF: predicated region fallthrough
CT: control target
= control target key end

     0   :  { %vm23_vm0 = vcmask 261120   ;;  %v245_v6 = vmov 0.0   ;;  %vm246_vm1 = vmmov 0   ;;  %vm143_vm2 = vcmask 523264   ;;  %s316_s0 = inlined_call_operand.vmem [shape: f32[16,32], index: 0, kind: input, shape index: {}]   ;;  %s317_s2 = inlined_call_operand.vmem [shape: bf16[32,64], index: 2, kind: input, shape index: {}]   ;;  %s318_s3 = inlined_call_operand.vmem [shape: bf16[64,32], index: 3, kind: input, shape index: {}]   ;;  %s319_s1 = inlined_call_operand.vmem [shape: f32[1,32], index: 1, kind: input, shape index: {}]   ;;  %s320_s4 = inlined_call_operand.vmem [shape: f32[16,32], index: 4, kind: output, shape index: {}]  }
   0x1   :  { %v18_v0 = vld [vmem:[%s316_s0] sm:$0xff]  ;;  %v278_v1 = vld [vmem:[%s316_s0 + $0x8] sm:$0xff]  ;;  %213 = vmatprep.subr.bf16.mxu0 %v245_v6  ;;  %217 = vmatprep.mubr.msk.bf16.mxu0 %vm246_vm1, %v245_v6  ;;  %v237_v9 = vld [vmem:[%s318_s3 + $0x18] sm:$0xff]  }
   0x2   :  { %v21_v2 = vmul.f32 %v18_v0, %v18_v0  ;;  %v22_v3 = vmul.f32 %v278_v1, %v278_v1  ;;  %v235_v7 = vld [vmem:[%s317_s2 + $0x8] sm:$0xff]   ;;  %221 = vmatprep.subr.bf16.mxu1 %v245_v6  ;;  %229 = vmatprep.mubr.msk.bf16.mxu1 %vm246_vm1, %v245_v6  ;;  %v236_v8 = vld [vmem:[%s317_s2] sm:$0xff]   ;;  %v238_v10 = vld [vmem:[%s318_s3 + $0x10] sm:$0xff]  }
   0x3   :  { %214 = vmatpush3.bf16.msra.mxu0 %v235_v7  ;;  %222 = vmatpush3.bf16.msra.mxu1 %v237_v9  ;;  %v196_v20 = vld [vmem:[%s319_s1] ss:$0 sm:$0xff]  ;;  %v239_v25 = vld [vmem:[%s318_s3 + $0x8] sm:$0xff]  }
   0x4   :  { %v24_v4 = vsel %vm23_vm0, %v21_v2, 0.0  ;;  %v27_v5 = vsel %vm23_vm0, %v22_v3, 0.0  ;;  %215 = vmatprep.subr.bf16.mxu0 %v245_v6  ;;  %223 = vmatprep.subr.bf16.mxu1 %v245_v6  ;;  %v240_v26 = vld [vmem:[%s318_s3] sm:$0xff]  }
   0x5   :  { %25 = vadd.xlane.f32.xlu0 %v24_v4 }
   0x7   :  { %216 = vmatpush3.bf16.msra.mxu0 %v236_v8  ;;  %224 = vmatpush3.bf16.msra.mxu1 %v238_v10 }
   0x8   :  { %225 = vmatprep.subr.bf16.mxu1 %v245_v6 }
   0x9   :  { %28 = vadd.xlane.f32.xlu0 %v27_v5 }
   0xb   :  { %226 = vmatpush3.bf16.msra.mxu1 %v239_v25 }
   0xc   :  { %227 = vmatprep.subr.bf16.mxu1 %v245_v6 }
   0xf   :  { %228 = vmatpush3.bf16.msra.mxu1 %v240_v26 }
  0x8e   :  { %v26_v11 = vpop.xlane.xlu0 %25 }
  0x8f   :  { %v31_v12 = vmul.f32 0.03125, %v26_v11 }
  0x91   :  { %v33_v13 = vadd.f32 1e-06, %v31_v12 }
  0x92   :  { %v29_v14 = vpop.xlane.xlu0 %28 }
  0x93   :  { %241 = vrsqrt.f32 %v33_v13  ;;  %v32_v15 = vmul.f32 0.03125, %v29_v14 }
  0x95   :  { %v34_v16 = vadd.f32 1e-06, %v32_v15 }
  0x97   :  { %243 = vrsqrt.f32 %v34_v16 }
  0xa0   :  { %v242_v17 = vpop.eup %241 }
  0xa1   :  { %v37_v18 = vmul.f32 %v242_v17, %v18_v0 }
  0xa3   :  { %v45_v22 = vmul.f32 %v196_v20, %v37_v18 }
  0xa4   :  { %v244_v19 = vpop.eup %243 }
  0xa5   :  { %v38_v21 = vmul.f32 %v244_v19, %v278_v1 }
  0xa7   :  { %v46_v23 = vmul.f32 %v196_v20, %v38_v21 }
  0xa9   :  { %v47_v24 = vpack.c.bf16 %v46_v23, %v45_v22 }
  0xab   :  { %218 = vmatmul.mubr.msk.bf16.vlgmr.msra.gmra.mxu0 %vm23_vm0, %v47_v24 }
 0x16b   :  { %v101_v27 = vpop.f32.mrf.mxu0 }
 0x16c   :  { %v108_v30 = vmax.f32 %v101_v27, 0.0 }
 0x16d   :  { %v219_v28 = vpop.f32.mrf.mxu0 }
 0x16f   :  { %v104_v29 = vpop.f32.mrf.mxu0 }
 0x170   :  { %v109_v31 = vmax.f32 %v104_v29, 0.0 }
 0x171   :  { %v220_v32 = vpop.f32.mrf.mxu0 }
 0x172   :  { %v110_v33 = vpack.c.bf16 %v109_v31, %v108_v30 }
 0x174   :  { %230 = vmatmul.mubr.msk.bf16.vlgmr.msra.gmra.mxu1 %vm143_vm2, %v110_v33 }
 0x234   :  { %v181_v34 = vpop.f32.mrf.mxu1 }
 0x235   :  { %v188_v35 = vadd.f32 %v181_v34, %v18_v0 }
 0x236   :  { %v231_v36 = vpop.f32.mrf.mxu1 }
 0x237   :  { %190 = vst.msk [vmem:[%s320_s4] sm:$0xff] %vm23_vm0, %v188_v35 }
 0x238   :  { %v184_v37 = vpop.f32.mrf.mxu1 }
 0x239   :  { %v189_v38 = vadd.f32 %v184_v37, %v278_v1 }
 0x23a   :  { %v232_v39 = vpop.f32.mrf.mxu1 }
 0x23b   :  { %191 = vst.msk [vmem:[%s320_s4 + $0x8] sm:$0xff] %vm23_vm0, %v189_v38 }

// kernel: knowledge_generator_forward.12
= control target key start
LH: loop header
LB: loop body
LE: loop exit
PB: predicated region body
PF: predicated region fallthrough
CT: control target
= control target key end

     0   :  { %s1353_s27 = smov 0   ;;  %s1512_s0 = inlined_call_operand.vmem [shape: f32[2,8,32], index: 0, kind: input, shape index: {}]   ;;  %s1513_s1 = inlined_call_operand.vmem [shape: f32[2,1,8], index: 1, kind: input, shape index: {}]   ;;  %s1514_s2 = inlined_call_operand.vmem [shape: f32[1,4,8,8], index: 2, kind: input, shape index: {}]   ;;  %s1515_s3 = inlined_call_operand.vmem [shape: f32[1,32], index: 3, kind: input, shape index: {}]   ;;  %s1516_s4 = inlined_call_operand.vmem [shape: bf16[32,32], index: 4, kind: input, shape index: {}]   ;;  %s1517_s5 = inlined_call_operand.vmem [shape: bf16[32,32], index: 5, kind: input, shape index: {}]   ;;  %s1518_s6 = inlined_call_operand.vmem [shape: bf16[32,32], index: 6, kind: input, shape index: {}]   ;;  %s1519_s7 = inlined_call_operand.vmem [shape: bf16[32,32], index: 7, kind: input, shape index: {}]   ;;  %s1520_s8 = inlined_call_operand.vmem [shape: f32[2,8,32], index: 8, kind: output, shape index: {}]  }
   0x1 LB: > { %s1108_s28 = sadd.s32 4294967295, %s1298_s27   ;;  %p1112_p0 = scmp.ge.s32.totalorder %s1298_s27, 1  ;;  %s1298_s27 = sphi %s1353_s27, %s18_s27  }
   0x2   : > { %p269_p1 = scmp.lt.s32.totalorder %s1298_s27, 3 }
   0x4   : > { %p270_p2 = pnand %p1112_p0, %p269_p1 }
   0x5   : > { %p304_p3 = scmp.lt.s32.totalorder (!%p270_p2), %s1108_s28, 1  ;;  %s1302_s25 = smov (!%p270_p2), 120  }
   0x6   : > { %273 = sbr.rel (%p270_p2) target bundleno = 1535 (0x5ff), region = 52  ;;  %s1303_s26 = smov (!%p270_p2), 112  }
   0x7   : > { %s1304_s30 = smov (!%p270_p2), 104   ;;  %s1305_s22 = smov (!%p270_p2), 8  }
   0xb   : > { %s1522_s28 = smov (!%p304_p3, %s1108_s28), 1  ;;  %vm319_vm0 = vcmask 261120   ;;  %v1266_v3 = vld [vmem:[%s1516_s4 + $0x8] sm:$0xff]   ;;  %v1300_v5 = vmov 0.0   ;;  %v1268_v6 = vld [vmem:[%s1516_s4] sm:$0xff]   ;;  %vm1301_vm1 = vmmov 0  }
   0xc   : > { %s1113_s29 = sshll.u32 %s1522_s28, 3  ;;  %v1267_v4 = vld [vmem:[%s1517_s5 + $0x8] sm:$0xff]   ;;  %1170 = vmatprep.subr.bf16.mxu0 %v1300_v5  ;;  %1178 = vmatprep.subr.bf16.mxu1 %v1300_v5  ;;  %v1269_v7 = vld [vmem:[%s1517_s5] sm:$0xff]   ;;  %vm517_vm2 = vcmask 64512   ;;  %vm581_vm3 = vcmask 1043456   ;;  %s310_s11 = scalar_lea.vmem %s1513_s1, %s1522_s28  ;;  %v1132_v62 = vld [vmem:[%s1514_s2 + $0x10] sm:$0xff] }
   0xd   : > { %s307_s10 = scalar_lea.vmem %s1512_s0, %s1113_s29  ;;  %1171 = vmatpush3.bf16.msra.mxu0 %v1266_v3  ;;  %1179 = vmatpush3.bf16.msra.mxu1 %v1267_v4  ;;  %v1115_v12 = vld [vmem:[%s1515_s3] ss:$0 sm:$0xff]  ;;  %v1270_v15 = vld [vmem:[%s1518_s6 + $0x8] sm:$0xff]   ;;  %vm980_vm4 = vcmask 130048   ;;  %vm982_vm5 = vcmask 195584  }
   0xe   : > { %v1369_v0 = vld [vmem:[%s307_s10] sm:$0xff]  ;;  %1172 = vmatprep.subr.bf16.mxu0 %v1300_v5  ;;  %1180 = vmatprep.subr.bf16.mxu1 %v1300_v5  ;;  %v1129_v54 = vld [vmem:[%s1514_s2 + $0x8] sm:$0xff]  ;;  %s314_s10 = scalar_lea.vmem %s1520_s8, %s1113_s29 }
   0xf   : > { %v318_v1 = vmul.f32 %v1369_v0, %v1369_v0  ;;  %1174 = vmatprep.mubr.msk.bf16.mxu0 %vm1301_vm1, %v1300_v5  ;;  %1182 = vmatprep.mubr.msk.bf16.mxu1 %vm1301_vm1, %v1300_v5  ;;  %v1271_v17 = vld [vmem:[%s1518_s6] sm:$0xff]  }
  0x10   : > { %v1125_v44 = vld [vmem:[%s310_s11] ss:$0 sm:$0xff] }
  0x11   : > { %v320_v2 = vsel %vm319_vm0, %v318_v1, 0.0  ;;  %1173 = vmatpush3.bf16.msra.mxu0 %v1268_v6  ;;  %1181 = vmatpush3.bf16.msra.mxu1 %v1269_v7  ;;  %v564_v46 = vld [vmem:[%s1514_s2] sm:$0xff] }
  0x12   : > { %321 = vadd.xlane.f32.xlu0 %v320_v2  ;;  %1186 = vmatprep.subr.bf16.mxu0 %v1300_v5 }
  0x13   : > { %1194 = vmatprep.subr.bf16.mxu1 %v1300_v5 }
  0x9b   : > { %v322_v8 = vpop.xlane.xlu0 %321 }
  0x9c   : > { %v324_v9 = vmul.f32 0.03125, %v322_v8  ;;  %v1135_v8 = vld [vmem:[%s1514_s2 + $0x18] sm:$0xff] }
  0x9e   : > { %v325_v10 = vadd.f32 1e-06, %v324_v9 }
  0xa0   : > { %1274 = vrsqrt.f32 %v325_v10 }
  0xad   : > { %v1275_v11 = vpop.eup %1274 }
  0xae   : > { %v327_v13 = vmul.f32 %v1275_v11, %v1369_v0 }
  0xb0   : > { %v334_v14 = vmul.f32 %v1115_v12, %v327_v13 }
  0xb2   : > { %v335_v16 = vpack.c.bf16 %v334_v14, %v334_v14 }
  0xb4   : > { %1175 = vmatmul.mubr.msk.bf16.vlgmr.msra.gmra.mxu0 %vm319_vm0, %v335_v16  ;;  %1183 = vmatmul.mubr.msk.bf16.vlgmr.msra.gmra.mxu1 %vm319_vm0, %v335_v16 }
  0xb5   : > { %1187 = vmatpush3.bf16.msra.mxu0 %v1270_v15  ;;  %1190 = vmatprep.mubr.msk.bf16.mxu0 %vm1301_vm1, %v1300_v5 }
  0xb6   : > { %1188 = vmatprep.subr.bf16.mxu0 %v1300_v5  ;;  %1196 = vmatprep.mubr.msk.bf16.mxu1 %vm1301_vm1, %v1300_v5 }
  0xb9   : > { %1189 = vmatpush3.bf16.msra.mxu0 %v1271_v17 }
  0xba   : > { %1200 = vmatprep.subr.bf16.mxu0 %v1300_v5 }
  0xbc   : > { %1191 = vmatmul.mubr.msk.bf16.vlgmr.msra.gmra.mxu0 %vm319_vm0, %v335_v16 }
  0xbd   : > { %1202 = vmatprep.mubr.msk.bf16.mxu0 %vm1301_vm1, %v1300_v5 }
 0x174   : > { %v389_v18 = vpop.f32.mrf.mxu0  ;;  %v445_v19 = vpop.f32.mrf.mxu1 }
 0x175   : > { %v508_v20 = vpack.c.bf16 %v389_v18, %v389_v18  ;;  %v509_v21 = vpack.c.bf16 %v445_v19, %v445_v19 }
 0x176   : > { %v1176_v22 = vpop.f32.mrf.mxu0  ;;  %v1184_v23 = vpop.f32.mrf.mxu1 }
 0x177   : > { %629 = vrot.lane.b32.xlu0 %v509_v21, %s1302_s25  ;;  %626 = vrot.lane.b32.xlu1 %v508_v20, %s1302_s25  ;;  %v522_v24 = vsel %vm517_vm2, %v509_v21, 0 }
 0x178   : > { %v392_v25 = vpop.f32.mrf.mxu0  ;;  %v448_v26 = vpop.f32.mrf.mxu1  ;;  %1195 = vmatpush3.bf16.xpose.msra.mxu1 %v522_v24 }
 0x179   : > { %1206 = vmatprep.subr.bf16.mxu1 %v1300_v5 }
 0x17a   : > { %v1177_v27 = vpop.f32.mrf.mxu0  ;;  %v1185_v28 = vpop.f32.mrf.mxu1 }
 0x17b   : > { %743 = vrot.lane.b32.xlu1 %v509_v21, %s1303_s26 }
 0x17c   : > { %v501_v29 = vpop.f32.mrf.mxu0 }
 0x17d   : > { %v1422_v30 = vpack.c.bf16 %v501_v29, %v501_v29 }
 0x17e   : > { %v1192_v31 = vpop.f32.mrf.mxu0 }
 0x17f   : > { %741 = vrot.lane.b32.xlu1 %v508_v20, %s1303_s26  ;;  %1197 = vmatmul.mubr.msk.bf16.vlgmr.msra.gmra.mxu1 %vm517_vm2, %v508_v20  ;;  %v583_v32 = vsel %vm581_vm3, %v1422_v30, 0 }
 0x180   : > { %v504_v33 = vpop.f32.mrf.mxu0  ;;  %1201 = vmatpush3.bf16.msra.mxu0 %v583_v32  ;;  %1208 = vmatprep.mubr.msk.bf16.mxu1 %vm1301_vm1, %v1300_v5 }
 0x181   : > { %1212 = vmatprep.subr.bf16.mxu0 %v1300_v5 }
 0x182   : > { %v1193_v34 = vpop.f32.mrf.mxu0 }
 0x183   : > { %856 = vrot.lane.b32.xlu1 %v509_v21, %s1304_s30 }
 0x187   : > { %854 = vrot.lane.b32.xlu1 %v508_v20, %s1304_s30 }
 0x1e9   : > { %v630_v35 = vpop.permute.xlu0 %629  ;;  %v627_v36 = vpop.permute.xlu1 %626 }
 0x1ea   : > { %v635_v37 = vsel %vm517_vm2, %v630_v35, 0 }
 0x1eb   : > { %1207 = vmatpush3.bf16.xpose.msra.mxu1 %v635_v37 }
 0x1ec   : > { %1218 = vmatprep.subr.bf16.mxu1 %v1300_v5 }
 0x1ed   : > { %v744_v38 = vpop.permute.xlu1 %743 }
 0x1ee   : > { %v749_v40 = vsel %vm517_vm2, %v744_v38, 0 }
 0x1f1   : > { %v742_v39 = vpop.permute.xlu1 %741 }
 0x1f2   : > { %1209 = vmatmul.mubr.msk.bf16.vlgmr.msra.gmra.mxu1 %vm517_vm2, %v627_v36 }
 0x1f3   : > { %1219 = vmatpush3.bf16.xpose.msra.mxu1 %v749_v40  ;;  %1220 = vmatprep.mubr.msk.bf16.mxu1 %vm1301_vm1, %v1300_v5 }
 0x1f4   : > { %1230 = vmatprep.subr.bf16.mxu1 %v1300_v5 }
 0x1f5   : > { %v857_v41 = vpop.permute.xlu1 %856 }
 0x1f6   : > { %v862_v42 = vsel %vm517_vm2, %v857_v41, 0 }
 0x1f9   : > { %v855_v43 = vpop.permute.xlu1 %854 }
 0x1fa   : > { %1221 = vmatmul.mubr.msk.bf16.vlgmr.msra.gmra.mxu1 %vm517_vm2, %v742_v39 }
 0x1fb   : > { %1231 = vmatpush3.bf16.xpose.msra.mxu1 %v862_v42  ;;  %1232 = vmatprep.mubr.msk.bf16.mxu1 %vm1301_vm1, %v1300_v5 }
 0x1fc   : > { %1242 = vmatprep.subr.bf16.mxu1 %v1300_v5 }
 0x202   : > { %1233 = vmatmul.mubr.msk.bf16.vlgmr.msra.gmra.mxu1 %vm517_vm2, %v855_v43 }
 0x203   : > { %1246 = vmatprep.mubr.msk.bf16.mxu1 %vm1301_vm1, %v1300_v5 }
 0x23f   : > { %v558_v45 = vpop.f32.mrf.mxu1 }
 0x240   : > { %v559_v47 = vadd.f32 %v1125_v44, %v558_v45 }
 0x241   : > { %v1198_v48 = vpop.f32.mrf.mxu1 }
 0x242   : > { %v565_v49 = vadd.f32 %v564_v46, %v559_v47 }
 0x243   : > { %v561_v50 = vpop.f32.mrf.mxu1 }
 0x244   : > { %v566_v51 = vsel %vm517_vm2, %v565_v49, -inf }
 0x245   : > { %567 = vmax.xlane.f32.xlu1 %v566_v51  ;;  %v1199_v52 = vpop.f32.mrf.mxu1 }
 0x2b2   : > { %v671_v53 = vpop.f32.mrf.mxu1 }
 0x2b3   : > { %v672_v55 = vadd.f32 %v1125_v44, %v671_v53 }
 0x2b4   : > { %v1210_v56 = vpop.f32.mrf.mxu1 }
 0x2b5   : > { %v679_v57 = vadd.f32 %v1129_v54, %v672_v55 }
 0x2b6   : > { %v674_v58 = vpop.f32.mrf.mxu1 }
 0x2b7   : > { %v680_v59 = vsel %vm517_vm2, %v679_v57, -inf }
 0x2b8   : > { %681 = vmax.xlane.f32.xlu0 %v680_v59  ;;  %v1211_v60 = vpop.f32.mrf.mxu1 }
 0x2ba   : > { %v785_v61 = vpop.f32.mrf.mxu1 }
 0x2bb   : > { %v786_v63 = vadd.f32 %v1125_v44, %v785_v61  ;;  %v1272_v61 = vld [vmem:[%s1519_s7 + $0x8] sm:$0xff]  }
 0x2bc   : > { %v1222_v1 = vpop.f32.mrf.mxu1  ;;  %1243 = vmatpush3.bf16.msra.mxu1 %v1272_v61 }
 0x2bd   : > { %v793_v2 = vadd.f32 %v1132_v62, %v786_v63  ;;  %1244 = vmatprep.subr.bf16.mxu1 %v1300_v5  ;;  %v1273_v1 = vld [vmem:[%s1519_s7] sm:$0xff]  }
 0x2be   : > { %v788_v3 = vpop.f32.mrf.mxu1 }
 0x2bf   : > { %v794_v4 = vsel %vm517_vm2, %v793_v2, -inf }
 0x2c0   : > { %795 = vmax.xlane.f32.xlu1 %v794_v4  ;;  %v1223_v6 = vpop.f32.mrf.mxu1  ;;  %1245 = vmatpush3.bf16.msra.mxu1 %v1273_v1 }
 0x2c2   : > { %v898_v7 = vpop.f32.mrf.mxu1 }
 0x2c3   : > { %v899_v9 = vadd.f32 %v1125_v44, %v898_v7 }
 0x2c4   : > { %v1234_v10 = vpop.f32.mrf.mxu1 }
 0x2c5   : > { %v906_v11 = vadd.f32 %v1135_v8, %v899_v9 }
 0x2c6   : > { %v901_v12 = vpop.f32.mrf.mxu1 }
 0x2c7   : > { %v907_v13 = vsel %vm517_vm2, %v906_v11, -inf }
 0x2c8   : > { %908 = vmax.xlane.f32.xlu0 %v907_v13  ;;  %v1235_v14 = vpop.f32.mrf.mxu1 }
 0x2ce   : > { %v568_v15 = vpop.xlane.xlu1 %567 }
 0x2cf   : > { %v569_v16 = vsub.f32 %v565_v49, %v568_v15 }
 0x2d1   : > { %v570_v17 = vmul.f32 1.442695, %v569_v16 }
 0x2d3   : > { %1276 = vpow2.f32 %v570_v17 }
 0x2e0   : > { %v1277_v18 = vpop.eup %1276 }
 0x2e1   : > { %v572_v19 = vsel %vm517_vm2, %v1277_v18, 0.0 }
 0x2e2   : > { %573 = vadd.xlane.f32.xlu1 %v572_v19 }
 0x2f3   : > { %693 = vrot.lane.b32.xlu1 %v1422_v30, %s1302_s25  ;;  %s1306_s25 = smov 16  }
 0x341   : > { %v682_v20 = vpop.xlane.xlu0 %681 }
 0x342   : > { %v683_v21 = vsub.f32 %v679_v57, %v682_v20 }
 0x344   : > { %v684_v22 = vmul.f32 1.442695, %v683_v21 }
 0x346   : > { %1278 = vpow2.f32 %v684_v22 }
 0x349   : > { %v796_v23 = vpop.xlane.xlu1 %795 }
 0x34a   : > { %v797_v24 = vsub.f32 %v793_v2, %v796_v23 }
 0x34c   : > { %v798_v25 = vmul.f32 1.442695, %v797_v24 }
 0x34e   : > { %1280 = vpow2.f32 %v798_v25 }
 0x351   : > { %v909_v26 = vpop.xlane.xlu0 %908 }
 0x352   : > { %v910_v27 = vsub.f32 %v906_v11, %v909_v26 }
 0x353   : > { %v1279_v28 = vpop.eup %1278 }
 0x354   : > { %v911_v29 = vmul.f32 1.442695, %v910_v27  ;;  %v686_v31 = vsel %vm517_vm2, %v1279_v28, 0.0 }
 0x355   : > { %687 = vadd.xlane.f32.xlu0 %v686_v31 }
 0x356   : > { %1282 = vpow2.f32 %v911_v29 }
 0x35b   : > { %v1281_v32 = vpop.eup %1280 }
 0x35c   : > { %v800_v33 = vsel %vm517_vm2, %v1281_v32, 0.0 }
 0x35d   : > { %801 = vadd.xlane.f32.xlu1 %v800_v33 }
 0x363   : > { %v1283_v34 = vpop.eup %1282 }
 0x364   : > { %v913_v35 = vsel %vm517_vm2, %v1283_v34, 0.0 }
 0x365   : > { %914 = vadd.xlane.f32.xlu0 %v913_v35 }
 0x36b   : > { %v574_v36 = vpop.xlane.xlu1 %573 }
 0x36c   : > { %1284 = vrcp.f32 %v574_v36 }
 0x36e   : > { %919 = vrot.lane.b32.xlu1 %v1422_v30, %s1304_s30 }
 0x36f   : > { %v694_v39 = vpop.permute.xlu1 %693 }
 0x370   : > { %v699_v41 = vsel %vm581_vm3, %v694_v39, 0 }
 0x379   : > { %v1285_v37 = vpop.eup %1284 }
 0x37a   : > { %v576_v38 = vmul.f32 %v1285_v37, %v1277_v18 }
 0x37b   : > { %806 = vrot.lane.b32.xlu0 %v1422_v30, %s1303_s26  ;;  %s1307_s26 = smov 24  }
 0x37c   : > { %v577_v40 = vpack.c.bf16 %v576_v38, %v576_v38 }
 0x37e   : > { %1203 = vmatmul.mubr.msk.bf16.vlgmr.msra.gmra.mxu0 %vm517_vm2, %v577_v40 }
 0x37f   : > { %1213 = vmatpush3.bf16.msra.mxu0 %v699_v41  ;;  %1214 = vmatprep.mubr.msk.bf16.mxu0 %vm1301_vm1, %v1300_v5 }
 0x380   : > { %1224 = vmatprep.subr.bf16.mxu0 %v1300_v5 }
 0x3de   : > { %v688_v42 = vpop.xlane.xlu0 %687 }
 0x3df   : > { %1286 = vrcp.f32 %v688_v42 }
 0x3e6   : > { %v802_v43 = vpop.xlane.xlu1 %801 }
 0x3e7   : > { %1288 = vrcp.f32 %v802_v43 }
 0x3ea   : > { %v920_v51 = vpop.permute.xlu1 %919 }
 0x3eb   : > { %v925_v53 = vsel %vm581_vm3, %v920_v51, 0 }
 0x3ec   : > { %v1287_v44 = vpop.eup %1286 }
 0x3ed   : > { %v690_v45 = vmul.f32 %v1287_v44, %v1279_v28 }
 0x3ee   : > { %v915_v46 = vpop.xlane.xlu0 %914 }
 0x3ef   : > { %1290 = vrcp.f32 %v915_v46  ;;  %v691_v30 = vpack.c.bf16 %v690_v45, %v690_v45 }
 0x3f1   : > { %1215 = vmatmul.mubr.msk.bf16.vlgmr.msra.gmra.mxu0 %vm517_vm2, %v691_v30 }
 0x3f2   : > { %v807_v47 = vpop.permute.xlu0 %806  ;;  %1226 = vmatprep.mubr.msk.bf16.mxu0 %vm1301_vm1, %v1300_v5 }
 0x3f3   : > { %v812_v48 = vsel %vm581_vm3, %v807_v47, 0 }
 0x3f4   : > { %v1289_v49 = vpop.eup %1288  ;;  %1225 = vmatpush3.bf16.msra.mxu0 %v812_v48 }
 0x3f5   : > { %1236 = vmatprep.subr.bf16.mxu0 %v1300_v5  ;;  %v804_v50 = vmul.f32 %v1289_v49, %v1281_v32 }
 0x3f7   : > { %v805_v52 = vpack.c.bf16 %v804_v50, %v804_v50 }
 0x3f9   : > { %1227 = vmatmul.mubr.msk.bf16.vlgmr.msra.gmra.mxu0 %vm517_vm2, %v805_v52 }
 0x3fa   : > { %1237 = vmatpush3.bf16.msra.mxu0 %v925_v53  ;;  %1238 = vmatprep.mubr.msk.bf16.mxu0 %vm1301_vm1, %v1300_v5 }
 0x3fc   : > { %v1291_v54 = vpop.eup %1290 }
 0x3fd   : > { %v917_v55 = vmul.f32 %v1291_v54, %v1283_v34 }
 0x3ff   : > { %v918_v56 = vpack.c.bf16 %v917_v55, %v917_v55 }
 0x401   : > { %1239 = vmatmul.mubr.msk.bf16.vlgmr.msra.gmra.mxu0 %vm517_vm2, %v918_v56 }
 0x43e   : > { %v619_v57 = vpop.f32.mrf.mxu0 }
 0x440   : > { %v1204_v58 = vpop.f32.mrf.mxu0 }
 0x442   : > { %v622_v59 = vpop.f32.mrf.mxu0 }
 0x444   : > { %v1205_v60 = vpop.f32.mrf.mxu0 }
 0x4b1   : > { %v735_v62 = vpop.f32.mrf.mxu0 }
 0x4b2   : > { %968 = vrot.lane.b32.xlu1 %v735_v62, %s1305_s22 }
 0x4b3   : > { %v1216_v63 = vpop.f32.mrf.mxu0 }
 0x4b5   : > { %v738_v2 = vpop.f32.mrf.mxu0 }
 0x4b7   : > { %v1217_v3 = vpop.f32.mrf.mxu0 }
 0x4b9   : > { %v848_v4 = vpop.f32.mrf.mxu0 }
 0x4ba   : > { %972 = vrot.lane.b32.xlu0 %v848_v4, %s1306_s25 }
 0x4bb   : > { %v1228_v6 = vpop.f32.mrf.mxu0 }
 0x4bd   : > { %v851_v7 = vpop.f32.mrf.mxu0 }
 0x4bf   : > { %v1229_v8 = vpop.f32.mrf.mxu0 }
 0x4c1   : > { %v961_v9 = vpop.f32.mrf.mxu0 }
 0x4c2   : > { %976 = vrot.lane.b32.xlu1 %v961_v9, %s1307_s26 }
 0x4c3   : > { %v1240_v5 = vpop.f32.mrf.mxu0 }
 0x4c5   : > { %v964_v10 = vpop.f32.mrf.mxu0 }
 0x4c7   : > { %v1241_v11 = vpop.f32.mrf.mxu0 }
 0x524   : > { %v969_v12 = vpop.permute.xlu1 %968 }
 0x525   : > { %v979_v14 = vsel %vm517_vm2, %v619_v57, %v969_v12 }
 0x52c   : > { %v973_v13 = vpop.permute.xlu0 %972 }
 0x52d   : > { %v981_v15 = vsel %vm980_vm4, %v979_v14, %v973_v13 }
 0x534   : > { %v977_v16 = vpop.permute.xlu1 %976 }
 0x535   : > { %v983_v17 = vsel %vm982_vm5, %v981_v15, %v977_v16 }
 0x536   : > { %v984_v18 = vpack.c.bf16 %v983_v17, %v983_v17 }
 0x538   : > { %1247 = vmatmul.mubr.msk.bf16.vlgmr.msra.gmra.mxu1 %vm319_vm0, %v984_v18 }
 0x5f8   : > { %v1038_v19 = vpop.f32.mrf.mxu1 }
 0x5f9   : > { %v1044_v20 = vadd.f32 %v1038_v19, %v1369_v0 }
 0x5fa   : > { %v1248_v21 = vpop.f32.mrf.mxu1 }
 0x5fb   : > { %1045 = vst.msk [vmem:[%s314_s10] sm:$0xff] %vm319_vm0, %v1044_v20 }
 0x5fc   : > { %v1041_v22 = vpop.f32.mrf.mxu1 }
 0x5fe   : > { %v1249_v23 = vpop.f32.mrf.mxu1 }
 0x5ff PF: > { %s18_s27 = sadd.s32 1, %s1298_s27  }
 0x600   : > { %p15_p4 = scmp.ge.s32.totalorder %s18_s27, 4  }
 0x602   :  { %17 = sbr.rel (!%p15_p4) target bundleno = 1 (0x1), region = 88 }

// kernel: knowledge_generator_forward.17
= control target key start
LH: loop header
LB: loop body
LE: loop exit
PB: predicated region body
PF: predicated region fallthrough
CT: control target
= control target key end

     0   :  { %s1365_s27 = smov 0   ;;  %s1524_s0 = inlined_call_operand.vmem [shape: f32[2,8,32], index: 0, kind: input, shape index: {}]   ;;  %s1525_s1 = inlined_call_operand.vmem [shape: f32[2,1,8], index: 1, kind: input, shape index: {}]   ;;  %s1526_s2 = inlined_call_operand.vmem [shape: f32[1,4,8,8], index: 2, kind: input, shape index: {}]   ;;  %s1527_s3 = inlined_call_operand.vmem [shape: f32[1,32], index: 3, kind: input, shape index: {}]   ;;  %s1528_s4 = inlined_call_operand.vmem [shape: bf16[32,32], index: 4, kind: input, shape index: {}]   ;;  %s1529_s5 = inlined_call_operand.vmem [shape: bf16[32,32], index: 5, kind: input, shape index: {}]   ;;  %s1530_s6 = inlined_call_operand.vmem [shape: bf16[32,32], index: 6, kind: input, shape index: {}]   ;;  %s1531_s7 = inlined_call_operand.vmem [shape: bf16[32,32], index: 7, kind: input, shape index: {}]   ;;  %s1532_s8 = inlined_call_operand.vmem [shape: f32[2,8,32], index: 8, kind: output, shape index: {}]  }
   0x1 LB: > { %s1118_s28 = sadd.s32 4294967295, %s1309_s27   ;;  %p1122_p0 = scmp.ge.s32.totalorder %s1309_s27, 1  ;;  %s1309_s27 = sphi %s1365_s27, %s18_s27  }
   0x2   : > { %p269_p1 = scmp.lt.s32.totalorder %s1309_s27, 3 }
   0x4   : > { %p270_p2 = pnand %p1122_p0, %p269_p1 }
   0x5   : > { %p304_p3 = scmp.lt.s32.totalorder (!%p270_p2), %s1118_s28, 1  ;;  %s1313_s25 = smov (!%p270_p2), 120  }
   0x6   : > { %273 = sbr.rel (%p270_p2) target bundleno = 1537 (0x601), region = 52  ;;  %s1314_s26 = smov (!%p270_p2), 112  }
   0x7   : > { %s1315_s30 = smov (!%p270_p2), 104   ;;  %s1317_s22 = smov (!%p270_p2), 8  }
   0xb   : > { %s1534_s28 = smov (!%p304_p3, %s1118_s28), 1  ;;  %vm319_vm0 = vcmask 261120   ;;  %v1277_v3 = vld [vmem:[%s1528_s4 + $0x8] sm:$0xff]   ;;  %v1311_v5 = vmov 0.0   ;;  %v1279_v6 = vld [vmem:[%s1528_s4] sm:$0xff]   ;;  %vm1312_vm1 = vmmov 0   ;;  %v508_v44 = vlaneseq }
   0xc   : > { %s1123_s29 = sshll.u32 %s1534_s28, 3  ;;  %v1278_v4 = vld [vmem:[%s1529_s5 + $0x8] sm:$0xff]   ;;  %1180 = vmatprep.subr.bf16.mxu0 %v1311_v5  ;;  %1188 = vmatprep.subr.bf16.mxu1 %v1311_v5  ;;  %v1280_v7 = vld [vmem:[%s1529_s5] sm:$0xff]   ;;  %vm523_vm2 = vcmask 64512   ;;  %vm588_vm3 = vcmask 1043456   ;;  %s310_s11 = scalar_lea.vmem %s1525_s1, %s1534_s28  ;;  %vm990_vm5 = vcmask 130048  }
   0xd   : > { %s307_s10 = scalar_lea.vmem %s1524_s0, %s1123_s29  ;;  %1181 = vmatpush3.bf16.msra.mxu0 %v1277_v3  ;;  %1189 = vmatpush3.bf16.msra.mxu1 %v1278_v4  ;;  %v1125_v12 = vld [vmem:[%s1527_s3] ss:$0 sm:$0xff]  ;;  %v1281_v15 = vld [vmem:[%s1530_s6 + $0x8] sm:$0xff]   ;;  %v509_v45 = vshrl.u32 %v508_v44, 7  ;;  %v511_v46 = vand.u32 127, %v508_v44  ;;  %vm992_vm6 = vcmask 195584  }
   0xe   : > { %v1381_v0 = vld [vmem:[%s307_s10] sm:$0xff]  ;;  %1182 = vmatprep.subr.bf16.mxu0 %v1311_v5  ;;  %1190 = vmatprep.subr.bf16.mxu1 %v1311_v5  ;;  %v1316_v52 = vmov -1e+09   ;;  %v1139_v60 = vld [vmem:[%s1526_s2 + $0x8] sm:$0xff]  ;;  %s314_s10 = scalar_lea.vmem %s1532_s8, %s1123_s29 }
   0xf   : > { %v318_v1 = vmul.f32 %v1381_v0, %v1381_v0  ;;  %1184 = vmatprep.mubr.msk.bf16.mxu0 %vm1312_vm1, %v1311_v5  ;;  %1192 = vmatprep.mubr.msk.bf16.mxu1 %vm1312_vm1, %v1311_v5  ;;  %v1282_v17 = vld [vmem:[%s1530_s6] sm:$0xff]   ;;  %vm512_vm4 = vcmp.le.s32.totalorder %v511_v46, %v509_v45 }
  0x10   : > { %v1135_v47 = vld [vmem:[%s310_s11] ss:$0 sm:$0xff]  ;;  %v513_v53 = vsel %vm512_vm4, 0.0, %v1316_v52 }
  0x11   : > { %v320_v2 = vsel %vm319_vm0, %v318_v1, 0.0  ;;  %1183 = vmatpush3.bf16.msra.mxu0 %v1279_v6  ;;  %1191 = vmatpush3.bf16.msra.mxu1 %v1280_v7  ;;  %v570_v49 = vld [vmem:[%s1526_s2] sm:$0xff]  ;;  %v1142_v7 = vld [vmem:[%s1526_s2 + $0x10] sm:$0xff] }
  0x12   : > { %321 = vadd.xlane.f32.xlu0 %v320_v2  ;;  %1196 = vmatprep.subr.bf16.mxu0 %v1311_v5 }
  0x13   : > { %1204 = vmatprep.subr.bf16.mxu1 %v1311_v5 }
  0x9b   : > { %v322_v8 = vpop.xlane.xlu0 %321 }
  0x9c   : > { %v324_v9 = vmul.f32 0.03125, %v322_v8 }
  0x9e   : > { %v325_v10 = vadd.f32 1e-06, %v324_v9 }
  0xa0   : > { %1285 = vrsqrt.f32 %v325_v10 }
  0xad   : > { %v1286_v11 = vpop.eup %1285 }
  0xae   : > { %v327_v13 = vmul.f32 %v1286_v11, %v1381_v0 }
  0xb0   : > { %v334_v14 = vmul.f32 %v1125_v12, %v327_v13 }
  0xb2   : > { %v335_v16 = vpack.c.bf16 %v334_v14, %v334_v14 }
  0xb4   : > { %1185 = vmatmul.mubr.msk.bf16.vlgmr.msra.gmra.mxu0 %vm319_vm0, %v335_v16  ;;  %1193 = vmatmul.mubr.msk.bf16.vlgmr.msra.gmra.mxu1 %vm319_vm0, %v335_v16 }
  0xb5   : > { %1197 = vmatpush3.bf16.msra.mxu0 %v1281_v15  ;;  %1200 = vmatprep.mubr.msk.bf16.mxu0 %vm1312_vm1, %v1311_v5 }
  0xb6   : > { %1198 = vmatprep.subr.bf16.mxu0 %v1311_v5  ;;  %1206 = vmatprep.mubr.msk.bf16.mxu1 %vm1312_vm1, %v1311_v5 }
  0xb9   : > { %1199 = vmatpush3.bf16.msra.mxu0 %v1282_v17 }
  0xba   : > { %1210 = vmatprep.subr.bf16.mxu0 %v1311_v5 }
  0xbc   : > { %1201 = vmatmul.mubr.msk.bf16.vlgmr.msra.gmra.mxu0 %vm319_vm0, %v335_v16  ;;  %v1145_v16 = vld [vmem:[%s1526_s2 + $0x18] sm:$0xff] }
  0xbd   : > { %1212 = vmatprep.mubr.msk.bf16.mxu0 %vm1312_vm1, %v1311_v5 }
 0x174   : > { %v389_v18 = vpop.f32.mrf.mxu0  ;;  %v445_v19 = vpop.f32.mrf.mxu1 }
 0x175   : > { %v514_v20 = vpack.c.bf16 %v389_v18, %v389_v18  ;;  %v515_v21 = vpack.c.bf16 %v445_v19, %v445_v19 }
 0x176   : > { %v1186_v22 = vpop.f32.mrf.mxu0  ;;  %v1194_v23 = vpop.f32.mrf.mxu1 }
 0x177   : > { %636 = vrot.lane.b32.xlu0 %v515_v21, %s1313_s25  ;;  %633 = vrot.lane.b32.xlu1 %v514_v20, %s1313_s25  ;;  %v528_v24 = vsel %vm523_vm2, %v515_v21, 0 }
 0x178   : > { %v392_v25 = vpop.f32.mrf.mxu0  ;;  %v448_v26 = vpop.f32.mrf.mxu1  ;;  %1205 = vmatpush3.bf16.xpose.msra.mxu1 %v528_v24 }
 0x179   : > { %1216 = vmatprep.subr.bf16.mxu1 %v1311_v5 }
 0x17a   : > { %v1187_v27 = vpop.f32.mrf.mxu0  ;;  %v1195_v28 = vpop.f32.mrf.mxu1 }
 0x17b   : > { %751 = vrot.lane.b32.xlu1 %v515_v21, %s1314_s26 }
 0x17c   : > { %v501_v29 = vpop.f32.mrf.mxu0 }
 0x17d   : > { %v1434_v30 = vpack.c.bf16 %v501_v29, %v501_v29 }
 0x17e   : > { %v1202_v31 = vpop.f32.mrf.mxu0 }
 0x17f   : > { %749 = vrot.lane.b32.xlu1 %v514_v20, %s1314_s26  ;;  %1207 = vmatmul.mubr.msk.bf16.vlgmr.msra.gmra.mxu1 %vm523_vm2, %v514_v20  ;;  %v590_v32 = vsel %vm588_vm3, %v1434_v30, 0 }
 0x180   : > { %v504_v33 = vpop.f32.mrf.mxu0  ;;  %1211 = vmatpush3.bf16.msra.mxu0 %v590_v32  ;;  %1218 = vmatprep.mubr.msk.bf16.mxu1 %vm1312_vm1, %v1311_v5 }
 0x181   : > { %1222 = vmatprep.subr.bf16.mxu0 %v1311_v5 }
 0x182   : > { %v1203_v34 = vpop.f32.mrf.mxu0 }
 0x183   : > { %865 = vrot.lane.b32.xlu1 %v515_v21, %s1315_s30 }
 0x187   : > { %863 = vrot.lane.b32.xlu1 %v514_v20, %s1315_s30 }
 0x1e9   : > { %v637_v35 = vpop.permute.xlu0 %636  ;;  %v634_v36 = vpop.permute.xlu1 %633 }
 0x1ea   : > { %v642_v37 = vsel %vm523_vm2, %v637_v35, 0 }
 0x1eb   : > { %1217 = vmatpush3.bf16.xpose.msra.mxu1 %v642_v37 }
 0x1ec   : > { %1228 = vmatprep.subr.bf16.mxu1 %v1311_v5 }
 0x1ed   : > { %v752_v38 = vpop.permute.xlu1 %751 }
 0x1ee   : > { %v757_v40 = vsel %vm523_vm2, %v752_v38, 0 }
 0x1f1   : > { %v750_v39 = vpop.permute.xlu1 %749 }
 0x1f2   : > { %1219 = vmatmul.mubr.msk.bf16.vlgmr.msra.gmra.mxu1 %vm523_vm2, %v634_v36 }
 0x1f3   : > { %1229 = vmatpush3.bf16.xpose.msra.mxu1 %v757_v40  ;;  %1230 = vmatprep.mubr.msk.bf16.mxu1 %vm1312_vm1, %v1311_v5 }
 0x1f4   : > { %1240 = vmatprep.subr.bf16.mxu1 %v1311_v5 }
 0x1f5   : > { %v866_v41 = vpop.permute.xlu1 %865 }
 0x1f6   : > { %v871_v42 = vsel %vm523_vm2, %v866_v41, 0 }
 0x1f9   : > { %v864_v43 = vpop.permute.xlu1 %863 }
 0x1fa   : > { %1231 = vmatmul.mubr.msk.bf16.vlgmr.msra.gmra.mxu1 %vm523_vm2, %v750_v39 }
 0x1fb   : > { %1241 = vmatpush3.bf16.xpose.msra.mxu1 %v871_v42  ;;  %1242 = vmatprep.mubr.msk.bf16.mxu1 %vm1312_vm1, %v1311_v5 }
 0x1fc   : > { %1252 = vmatprep.subr.bf16.mxu1 %v1311_v5 }
 0x202   : > { %1243 = vmatmul.mubr.msk.bf16.vlgmr.msra.gmra.mxu1 %vm523_vm2, %v864_v43 }
 0x203   : > { %1256 = vmatprep.mubr.msk.bf16.mxu1 %vm1312_vm1, %v1311_v5 }
 0x23f   : > { %v564_v48 = vpop.f32.mrf.mxu1 }
 0x240   : > { %v565_v50 = vadd.f32 %v1135_v47, %v564_v48 }
 0x241   : > { %v1208_v51 = vpop.f32.mrf.mxu1 }
 0x242   : > { %v571_v54 = vadd.f32 %v570_v49, %v565_v50 }
 0x243   : > { %v567_v55 = vpop.f32.mrf.mxu1 }
 0x244   : > { %v572_v56 = vadd.f32 %v571_v54, %v513_v53 }
 0x245   : > { %v1209_v57 = vpop.f32.mrf.mxu1 }
 0x246   : > { %v573_v58 = vsel %vm523_vm2, %v572_v56, -inf }
 0x247   : > { %574 = vmax.xlane.f32.xlu1 %v573_v58 }
 0x2b2   : > { %v678_v59 = vpop.f32.mrf.mxu1 }
 0x2b3   : > { %v679_v61 = vadd.f32 %v1135_v47, %v678_v59 }
 0x2b4   : > { %v1220_v62 = vpop.f32.mrf.mxu1 }
 0x2b5   : > { %v686_v63 = vadd.f32 %v1139_v60, %v679_v61 }
 0x2b6   : > { %v681_v1 = vpop.f32.mrf.mxu1 }
 0x2b7   : > { %v687_v2 = vadd.f32 %v686_v63, %v513_v53 }
 0x2b8   : > { %v1221_v3 = vpop.f32.mrf.mxu1 }
 0x2b9   : > { %v688_v4 = vsel %vm523_vm2, %v687_v2, -inf }
 0x2ba   : > { %689 = vmax.xlane.f32.xlu0 %v688_v4  ;;  %v793_v6 = vpop.f32.mrf.mxu1 }
 0x2bb   : > { %v794_v8 = vadd.f32 %v1135_v47, %v793_v6 }
 0x2bc   : > { %v1232_v9 = vpop.f32.mrf.mxu1 }
 0x2bd   : > { %v801_v10 = vadd.f32 %v1142_v7, %v794_v8  ;;  %v1283_v8 = vld [vmem:[%s1531_s7 + $0x8] sm:$0xff]  }
 0x2be   : > { %v796_v11 = vpop.f32.mrf.mxu1  ;;  %1253 = vmatpush3.bf16.msra.mxu1 %v1283_v8 }
 0x2bf   : > { %v802_v12 = vadd.f32 %v801_v10, %v513_v53  ;;  %1254 = vmatprep.subr.bf16.mxu1 %v1311_v5  ;;  %v1284_v11 = vld [vmem:[%s1531_s7] sm:$0xff]  }
 0x2c0   : > { %v1233_v13 = vpop.f32.mrf.mxu1 }
 0x2c1   : > { %v803_v14 = vsel %vm523_vm2, %v802_v12, -inf }
 0x2c2   : > { %804 = vmax.xlane.f32.xlu1 %v803_v14  ;;  %v907_v15 = vpop.f32.mrf.mxu1  ;;  %1255 = vmatpush3.bf16.msra.mxu1 %v1284_v11 }
 0x2c3   : > { %v908_v17 = vadd.f32 %v1135_v47, %v907_v15 }
 0x2c4   : > { %v1244_v18 = vpop.f32.mrf.mxu1 }
 0x2c5   : > { %v915_v19 = vadd.f32 %v1145_v16, %v908_v17 }
 0x2c6   : > { %v910_v20 = vpop.f32.mrf.mxu1 }
 0x2c7   : > { %v916_v21 = vadd.f32 %v915_v19, %v513_v53 }
 0x2c8   : > { %v1245_v22 = vpop.f32.mrf.mxu1 }
 0x2c9   : > { %v917_v23 = vsel %vm523_vm2, %v916_v21, -inf }
 0x2ca   : > { %918 = vmax.xlane.f32.xlu0 %v917_v23 }
 0x2d0   : > { %v575_v24 = vpop.xlane.xlu1 %574 }
 0x2d1   : > { %v576_v25 = vsub.f32 %v572_v56, %v575_v24 }
 0x2d3   : > { %v577_v26 = vmul.f32 1.442695, %v576_v25 }
 0x2d5   : > { %1287 = vpow2.f32 %v577_v26 }
 0x2e2   : > { %v1288_v27 = vpop.eup %1287 }
 0x2e3   : > { %v579_v28 = vsel %vm523_vm2, %v1288_v27, 0.0 }
 0x2e4   : > { %580 = vadd.xlane.f32.xlu1 %v579_v28 }
 0x2f5   : > { %701 = vrot.lane.b32.xlu1 %v1434_v30, %s1313_s25  ;;  %s1318_s25 = smov 16  }
 0x343   : > { %v690_v29 = vpop.xlane.xlu0 %689 }
 0x344   : > { %v691_v31 = vsub.f32 %v687_v2, %v690_v29 }
 0x346   : > { %v692_v32 = vmul.f32 1.442695, %v691_v31 }
 0x348   : > { %1289 = vpow2.f32 %v692_v32 }
 0x34b   : > { %v805_v33 = vpop.xlane.xlu1 %804 }
 0x34c   : > { %v806_v34 = vsub.f32 %v802_v12, %v805_v33 }
 0x34e   : > { %v807_v35 = vmul.f32 1.442695, %v806_v34 }
 0x350   : > { %1291 = vpow2.f32 %v807_v35 }
 0x353   : > { %v919_v36 = vpop.xlane.xlu0 %918 }
 0x354   : > { %v920_v37 = vsub.f32 %v916_v21, %v919_v36 }
 0x355   : > { %v1290_v38 = vpop.eup %1289 }
 0x356   : > { %v921_v39 = vmul.f32 1.442695, %v920_v37  ;;  %v694_v40 = vsel %vm523_vm2, %v1290_v38, 0.0 }
 0x357   : > { %695 = vadd.xlane.f32.xlu0 %v694_v40 }
 0x358   : > { %1293 = vpow2.f32 %v921_v39 }
 0x35d   : > { %v1292_v41 = vpop.eup %1291 }
 0x35e   : > { %v809_v42 = vsel %vm523_vm2, %v1292_v41, 0.0 }
 0x35f   : > { %810 = vadd.xlane.f32.xlu1 %v809_v42 }
 0x365   : > { %v1294_v43 = vpop.eup %1293 }
 0x366   : > { %v923_v44 = vsel %vm523_vm2, %v1294_v43, 0.0 }
 0x367   : > { %924 = vadd.xlane.f32.xlu0 %v923_v44 }
 0x36d   : > { %v581_v45 = vpop.xlane.xlu1 %580 }
 0x36e   : > { %1295 = vrcp.f32 %v581_v45 }
 0x370   : > { %929 = vrot.lane.b32.xlu1 %v1434_v30, %s1315_s30 }
 0x371   : > { %v702_v48 = vpop.permute.xlu1 %701 }
 0x372   : > { %v707_v50 = vsel %vm588_vm3, %v702_v48, 0 }
 0x37b   : > { %v1296_v46 = vpop.eup %1295 }
 0x37c   : > { %v583_v47 = vmul.f32 %v1296_v46, %v1288_v27 }
 0x37d   : > { %815 = vrot.lane.b32.xlu0 %v1434_v30, %s1314_s26  ;;  %s1319_s26 = smov 24  }
 0x37e   : > { %v584_v49 = vpack.c.bf16 %v583_v47, %v583_v47 }
 0x380   : > { %1213 = vmatmul.mubr.msk.bf16.vlgmr.msra.gmra.mxu0 %vm523_vm2, %v584_v49 }
 0x381   : > { %1223 = vmatpush3.bf16.msra.mxu0 %v707_v50  ;;  %1224 = vmatprep.mubr.msk.bf16.mxu0 %vm1312_vm1, %v1311_v5 }
 0x382   : > { %1234 = vmatprep.subr.bf16.mxu0 %v1311_v5 }
 0x3e0   : > { %v696_v51 = vpop.xlane.xlu0 %695 }
 0x3e1   : > { %1297 = vrcp.f32 %v696_v51 }
 0x3e8   : > { %v811_v52 = vpop.xlane.xlu1 %810 }
 0x3e9   : > { %1299 = vrcp.f32 %v811_v52 }
 0x3ec   : > { %v930_v60 = vpop.permute.xlu1 %929 }
 0x3ed   : > { %v935_v62 = vsel %vm588_vm3, %v930_v60, 0 }
 0x3ee   : > { %v1298_v53 = vpop.eup %1297 }
 0x3ef   : > { %v698_v54 = vmul.f32 %v1298_v53, %v1290_v38 }
 0x3f0   : > { %v925_v55 = vpop.xlane.xlu0 %924 }
 0x3f1   : > { %1301 = vrcp.f32 %v925_v55  ;;  %v699_v30 = vpack.c.bf16 %v698_v54, %v698_v54 }
 0x3f3   : > { %1225 = vmatmul.mubr.msk.bf16.vlgmr.msra.gmra.mxu0 %vm523_vm2, %v699_v30 }
 0x3f4   : > { %v816_v56 = vpop.permute.xlu0 %815  ;;  %1236 = vmatprep.mubr.msk.bf16.mxu0 %vm1312_vm1, %v1311_v5 }
 0x3f5   : > { %v821_v57 = vsel %vm588_vm3, %v816_v56, 0 }
 0x3f6   : > { %v1300_v58 = vpop.eup %1299  ;;  %1235 = vmatpush3.bf16.msra.mxu0 %v821_v57 }
 0x3f7   : > { %1246 = vmatprep.subr.bf16.mxu0 %v1311_v5  ;;  %v813_v59 = vmul.f32 %v1300_v58, %v1292_v41 }
 0x3f9   : > { %v814_v61 = vpack.c.bf16 %v813_v59, %v813_v59 }
 0x3fb   : > { %1237 = vmatmul.mubr.msk.bf16.vlgmr.msra.gmra.mxu0 %vm523_vm2, %v814_v61 }
 0x3fc   : > { %1247 = vmatpush3.bf16.msra.mxu0 %v935_v62  ;;  %1248 = vmatprep.mubr.msk.bf16.mxu0 %vm1312_vm1, %v1311_v5 }
 0x3fe   : > { %v1302_v63 = vpop.eup %1301 }
 0x3ff   : > { %v927_v1 = vmul.f32 %v1302_v63, %v1294_v43 }
 0x401   : > { %v928_v2 = vpack.c.bf16 %v927_v1, %v927_v1 }
 0x403   : > { %1249 = vmatmul.mubr.msk.bf16.vlgmr.msra.gmra.mxu0 %vm523_vm2, %v928_v2 }
 0x440   : > { %v626_v3 = vpop.f32.mrf.mxu0 }
 0x442   : > { %v1214_v4 = vpop.f32.mrf.mxu0 }
 0x444   : > { %v629_v6 = vpop.f32.mrf.mxu0 }
 0x446   : > { %v1215_v7 = vpop.f32.mrf.mxu0 }
 0x4b3   : > { %v743_v9 = vpop.f32.mrf.mxu0 }
 0x4b4   : > { %978 = vrot.lane.b32.xlu1 %v743_v9, %s1317_s22 }
 0x4b5   : > { %v1226_v10 = vpop.f32.mrf.mxu0 }
 0x4b7   : > { %v746_v12 = vpop.f32.mrf.mxu0 }
 0x4b9   : > { %v1227_v13 = vpop.f32.mrf.mxu0 }
 0x4bb   : > { %v857_v14 = vpop.f32.mrf.mxu0 }
 0x4bc   : > { %982 = vrot.lane.b32.xlu0 %v857_v14, %s1318_s25 }
 0x4bd   : > { %v1238_v15 = vpop.f32.mrf.mxu0 }
 0x4bf   : > { %v860_v16 = vpop.f32.mrf.mxu0 }
 0x4c1   : > { %v1239_v17 = vpop.f32.mrf.mxu0 }
 0x4c3   : > { %v971_v18 = vpop.f32.mrf.mxu0 }
 0x4c4   : > { %986 = vrot.lane.b32.xlu1 %v971_v18, %s1319_s26 }
 0x4c5   : > { %v1250_v5 = vpop.f32.mrf.mxu0 }
 0x4c7   : > { %v974_v19 = vpop.f32.mrf.mxu0 }
 0x4c9   : > { %v1251_v20 = vpop.f32.mrf.mxu0 }
 0x526   : > { %v979_v21 = vpop.permute.xlu1 %978 }
 0x527   : > { %v989_v23 = vsel %vm523_vm2, %v626_v3, %v979_v21 }
 0x52e   : > { %v983_v22 = vpop.permute.xlu0 %982 }
 0x52f   : > { %v991_v24 = vsel %vm990_vm5, %v989_v23, %v983_v22 }
 0x536   : > { %v987_v25 = vpop.permute.xlu1 %986 }
 0x537   : > { %v993_v26 = vsel %vm992_vm6, %v991_v24, %v987_v25 }
 0x538   : > { %v994_v27 = vpack.c.bf16 %v993_v26, %v993_v26 }
 0x53a   : > { %1257 = vmatmul.mubr.msk.bf16.vlgmr.msra.gmra.mxu1 %vm319_vm0, %v994_v27 }
 0x5fa   : > { %v1048_v28 = vpop.f32.mrf.mxu1 }
 0x5fb   : > { %v1054_v29 = vadd.f32 %v1048_v28, %v1381_v0 }
 0x5fc   : > { %v1258_v31 = vpop.f32.mrf.mxu1 }
 0x5fd   : > { %1055 = vst.msk [vmem:[%s314_s10] sm:$0xff] %vm319_vm0, %v1054_v29 }
 0x5fe   : > { %v1051_v32 = vpop.f32.mrf.mxu1 }
 0x600   : > { %v1259_v33 = vpop.f32.mrf.mxu1 }
 0x601 PF: > { %s18_s27 = sadd.s32 1, %s1309_s27  }
 0x602   : > { %p15_p4 = scmp.ge.s32.totalorder %s18_s27, 4  }
 0x604   :  { %17 = sbr.rel (!%p15_p4) target bundleno = 1 (0x1), region = 88 }

// kernel: knowledge_generator_forward.23
= control target key start
LH: loop header
LB: loop body
LE: loop exit
PB: predicated region body
PF: predicated region fallthrough
CT: control target
= control target key end

     0   :  { %vm20_vm0 = vcmask 261120   ;;  %v230_v2 = vmov 0.0   ;;  %vm231_vm1 = vmmov 0   ;;  %s302_s0 = inlined_call_operand.vmem [shape: f32[16,32], index: 0, kind: input, shape index: {}]   ;;  %s303_s2 = inlined_call_operand.vmem [shape: bf16[128,32], index: 2, kind: input, shape index: {}]   ;;  %s304_s1 = inlined_call_operand.vmem [shape: f32[1,32], index: 1, kind: input, shape index: {}]   ;;  %s305_s3 = inlined_call_operand.vmem [shape: f32[16,128], index: 3, kind: output, shape index: {}]  }
   0x1   :  { %v15_v0 = vld [vmem:[%s302_s0] sm:$0xff]  ;;  %v16_v1 = vld [vmem:[%s302_s0 + $0x8] sm:$0xff]  ;;  %196 = vmatprep.subr.bf16.mxu0 %v230_v2  ;;  %v218_v5 = vld [vmem:[%s303_s2 + $0x38] sm:$0xff]   ;;  %212 = vmatprep.mubr.msk.bf16.mxu0 %vm231_vm1, %v230_v2 }
   0x2   :  { %v18_v3 = vmul.f32 %v15_v0, %v15_v0  ;;  %v19_v4 = vmul.f32 %v16_v1, %v16_v1  ;;  %v128_v7 = vsel %vm20_vm0, %v218_v5, 0  ;;  %v219_v9 = vld [vmem:[%s303_s2 + $0x30] sm:$0xff]   ;;  %v220_v11 = vld [vmem:[%s303_s2 + $0x28] sm:$0xff]   ;;  %v221_v13 = vld [vmem:[%s303_s2 + $0x20] sm:$0xff]  }
   0x3   :  { %197 = vmatpush3.bf16.xpose.msra.mxu0 %v128_v7  ;;  %v125_v10 = vsel %vm20_vm0, %v219_v9, 0  ;;  %v122_v12 = vsel %vm20_vm0, %v220_v11, 0  ;;  %v119_v14 = vsel %vm20_vm0, %v221_v13, 0  ;;  %v222_v15 = vld [vmem:[%s303_s2 + $0x18] sm:$0xff]   ;;  %v223_v17 = vld [vmem:[%s303_s2 + $0x10] sm:$0xff]   ;;  %v224_v19 = vld [vmem:[%s303_s2 + $0x8] sm:$0xff]  }
   0x4   :  { %v21_v6 = vsel %vm20_vm0, %v18_v3, 0.0  ;;  %v24_v8 = vsel %vm20_vm0, %v19_v4, 0.0  ;;  %198 = vmatprep.subr.bf16.mxu0 %v230_v2  ;;  %v116_v16 = vsel %vm20_vm0, %v222_v15, 0  ;;  %v113_v18 = vsel %vm20_vm0, %v223_v17, 0  ;;  %v225_v21 = vld [vmem:[%s303_s2] sm:$0xff]  }
   0x5   :  { %22 = vadd.xlane.f32.xlu0 %v21_v6  ;;  %v110_v20 = vsel %vm20_vm0, %v224_v19, 0  ;;  %v107_v22 = vsel %vm20_vm0, %v225_v21, 0  ;;  %v177_v31 = vld [vmem:[%s304_s1] ss:$0 sm:$0xff] }
   0x9   :  { %25 = vadd.xlane.f32.xlu0 %v24_v8 }
   0xb   :  { %199 = vmatpush3.bf16.xpose.msra.mxu0 %v125_v10 }
   0xc   :  { %200 = vmatprep.subr.bf16.mxu0 %v230_v2 }
  0x13   :  { %201 = vmatpush3.bf16.xpose.msra.mxu0 %v122_v12 }
  0x14   :  { %202 = vmatprep.subr.bf16.mxu0 %v230_v2 }
  0x1b   :  { %203 = vmatpush3.bf16.xpose.msra.mxu0 %v119_v14 }
  0x1c   :  { %204 = vmatprep.subr.bf16.mxu0 %v230_v2 }
  0x23   :  { %205 = vmatpush3.bf16.xpose.msra.mxu0 %v116_v16 }
  0x24   :  { %206 = vmatprep.subr.bf16.mxu0 %v230_v2 }
  0x2b   :  { %207 = vmatpush3.bf16.xpose.msra.mxu0 %v113_v18 }
  0x2c   :  { %208 = vmatprep.subr.bf16.mxu0 %v230_v2 }
  0x33   :  { %209 = vmatpush3.bf16.xpose.msra.mxu0 %v110_v20 }
  0x34   :  { %210 = vmatprep.subr.bf16.mxu0 %v230_v2 }
  0x3b   :  { %211 = vmatpush3.bf16.xpose.msra.mxu0 %v107_v22 }
  0x8e   :  { %v23_v23 = vpop.xlane.xlu0 %22 }
  0x8f   :  { %v28_v24 = vmul.f32 0.03125, %v23_v23 }
  0x91   :  { %v30_v25 = vadd.f32 1e-06, %v28_v24 }
  0x92   :  { %v26_v26 = vpop.xlane.xlu0 %25 }
  0x93   :  { %226 = vrsqrt.f32 %v30_v25  ;;  %v29_v27 = vmul.f32 0.03125, %v26_v26 }
  0x95   :  { %v31_v28 = vadd.f32 1e-06, %v29_v27 }
  0x97   :  { %228 = vrsqrt.f32 %v31_v28 }
  0xa0   :  { %v227_v29 = vpop.eup %226 }
  0xa1   :  { %v34_v30 = vmul.f32 %v227_v29, %v15_v0 }
  0xa3   :  { %v42_v34 = vmul.f32 %v177_v31, %v34_v30 }
  0xa4   :  { %v229_v32 = vpop.eup %228 }
  0xa5   :  { %v35_v33 = vmul.f32 %v229_v32, %v16_v1  ;;  %v44_v36 = vmul.f32 0.17677669, %v42_v34 }
  0xa7   :  { %v43_v35 = vmul.f32 %v177_v31, %v35_v33 }
  0xa9   :  { %v45_v37 = vmul.f32 0.17677669, %v43_v35 }
  0xab   :  { %v46_v38 = vpack.c.bf16 %v45_v37, %v44_v36 }
  0xad   :  { %213 = vmatmul.mubr.msk.bf16.vlgmr.msra.gmra.mxu0 %vm20_vm0, %v46_v38 }
 0x16d   :  { %v164_v39 = vpop.f32.mrf.mxu0 }
 0x16e   :  { %171 = vst [vmem:[%s305_s3] sm:$0xff] %v164_v39 }
 0x16f   :  { %v214_v40 = vpop.f32.mrf.mxu0 }
 0x171   :  { %v167_v41 = vpop.f32.mrf.mxu0 }
 0x172   :  { %172 = vst [vmem:[%s305_s3 + $0x8] sm:$0xff] %v167_v41 }
 0x173   :  { %v215_v42 = vpop.f32.mrf.mxu0 }

// kernel: knowledge_generator_forward.18
= control target key start
LH: loop header
LB: loop body
LE: loop exit
PB: predicated region body
PF: predicated region fallthrough
CT: control target
= control target key end

     0   :  { %s1374_s27 = smov 0   ;;  %s1525_s0 = inlined_call_operand.vmem [shape: f32[2,8,32], index: 0, kind: input, shape index: {}]   ;;  %s1526_s1 = inlined_call_operand.vmem [shape: f32[2,8,32], index: 1, kind: input, shape index: {}]   ;;  %s1527_s2 = inlined_call_operand.vmem [shape: f32[2,1,8], index: 2, kind: input, shape index: {}]   ;;  %s1528_s3 = inlined_call_operand.vmem [shape: f32[1,32], index: 3, kind: input, shape index: {}]   ;;  %s1529_s4 = inlined_call_operand.vmem [shape: bf16[32,32], index: 4, kind: input, shape index: {}]   ;;  %s1530_s5 = inlined_call_operand.vmem [shape: bf16[32,32], index: 5, kind: input, shape index: {}]   ;;  %s1531_s6 = inlined_call_operand.vmem [shape: bf16[32,32], index: 6, kind: input, shape index: {}]   ;;  %s1532_s7 = inlined_call_operand.vmem [shape: bf16[32,32], index: 7, kind: input, shape index: {}]   ;;  %s1533_s8 = inlined_call_operand.vmem [shape: f32[2,8,32], index: 8, kind: output, shape index: {}]  }
   0x1 LB: > { %s1131_s28 = sadd.s32 4294967295, %s1319_s27   ;;  %p1135_p0 = scmp.ge.s32.totalorder %s1319_s27, 1  ;;  %s1319_s27 = sphi %s1374_s27, %s18_s27  }
   0x2   : > { %p278_p1 = scmp.lt.s32.totalorder %s1319_s27, 3 }
   0x4   : > { %p279_p2 = pnand %p1135_p0, %p278_p1 }
   0x5   : > { %p317_p3 = scmp.lt.s32.totalorder (!%p279_p2), %s1131_s28, 1  ;;  %s1323_s24 = smov (!%p279_p2), 120  }
   0x6   : > { %282 = sbr.rel (%p279_p2) target bundleno = 1525 (0x5f5), region = 52  ;;  %s1324_s25 = smov (!%p279_p2), 112  }
   0x7   : > { %s1325_s26 = smov (!%p279_p2), 104   ;;  %s1326_s16 = smov (!%p279_p2), 8  }
   0x8   : > { %s1327_s19 = smov (!%p279_p2), 16   ;;  %s1328_s20 = smov (!%p279_p2), 24  }
   0xb   : > { %s1535_s28 = smov (!%p317_p3, %s1131_s28), 1  ;;  %vm336_vm0 = vcmask 261120   ;;  %v1287_v3 = vld [vmem:[%s1530_s5 + $0x8] sm:$0xff]   ;;  %v1321_v4 = vmov 0.0   ;;  %v1288_v5 = vld [vmem:[%s1530_s5] sm:$0xff]   ;;  %vm1322_vm1 = vmmov 0  }
   0xc   : > { %s1385_s29 = sshll.u32 %s1535_s28, 3  ;;  %1199 = vmatprep.subr.bf16.mxu1 %v1321_v4  ;;  %1191 = vmatprep.subr.bf16.mxu0 %v1321_v4  ;;  %v1289_v6 = vld [vmem:[%s1529_s4 + $0x8] sm:$0xff]   ;;  %v1290_v9 = vld [vmem:[%s1529_s4] sm:$0xff]   ;;  %vm539_vm2 = vcmask 64512   ;;  %s327_s14 = scalar_lea.vmem %s1527_s2, %s1535_s28  ;;  %vm601_vm3 = vcmask 1043456   ;;  %vm991_vm4 = vcmask 130048  }
   0xd   : > { %s320_s10 = scalar_lea.vmem %s1525_s0, %s1385_s29  ;;  %1200 = vmatpush3.bf16.msra.mxu1 %v1287_v3  ;;  %s324_s17 = scalar_lea.vmem %s1526_s1, %s1385_s29  ;;  %1203 = vmatprep.mubr.msk.bf16.mxu1 %vm1322_vm1, %v1321_v4  ;;  %v1139_v14 = vld [vmem:[%s1528_s3] ss:$0 sm:$0xff]  ;;  %v1291_v31 = vld [vmem:[%s1531_s6 + $0x8] sm:$0xff]   ;;  %vm993_vm5 = vcmask 195584  }
   0xe   : > { %v1391_v0 = vld [vmem:[%s320_s10] sm:$0xff]  ;;  %1201 = vmatprep.subr.bf16.mxu1 %v1321_v4  ;;  %1195 = vmatprep.mubr.msk.bf16.mxu0 %vm1322_vm1, %v1321_v4  ;;  %s331_s23 = scalar_lea.vmem %s1533_s8, %s1385_s29 }
   0xf   : > { %v335_v1 = vmul.f32 %v1391_v0, %v1391_v0  ;;  %v352_v7 = vld [vmem:[%s324_s17] sm:$0xff]  ;;  %1192 = vmatpush3.bf16.msra.mxu0 %v1289_v6 }
  0x10   : > { %v354_v8 = vpack.c.bf16 %v352_v7, %v352_v7  ;;  %1193 = vmatprep.subr.bf16.mxu0 %v1321_v4  ;;  %v1292_v32 = vld [vmem:[%s1531_s6] sm:$0xff]  }
  0x11   : > { %v337_v2 = vsel %vm336_vm0, %v335_v1, 0.0  ;;  %1202 = vmatpush3.bf16.msra.mxu1 %v1288_v5  ;;  %v1149_v40 = vld [vmem:[%s327_s14] ss:$0 sm:$0xff] }
  0x12   : > { %338 = vadd.xlane.f32.xlu0 %v337_v2  ;;  %1215 = vmatprep.subr.bf16.mxu1 %v1321_v4 }
  0x13   : > { %1194 = vmatpush3.bf16.msra.mxu0 %v1290_v9 }
  0x14   : > { %1204 = vmatmul.mubr.msk.bf16.vlgmr.msra.gmra.mxu1 %vm336_vm0, %v354_v8  ;;  %1207 = vmatprep.subr.bf16.mxu0 %v1321_v4 }
  0x15   : > { %1217 = vmatprep.mubr.msk.bf16.mxu1 %vm1322_vm1, %v1321_v4 }
  0x9b   : > { %v339_v10 = vpop.xlane.xlu0 %338 }
  0x9c   : > { %v341_v11 = vmul.f32 0.03125, %v339_v10 }
  0x9e   : > { %v342_v12 = vadd.f32 1e-06, %v341_v11 }
  0xa0   : > { %1295 = vrsqrt.f32 %v342_v12 }
  0xad   : > { %v1296_v13 = vpop.eup %1295 }
  0xae   : > { %v344_v15 = vmul.f32 %v1296_v13, %v1391_v0 }
  0xb0   : > { %v351_v16 = vmul.f32 %v1139_v14, %v344_v15 }
  0xb2   : > { %v353_v17 = vpack.c.bf16 %v351_v16, %v351_v16 }
  0xb4   : > { %1196 = vmatmul.mubr.msk.bf16.vlgmr.msra.gmra.mxu0 %vm336_vm0, %v353_v17 }
  0xb5   : > { %1211 = vmatprep.mubr.msk.bf16.mxu0 %vm1322_vm1, %v1321_v4  ;;  %1208 = vmatpush3.bf16.msra.mxu0 %v1291_v31 }
  0xb6   : > { %1209 = vmatprep.subr.bf16.mxu0 %v1321_v4 }
  0xb9   : > { %1210 = vmatpush3.bf16.msra.mxu0 %v1292_v32 }
  0xba   : > { %1221 = vmatprep.subr.bf16.mxu0 %v1321_v4 }
  0xbc   : > { %1212 = vmatmul.mubr.msk.bf16.vlgmr.msra.gmra.mxu0 %vm336_vm0, %v354_v8 }
  0xbd   : > { %1223 = vmatprep.mubr.msk.bf16.mxu0 %vm1322_vm1, %v1321_v4 }
  0xd4   : > { %v467_v18 = vpop.f32.mrf.mxu1 }
  0xd5   : > { %v531_v19 = vpack.c.bf16 %v467_v18, %v467_v18 }
  0xd6   : > { %v1205_v20 = vpop.f32.mrf.mxu1 }
  0xd7   : > { %649 = vrot.lane.b32.xlu0 %v531_v19, %s1323_s24  ;;  %760 = vrot.lane.b32.xlu1 %v531_v19, %s1324_s25  ;;  %v544_v21 = vsel %vm539_vm2, %v531_v19, 0 }
  0xd8   : > { %v470_v22 = vpop.f32.mrf.mxu1  ;;  %1216 = vmatpush3.bf16.xpose.msra.mxu1 %v544_v21 }
  0xd9   : > { %1227 = vmatprep.subr.bf16.mxu1 %v1321_v4 }
  0xda   : > { %v1206_v23 = vpop.f32.mrf.mxu1 }
 0x149   : > { %v650_v24 = vpop.permute.xlu0 %649  ;;  %v761_v33 = vpop.permute.xlu1 %760 }
 0x14a   : > { %v655_v27 = vsel %vm539_vm2, %v650_v24, 0  ;;  %v766_v35 = vsel %vm539_vm2, %v761_v33, 0 }
 0x174   : > { %v408_v25 = vpop.f32.mrf.mxu0 }
 0x175   : > { %v530_v26 = vpack.c.bf16 %v408_v25, %v408_v25 }
 0x176   : > { %v1197_v28 = vpop.f32.mrf.mxu0 }
 0x177   : > { %646 = vrot.lane.b32.xlu1 %v530_v26, %s1323_s24  ;;  %1218 = vmatmul.mubr.msk.bf16.vlgmr.msra.gmra.mxu1 %vm539_vm2, %v530_v26 }
 0x178   : > { %v411_v29 = vpop.f32.mrf.mxu0  ;;  %1228 = vmatpush3.bf16.xpose.msra.mxu1 %v655_v27  ;;  %1229 = vmatprep.mubr.msk.bf16.mxu1 %vm1322_vm1, %v1321_v4 }
 0x179   : > { %1239 = vmatprep.subr.bf16.mxu1 %v1321_v4 }
 0x17a   : > { %v1198_v30 = vpop.f32.mrf.mxu0 }
 0x17b   : > { %758 = vrot.lane.b32.xlu1 %v530_v26, %s1324_s25 }
 0x17c   : > { %v523_v47 = vpop.f32.mrf.mxu0 }
 0x17d   : > { %v1474_v48 = vpack.c.bf16 %v523_v47, %v523_v47 }
 0x17e   : > { %v1213_v49 = vpop.f32.mrf.mxu0 }
 0x17f   : > { %870 = vrot.lane.b32.xlu1 %v531_v19, %s1325_s26  ;;  %v603_v50 = vsel %vm601_vm3, %v1474_v48, 0 }
 0x180   : > { %v526_v51 = vpop.f32.mrf.mxu0  ;;  %1222 = vmatpush3.bf16.msra.mxu0 %v603_v50 }
 0x181   : > { %1233 = vmatprep.subr.bf16.mxu0 %v1321_v4 }
 0x182   : > { %v1214_v52 = vpop.f32.mrf.mxu0 }
 0x183   : > { %868 = vrot.lane.b32.xlu1 %v530_v26, %s1325_s26 }
 0x1e9   : > { %v647_v34 = vpop.permute.xlu1 %646 }
 0x1ea   : > { %1230 = vmatmul.mubr.msk.bf16.vlgmr.msra.gmra.mxu1 %vm539_vm2, %v647_v34 }
 0x1eb   : > { %1240 = vmatpush3.bf16.xpose.msra.mxu1 %v766_v35  ;;  %1241 = vmatprep.mubr.msk.bf16.mxu1 %vm1322_vm1, %v1321_v4 }
 0x1ec   : > { %1251 = vmatprep.subr.bf16.mxu1 %v1321_v4 }
 0x1ed   : > { %v759_v36 = vpop.permute.xlu1 %758 }
 0x1f1   : > { %v871_v37 = vpop.permute.xlu1 %870 }
 0x1f2   : > { %v876_v38 = vsel %vm539_vm2, %v871_v37, 0  ;;  %1242 = vmatmul.mubr.msk.bf16.vlgmr.msra.gmra.mxu1 %vm539_vm2, %v759_v36 }
 0x1f3   : > { %1252 = vmatpush3.bf16.xpose.msra.mxu1 %v876_v38  ;;  %1253 = vmatprep.mubr.msk.bf16.mxu1 %vm1322_vm1, %v1321_v4 }
 0x1f4   : > { %1263 = vmatprep.subr.bf16.mxu1 %v1321_v4 }
 0x1f5   : > { %v869_v39 = vpop.permute.xlu1 %868 }
 0x1fa   : > { %1254 = vmatmul.mubr.msk.bf16.vlgmr.msra.gmra.mxu1 %vm539_vm2, %v869_v39 }
 0x1fb   : > { %1267 = vmatprep.mubr.msk.bf16.mxu1 %vm1322_vm1, %v1321_v4 }
 0x237   : > { %v580_v41 = vpop.f32.mrf.mxu1 }
 0x238   : > { %v581_v42 = vadd.f32 %v1149_v40, %v580_v41 }
 0x239   : > { %v1219_v43 = vpop.f32.mrf.mxu1 }
 0x23a   : > { %v586_v44 = vsel %vm539_vm2, %v581_v42, -inf }
 0x23b   : > { %587 = vmax.xlane.f32.xlu1 %v586_v44  ;;  %v583_v45 = vpop.f32.mrf.mxu1 }
 0x23d   : > { %v1220_v46 = vpop.f32.mrf.mxu1 }
 0x2aa   : > { %v691_v53 = vpop.f32.mrf.mxu1 }
 0x2ab   : > { %v692_v54 = vadd.f32 %v1149_v40, %v691_v53 }
 0x2ac   : > { %v1231_v55 = vpop.f32.mrf.mxu1 }
 0x2ad   : > { %v697_v56 = vsel %vm539_vm2, %v692_v54, -inf  ;;  %v1293_v55 = vld [vmem:[%s1532_s7 + $0x8] sm:$0xff]  }
 0x2ae   : > { %698 = vmax.xlane.f32.xlu0 %v697_v56  ;;  %v694_v57 = vpop.f32.mrf.mxu1  ;;  %1264 = vmatpush3.bf16.msra.mxu1 %v1293_v55 }
 0x2af   : > { %1265 = vmatprep.subr.bf16.mxu1 %v1321_v4 }
 0x2b0   : > { %v1232_v58 = vpop.f32.mrf.mxu1 }
 0x2b1   : > { %v1294_v58 = vld [vmem:[%s1532_s7] sm:$0xff]  }
 0x2b2   : > { %v802_v59 = vpop.f32.mrf.mxu1  ;;  %1266 = vmatpush3.bf16.msra.mxu1 %v1294_v58 }
 0x2b3   : > { %v803_v60 = vadd.f32 %v1149_v40, %v802_v59 }
 0x2b4   : > { %v1243_v61 = vpop.f32.mrf.mxu1 }
 0x2b5   : > { %v808_v62 = vsel %vm539_vm2, %v803_v60, -inf }
 0x2b6   : > { %809 = vmax.xlane.f32.xlu1 %v808_v62  ;;  %v805_v63 = vpop.f32.mrf.mxu1 }
 0x2b8   : > { %v1244_v1 = vpop.f32.mrf.mxu1 }
 0x2ba   : > { %v912_v2 = vpop.f32.mrf.mxu1 }
 0x2bb   : > { %v913_v3 = vadd.f32 %v1149_v40, %v912_v2 }
 0x2bc   : > { %v1255_v5 = vpop.f32.mrf.mxu1 }
 0x2bd   : > { %v918_v6 = vsel %vm539_vm2, %v913_v3, -inf }
 0x2be   : > { %919 = vmax.xlane.f32.xlu0 %v918_v6  ;;  %v915_v7 = vpop.f32.mrf.mxu1 }
 0x2c0   : > { %v1256_v8 = vpop.f32.mrf.mxu1 }
 0x2c4   : > { %v588_v9 = vpop.xlane.xlu1 %587 }
 0x2c5   : > { %v589_v10 = vsub.f32 %v581_v42, %v588_v9 }
 0x2c7   : > { %v590_v11 = vmul.f32 1.442695, %v589_v10 }
 0x2c9   : > { %1297 = vpow2.f32 %v590_v11 }
 0x2d6   : > { %v1298_v12 = vpop.eup %1297 }
 0x2d7   : > { %v592_v13 = vsel %vm539_vm2, %v1298_v12, 0.0 }
 0x2d8   : > { %593 = vadd.xlane.f32.xlu1 %v592_v13 }
 0x2e9   : > { %710 = vrot.lane.b32.xlu1 %v1474_v48, %s1323_s24 }
 0x337   : > { %v699_v14 = vpop.xlane.xlu0 %698 }
 0x338   : > { %v700_v15 = vsub.f32 %v692_v54, %v699_v14 }
 0x33a   : > { %v701_v16 = vmul.f32 1.442695, %v700_v15 }
 0x33c   : > { %1299 = vpow2.f32 %v701_v16 }
 0x33f   : > { %v810_v17 = vpop.xlane.xlu1 %809 }
 0x340   : > { %v811_v18 = vsub.f32 %v803_v60, %v810_v17 }
 0x342   : > { %v812_v19 = vmul.f32 1.442695, %v811_v18 }
 0x344   : > { %1301 = vpow2.f32 %v812_v19 }
 0x347   : > { %v920_v20 = vpop.xlane.xlu0 %919 }
 0x348   : > { %v921_v21 = vsub.f32 %v913_v3, %v920_v20 }
 0x349   : > { %v1300_v22 = vpop.eup %1299 }
 0x34a   : > { %v922_v23 = vmul.f32 1.442695, %v921_v21  ;;  %v703_v24 = vsel %vm539_vm2, %v1300_v22, 0.0 }
 0x34b   : > { %704 = vadd.xlane.f32.xlu0 %v703_v24 }
 0x34c   : > { %1303 = vpow2.f32 %v922_v23 }
 0x351   : > { %v1302_v25 = vpop.eup %1301 }
 0x352   : > { %v814_v26 = vsel %vm539_vm2, %v1302_v25, 0.0 }
 0x353   : > { %815 = vadd.xlane.f32.xlu1 %v814_v26 }
 0x359   : > { %v1304_v27 = vpop.eup %1303 }
 0x35a   : > { %v924_v28 = vsel %vm539_vm2, %v1304_v27, 0.0 }
 0x35b   : > { %925 = vadd.xlane.f32.xlu0 %v924_v28 }
 0x361   : > { %v594_v29 = vpop.xlane.xlu1 %593 }
 0x362   : > { %1305 = vrcp.f32 %v594_v29 }
 0x364   : > { %930 = vrot.lane.b32.xlu1 %v1474_v48, %s1325_s26 }
 0x365   : > { %v711_v31 = vpop.permute.xlu1 %710 }
 0x366   : > { %v716_v34 = vsel %vm601_vm3, %v711_v31, 0 }
 0x36f   : > { %v1306_v30 = vpop.eup %1305 }
 0x370   : > { %v596_v32 = vmul.f32 %v1306_v30, %v1298_v12 }
 0x371   : > { %820 = vrot.lane.b32.xlu0 %v1474_v48, %s1324_s25 }
 0x372   : > { %v597_v33 = vpack.c.bf16 %v596_v32, %v596_v32 }
 0x374   : > { %1224 = vmatmul.mubr.msk.bf16.vlgmr.msra.gmra.mxu0 %vm539_vm2, %v597_v33 }
 0x375   : > { %1234 = vmatpush3.bf16.msra.mxu0 %v716_v34  ;;  %1235 = vmatprep.mubr.msk.bf16.mxu0 %vm1322_vm1, %v1321_v4 }
 0x376   : > { %1245 = vmatprep.subr.bf16.mxu0 %v1321_v4 }
 0x3d4   : > { %v705_v35 = vpop.xlane.xlu0 %704 }
 0x3d5   : > { %1307 = vrcp.f32 %v705_v35 }
 0x3dc   : > { %v816_v36 = vpop.xlane.xlu1 %815 }
 0x3dd   : > { %1309 = vrcp.f32 %v816_v36 }
 0x3e0   : > { %v931_v45 = vpop.permute.xlu1 %930 }
 0x3e1   : > { %v936_v47 = vsel %vm601_vm3, %v931_v45, 0 }
 0x3e2   : > { %v1308_v37 = vpop.eup %1307 }
 0x3e3   : > { %v707_v38 = vmul.f32 %v1308_v37, %v1300_v22 }
 0x3e4   : > { %v926_v39 = vpop.xlane.xlu0 %925 }
 0x3e5   : > { %1311 = vrcp.f32 %v926_v39  ;;  %v708_v40 = vpack.c.bf16 %v707_v38, %v707_v38 }
 0x3e7   : > { %1236 = vmatmul.mubr.msk.bf16.vlgmr.msra.gmra.mxu0 %vm539_vm2, %v708_v40 }
 0x3e8   : > { %v821_v41 = vpop.permute.xlu0 %820  ;;  %1247 = vmatprep.mubr.msk.bf16.mxu0 %vm1322_vm1, %v1321_v4 }
 0x3e9   : > { %v826_v42 = vsel %vm601_vm3, %v821_v41, 0 }
 0x3ea   : > { %v1310_v43 = vpop.eup %1309  ;;  %1246 = vmatpush3.bf16.msra.mxu0 %v826_v42 }
 0x3eb   : > { %1257 = vmatprep.subr.bf16.mxu0 %v1321_v4  ;;  %v818_v44 = vmul.f32 %v1310_v43, %v1302_v25 }
 0x3ed   : > { %v819_v46 = vpack.c.bf16 %v818_v44, %v818_v44 }
 0x3ef   : > { %1248 = vmatmul.mubr.msk.bf16.vlgmr.msra.gmra.mxu0 %vm539_vm2, %v819_v46 }
 0x3f0   : > { %1258 = vmatpush3.bf16.msra.mxu0 %v936_v47  ;;  %1259 = vmatprep.mubr.msk.bf16.mxu0 %vm1322_vm1, %v1321_v4 }
 0x3f2   : > { %v1312_v48 = vpop.eup %1311 }
 0x3f3   : > { %v928_v49 = vmul.f32 %v1312_v48, %v1304_v27 }
 0x3f5   : > { %v929_v50 = vpack.c.bf16 %v928_v49, %v928_v49 }
 0x3f7   : > { %1260 = vmatmul.mubr.msk.bf16.vlgmr.msra.gmra.mxu0 %vm539_vm2, %v929_v50 }
 0x434   : > { %v639_v51 = vpop.f32.mrf.mxu0 }
 0x436   : > { %v1225_v52 = vpop.f32.mrf.mxu0 }
 0x438   : > { %v642_v53 = vpop.f32.mrf.mxu0 }
 0x43a   : > { %v1226_v54 = vpop.f32.mrf.mxu0 }
 0x4a7   : > { %v752_v56 = vpop.f32.mrf.mxu0 }
 0x4a8   : > { %979 = vrot.lane.b32.xlu1 %v752_v56, %s1326_s16 }
 0x4a9   : > { %v1237_v57 = vpop.f32.mrf.mxu0 }
 0x4ab   : > { %v755_v59 = vpop.f32.mrf.mxu0 }
 0x4ad   : > { %v1238_v60 = vpop.f32.mrf.mxu0 }
 0x4af   : > { %v862_v61 = vpop.f32.mrf.mxu0 }
 0x4b0   : > { %983 = vrot.lane.b32.xlu0 %v862_v61, %s1327_s19 }
 0x4b1   : > { %v1249_v62 = vpop.f32.mrf.mxu0 }
 0x4b3   : > { %v865_v63 = vpop.f32.mrf.mxu0 }
 0x4b5   : > { %v1250_v1 = vpop.f32.mrf.mxu0 }
 0x4b7   : > { %v972_v2 = vpop.f32.mrf.mxu0 }
 0x4b8   : > { %987 = vrot.lane.b32.xlu1 %v972_v2, %s1328_s20 }
 0x4b9   : > { %v1261_v4 = vpop.f32.mrf.mxu0 }
 0x4bb   : > { %v975_v3 = vpop.f32.mrf.mxu0 }
 0x4bd   : > { %v1262_v5 = vpop.f32.mrf.mxu0 }
 0x51a   : > { %v980_v6 = vpop.permute.xlu1 %979 }
 0x51b   : > { %v990_v8 = vsel %vm539_vm2, %v639_v51, %v980_v6 }
 0x522   : > { %v984_v7 = vpop.permute.xlu0 %983 }
 0x523   : > { %v992_v9 = vsel %vm991_vm4, %v990_v8, %v984_v7 }
 0x52a   : > { %v988_v10 = vpop.permute.xlu1 %987 }
 0x52b   : > { %v994_v11 = vsel %vm993_vm5, %v992_v9, %v988_v10 }
 0x52c   : > { %v995_v12 = vpack.c.bf16 %v994_v11, %v994_v11 }
 0x52e   : > { %1268 = vmatmul.mubr.msk.bf16.vlgmr.msra.gmra.mxu1 %vm336_vm0, %v995_v12 }
 0x5ee   : > { %v1049_v13 = vpop.f32.mrf.mxu1 }
 0x5ef   : > { %v1055_v14 = vadd.f32 %v1049_v13, %v1391_v0 }
 0x5f0   : > { %v1269_v15 = vpop.f32.mrf.mxu1 }
 0x5f1   : > { %1056 = vst.msk [vmem:[%s331_s23] sm:$0xff] %vm336_vm0, %v1055_v14 }
 0x5f2   : > { %v1052_v16 = vpop.f32.mrf.mxu1 }
 0x5f4   : > { %v1270_v17 = vpop.f32.mrf.mxu1 }
 0x5f5 PF: > { %s18_s27 = sadd.s32 1, %s1319_s27  }
 0x5f6   : > { %p15_p4 = scmp.ge.s32.totalorder %s18_s27, 4  }
 0x5f8   :  { %17 = sbr.rel (!%p15_p4) target bundleno = 1 (0x1), region = 88 }

</bundles_post_ra>
